<compile_context>
chip_gen: v5e
topology: v5e:2x2
jax: 0.10.0
libtpu: 0.0.40
codegen_flags: <defaults>
</compile_context>

<pallas_src>
import numpy as np
import jax
import jax.numpy as jnp
from jax.experimental import pallas as pl
from jax.experimental.pallas import tpu as pltpu

EPS = 1e-5
DEPTH = 32
NUM_CLASSES = 21
IN_CHANNELS = 3
IN_CHANNELS_PAD = 8           # pad Cin 3 -> 8 for the MXU / sublane tiling
HEAD_PAD = 128                # lane-dense head output, sliced to 21 outside
BACKBONE_CHANNELS = (8, 16, 32)
H_IN = W_IN = 16
N_BATCH = 2


# ---------------------------------------------------------------------------
# In-kernel helpers
# ---------------------------------------------------------------------------
def _relu6(v):
    return jnp.clip(v, 0.0, 6.0)


def _mm(a, b):
    return jnp.dot(a, b, preferred_element_type=jnp.float32)


def _bn_train(y, scale=None):
    """BatchNorm2d (train mode, gamma=1, beta=0) on a row-stacked
    (N*spatial, C) matrix.  Two-pass variance (mean, then centered sum of
    squares); an optional scalar `scale` is folded into the (1, C) inv_std
    row instead of scaling the full tensor."""
    inv_count = 1.0 / y.shape[0]
    mean = jnp.sum(y, axis=0, keepdims=True) * inv_count
    d = y - mean
    var = jnp.sum(d * d, axis=0, keepdims=True) * inv_count
    inv_std = jax.lax.rsqrt(var + EPS)
    if scale is not None:
        inv_std = inv_std * scale
    return d * inv_std


# ---------------------------------------------------------------------------
# The single fused kernel: backbone + GAP + 3 decoders + head
# ---------------------------------------------------------------------------
def _make_kernel(w_layout, c_layout):
    """Build the fused kernel with the packed-slab layouts closed over."""

    def kernel(dec_w_ref, x_ref, w_ref, c_ref, out_ref):
        # Static slab slices at the point of use (cheap VMEM reloads, no
        # hoisted full-tile constant loads held live across the kernel).
        def wmat(name):
            off, r, c = w_layout[name]
            return w_ref[off:off + r, :c]

        def cmat(name):
            off, r, c = c_layout[name]
            return c_ref[off:off + r, :c]

        def up_to(y, tgt_rows):
            if y.shape[0] == tgt_rows:          # identity
                return y
            return _mm(cmat(('up', y.shape[0], tgt_rows)), y)   # bilinear, align_corners=True

        # -------- synthetic backbone: (1x1 conv -> ReLU6 -> 2x2 avg-pool) x3
        h1 = _mm(cmat('pool1'), _relu6(_mm(x_ref[...], wmat('bw1'))))   # (N*64,  8)
        h2 = _mm(cmat('pool2'), _relu6(_mm(h1, wmat('bw2'))))           # (N*16, 16)
        h3 = _mm(cmat('pool3'), _relu6(_mm(h2, wmat('bw3'))))           # (N*4,  32)
        # adaptive_avg_pool2d(., 1), replicated over the 2x2 grid (BN-invariant)
        gap = _mm(cmat('gap'), h3)                                      # (N*4,  32)

        down_feats = [h3, h2, h1]           # deepest-first, like the reference
        up_feats = [gap]

        # ------------------------------ decoders ---------------------------
        out = None
        flat = 0
        for idx in range(len(down_feats)):
            tgt = down_feats[idx].shape[0]      # target stacked spatial rows
            acc = None
            for j in range(idx + 1):
                w_d = dec_w_ref[2 * (flat + j)]
                w_u = dec_w_ref[2 * (flat + j) + 1]
                # ReLU6 -> 1x1 conv -> BatchNorm (batch stats over N*spatial),
                # decoder scale folded into the BN inv_std row.
                d_br = _bn_train(_mm(_relu6(down_feats[j]), wmat(('d', idx, j))), scale=w_d)
                u_br = _bn_train(_mm(_relu6(up_feats[j]), wmat(('u', idx, j))), scale=w_u)
                term = up_to(d_br, tgt) + up_to(u_br, tgt)
                acc = term if acc is None else acc + term
            out = _bn_train(acc)                # decoder-level BN
            flat += idx + 1
            if idx < len(down_feats) - 1:
                up_feats.append(out)

        # ------------- head: ReLU6 -> 1x1 conv (bias); one lane-dense store
        out_ref[...] = _mm(_relu6(out), wmat('fc_w')) + wmat('fc_b')

    return kernel


# ---------------------------------------------------------------------------
# Host-side constant matrices (pool / bilinear interp on flattened spatial)
# ---------------------------------------------------------------------------
def _interp_matrix_1d(out_size, in_size):
    if out_size == in_size:
        return np.eye(out_size, dtype=np.float32)
    if in_size == 1:
        return np.ones((out_size, 1), np.float32)
    m = np.zeros((out_size, in_size), np.float32)
    src = np.arange(out_size, dtype=np.float64) * (in_size - 1) / (out_size - 1)
    lo = np.clip(np.floor(src).astype(np.int64), 0, in_size - 2)
    frac = (src - lo).astype(np.float32)
    rows = np.arange(out_size)
    m[rows, lo] += 1.0 - frac
    m[rows, lo + 1] += frac
    return m


def _upsample_matrix(out_hw, in_hw):
    a = _interp_matrix_1d(out_hw, in_hw)
    return np.kron(a, a).astype(np.float32)        # row-major flattened spatial


def _pool_matrix(in_hw):
    out_hw = in_hw // 2
    p = np.zeros((out_hw, in_hw), np.float32)
    idx = np.arange(out_hw)
    p[idx, 2 * idx] = 0.5
    p[idx, 2 * idx + 1] = 0.5
    return np.kron(p, p).astype(np.float32)        # 2x2 avg pool, stride 2


# ---------------------------------------------------------------------------
# Slab packing (one weight slab, one constant slab; 8-row aligned blocks)
# ---------------------------------------------------------------------------
def _round8(n):
    return -(-n // 8) * 8


def _pack_np(named_blocks, width):
    layout, parts, off = {}, [], 0
    for name, a in named_blocks:
        a = np.asarray(a, np.float32)
        r, c = a.shape
        rp = _round8(r)
        buf = np.zeros((rp, width), np.float32)
        buf[:r, :c] = a
        parts.append(buf)
        layout[name] = (off, r, c)
        off += rp
    return layout, np.concatenate(parts, axis=0)


def _pack_jnp(named_blocks, width):
    layout, parts, off = {}, [], 0
    for name, a in named_blocks:
        r, c = a.shape
        rp = _round8(r)
        parts.append(jnp.pad(a, ((0, rp - r), (0, width - c))))
        layout[name] = (off, r, c)
        off += rp
    return layout, jnp.concatenate(parts, axis=0)


# ---------------------------------------------------------------------------
# Parameter init (kaiming-normal fan_out for 1x1 convs) and forward wrapper
# ---------------------------------------------------------------------------
def init_params(key):
    keys = iter(jax.random.split(key, 64))

    def kaiming(shape):   # shape = (Cin, Cout); fan_out = Cout for a 1x1 conv
        return jax.random.normal(next(keys), shape, jnp.float32) * (2.0 / shape[1]) ** 0.5

    backbone_ws = []
    prev = IN_CHANNELS
    for c in BACKBONE_CHANNELS:
        backbone_ws.append(kaiming((prev, c)))
        prev = c

    down_channels = list(BACKBONE_CHANNELS)[::-1]              # [32, 16, 8]
    up_channels = down_channels[:1] + [DEPTH] * (len(down_channels) - 1)
    decoders = []
    for idx in range(len(down_channels)):
        decoders.append({
            'down_ws': [kaiming((c, DEPTH)) for c in down_channels[:idx + 1]],
            'up_ws': [kaiming((c, DEPTH)) for c in up_channels[:idx + 1]],
            'weight_': jnp.ones((idx + 1, 2), jnp.float32),
        })

    return {
        'backbone': backbone_ws,
        'decoders': decoders,
        'fc_w': kaiming((DEPTH, NUM_CLASSES)),
        'fc_b': jnp.zeros((1, NUM_CLASSES), jnp.float32),      # init.constant_(bias, 0)
    }


def sparse_mask_forward(params, x_nhwc, noise_key):
    n, h, w, c = x_nhwc.shape

    # input: pad Cin 3 -> 8 and row-stack the batch: (N*H*W, 8)
    x_flat = jnp.pad(x_nhwc, ((0, 0), (0, 0), (0, 0), (0, IN_CHANNELS_PAD - c)))
    x_flat = x_flat.reshape(n * h * w, IN_CHANNELS_PAD)

    # ---- ONE packed weight slab: backbone + decoder convs + head ----------
    dec = params['decoders']
    w_blocks = [
        ('bw1', jnp.pad(params['backbone'][0], ((0, IN_CHANNELS_PAD - c), (0, 0)))),
        ('bw2', params['backbone'][1]),
        ('bw3', params['backbone'][2]),
    ]
    for idx in range(len(dec)):
        for j in range(idx + 1):
            w_blocks.append((('d', idx, j), dec[idx]['down_ws'][j]))
        for j in range(idx + 1):
            w_blocks.append((('u', idx, j), dec[idx]['up_ws'][j]))
    w_blocks.append(('fc_w', jnp.pad(params['fc_w'], ((0, 0), (0, HEAD_PAD - NUM_CLASSES)))))
    w_blocks.append(('fc_b', jnp.pad(params['fc_b'], ((0, 0), (0, HEAD_PAD - NUM_CLASSES)))))
    w_layout, w_slab = _pack_jnp(w_blocks, HEAD_PAD)          # (400, 128) f32

    # ---- ONE packed constant slab: pool / GAP / bilinear, batch-stacked ---
    eye_n = np.eye(n, dtype=np.float32)
    sides = [h // 8, h // 4, h // 2]                          # per-sample 2, 4, 8
    gap_sp = sides[0] * sides[0]
    c_blocks = [
        ('pool1', np.kron(eye_n, _pool_matrix(h))),           # 16x16 -> 8x8
        ('pool2', np.kron(eye_n, _pool_matrix(h // 2))),      # 8x8  -> 4x4
        ('pool3', np.kron(eye_n, _pool_matrix(h // 4))),      # 4x4  -> 2x2
        # GAP, replicated over the 2x2 grid (BN-stat invariant, keeps 8 sublanes)
        ('gap', np.kron(eye_n, np.full((gap_sp, gap_sp), 1.0 / gap_sp, np.float32))),
    ]
    for si, s_src in enumerate(sides):
        for s_tgt in sides[si + 1:]:
            key = ('up', n * s_src * s_src, n * s_tgt * s_tgt)
            c_blocks.append((key, np.kron(eye_n, _upsample_matrix(s_tgt, s_src))))
    c_layout, c_slab_np = _pack_np(c_blocks, n * h * w)       # (464, 512) f32
    c_slab = jnp.asarray(c_slab_np)

    # ---- decoder scale weights (train mode): clamp(w_ + 0.1*randn, 0, 2) --
    nkeys = jax.random.split(noise_key, len(dec))
    rows = []
    for idx, d in enumerate(dec):
        noise = jax.random.normal(nkeys[idx], d['weight_'].shape, jnp.float32)
        rows.append(jnp.clip(d['weight_'] + 0.1 * noise, 0.0, 2.0))
    dec_w = jnp.concatenate(rows, axis=0).reshape(-1)         # (12,) flat [w_d, w_u]

    out_rows = n * sides[-1] * sides[-1]                      # N * 64 (8x8 per sample)
    cost = pl.CostEstimate(
        flops=10_000_000,
        transcendentals=16 * DEPTH,
        bytes_accessed=4 * (x_flat.size + w_slab.size + c_slab.size
                            + dec_w.size + out_rows * HEAD_PAD),
    )

    vmem = pl.BlockSpec(memory_space=pltpu.MemorySpace.VMEM)
    smem = pl.BlockSpec(memory_space=pltpu.MemorySpace.SMEM)

    out = pl.pallas_call(
        _make_kernel(w_layout, c_layout),
        out_shape=jax.ShapeDtypeStruct((out_rows, HEAD_PAD), jnp.float32),
        in_specs=[smem, vmem, vmem, vmem],
        out_specs=vmem,
        cost_estimate=cost,
    )(dec_w, x_flat, w_slab, c_slab)

    # slice the lane-padded head output back to NUM_CLASSES and un-flatten
    return out[:, :NUM_CLASSES].reshape(n, h // 2, w // 2, NUM_CLASSES)


if __name__ == "__main__":
    key = jax.random.PRNGKey(0)
    pkey, xkey, nkey = jax.random.split(key, 3)

    params = init_params(pkey)
    x_nchw = jax.random.normal(xkey, (N_BATCH, IN_CHANNELS, H_IN, W_IN), jnp.float32)
    x_nhwc = jnp.transpose(x_nchw, (0, 2, 3, 1))        # NCHW -> NHWC

    fwd = jax.jit(sparse_mask_forward)
    out_nhwc = fwd(params, x_nhwc, nkey)
    out_nchw = jnp.transpose(out_nhwc, (0, 3, 1, 2))    # back to NCHW
    jax.block_until_ready(out_nchw)

    assert out_nchw.shape == (N_BATCH, NUM_CLASSES, H_IN // 2, W_IN // 2), out_nchw.shape
    assert bool(jnp.all(jnp.isfinite(out_nchw)))
    print("KERNEL_OK")
</pallas_src>

<mosaic_0001>
module attributes {stable_mosaic.version = 11 : i64} {
  func.func @kernel(%arg0: memref<12xf32, #tpu.memory_space<smem>>, %arg1: memref<512x8xf32, #tpu.memory_space<vmem>>, %arg2: memref<400x128xf32, #tpu.memory_space<vmem>>, %arg3: memref<464x512xf32, #tpu.memory_space<vmem>>, %arg4: memref<128x128xf32, #tpu.memory_space<vmem>>) attributes {dimension_semantics = [], scalar_prefetch = 0 : i64, scratch_operands = 0 : i64, tpu.core_type = #tpu.core_type<tc>} {
    %c0 = arith.constant 0 : index
    %c0_0 = arith.constant 0 : index
    %0 = vector.load %arg3[%c0, %c0_0] : memref<464x512xf32, #tpu.memory_space<vmem>>, vector<128x512xf32>
    %c0_1 = arith.constant 0 : index
    %c0_2 = arith.constant 0 : index
    %1 = vector.load %arg1[%c0_1, %c0_2] : memref<512x8xf32, #tpu.memory_space<vmem>>, vector<512x8xf32>
    %c0_3 = arith.constant 0 : index
    %c0_4 = arith.constant 0 : index
    %2 = vector.load %arg2[%c0_3, %c0_4] : memref<400x128xf32, #tpu.memory_space<vmem>>, vector<8x8xf32>
    %cst = arith.constant dense<0.000000e+00> : vector<512x8xf32>
    %3 = tpu.matmul %1, %2, %cst {dimension_numbers = #tpu.dot_dimension_numbers<[1], [0], [0], [1], [0, 0, 1, 1], [], []>} : vector<512x8xf32>, vector<8x8xf32>, vector<512x8xf32> -> vector<512x8xf32>
    %cst_5 = arith.constant 0.000000e+00 : f32
    %cst_6 = arith.constant 6.000000e+00 : f32
    %4 = vector.broadcast %cst_5 : f32 to vector<512x8xf32>
    %5 = arith.maximumf %4, %3 : vector<512x8xf32>
    %6 = vector.broadcast %cst_6 : f32 to vector<512x8xf32>
    %7 = arith.minimumf %6, %5 : vector<512x8xf32>
    %cst_7 = arith.constant dense<0.000000e+00> : vector<128x8xf32>
    %8 = tpu.matmul %0, %7, %cst_7 {dimension_numbers = #tpu.dot_dimension_numbers<[1], [0], [0], [1], [0, 0, 1, 1], [], []>} : vector<128x512xf32>, vector<512x8xf32>, vector<128x8xf32> -> vector<128x8xf32>
    %c128 = arith.constant 128 : index
    %c0_8 = arith.constant 0 : index
    %9 = vector.load %arg3[%c128, %c0_8] : memref<464x512xf32, #tpu.memory_space<vmem>>, vector<32x128xf32>
    %c8 = arith.constant 8 : index
    %c0_9 = arith.constant 0 : index
    %10 = vector.load %arg2[%c8, %c0_9] : memref<400x128xf32, #tpu.memory_space<vmem>>, vector<8x16xf32>
    %cst_10 = arith.constant dense<0.000000e+00> : vector<128x16xf32>
    %11 = tpu.matmul %8, %10, %cst_10 {dimension_numbers = #tpu.dot_dimension_numbers<[1], [0], [0], [1], [0, 0, 1, 1], [], []>} : vector<128x8xf32>, vector<8x16xf32>, vector<128x16xf32> -> vector<128x16xf32>
    %cst_11 = arith.constant 0.000000e+00 : f32
    %cst_12 = arith.constant 6.000000e+00 : f32
    %12 = vector.broadcast %cst_11 : f32 to vector<128x16xf32>
    %13 = arith.maximumf %12, %11 : vector<128x16xf32>
    %14 = vector.broadcast %cst_12 : f32 to vector<128x16xf32>
    %15 = arith.minimumf %14, %13 : vector<128x16xf32>
    %cst_13 = arith.constant dense<0.000000e+00> : vector<32x16xf32>
    %16 = tpu.matmul %9, %15, %cst_13 {dimension_numbers = #tpu.dot_dimension_numbers<[1], [0], [0], [1], [0, 0, 1, 1], [], []>} : vector<32x128xf32>, vector<128x16xf32>, vector<32x16xf32> -> vector<32x16xf32>
    %c160 = arith.constant 160 : index
    %c0_14 = arith.constant 0 : index
    %17 = vector.load %arg3[%c160, %c0_14] : memref<464x512xf32, #tpu.memory_space<vmem>>, vector<8x32xf32>
    %c16 = arith.constant 16 : index
    %c0_15 = arith.constant 0 : index
    %18 = vector.load %arg2[%c16, %c0_15] : memref<400x128xf32, #tpu.memory_space<vmem>>, vector<16x32xf32>
    %cst_16 = arith.constant dense<0.000000e+00> : vector<32x32xf32>
    %19 = tpu.matmul %16, %18, %cst_16 {dimension_numbers = #tpu.dot_dimension_numbers<[1], [0], [0], [1], [0, 0, 1, 1], [], []>} : vector<32x16xf32>, vector<16x32xf32>, vector<32x32xf32> -> vector<32x32xf32>
    %cst_17 = arith.constant 0.000000e+00 : f32
    %cst_18 = arith.constant 6.000000e+00 : f32
    %20 = vector.broadcast %cst_17 : f32 to vector<32x32xf32>
    %21 = arith.maximumf %20, %19 : vector<32x32xf32>
    %22 = vector.broadcast %cst_18 : f32 to vector<32x32xf32>
    %23 = arith.minimumf %22, %21 : vector<32x32xf32>
    %cst_19 = arith.constant dense<0.000000e+00> : vector<8x32xf32>
    %24 = tpu.matmul %17, %23, %cst_19 {dimension_numbers = #tpu.dot_dimension_numbers<[1], [0], [0], [1], [0, 0, 1, 1], [], []>} : vector<8x32xf32>, vector<32x32xf32>, vector<8x32xf32> -> vector<8x32xf32>
    %c168 = arith.constant 168 : index
    %c0_20 = arith.constant 0 : index
    %25 = vector.load %arg3[%c168, %c0_20] : memref<464x512xf32, #tpu.memory_space<vmem>>, vector<8x8xf32>
    %cst_21 = arith.constant dense<0.000000e+00> : vector<8x32xf32>
    %26 = tpu.matmul %25, %24, %cst_21 {dimension_numbers = #tpu.dot_dimension_numbers<[1], [0], [0], [1], [0, 0, 1, 1], [], []>} : vector<8x8xf32>, vector<8x32xf32>, vector<8x32xf32> -> vector<8x32xf32>
    %c0_22 = arith.constant 0 : index
    %27 = memref.load %arg0[%c0_22] : memref<12xf32, #tpu.memory_space<smem>>
    %c1 = arith.constant 1 : index
    %28 = memref.load %arg0[%c1] : memref<12xf32, #tpu.memory_space<smem>>
    %cst_23 = arith.constant 0.000000e+00 : f32
    %cst_24 = arith.constant 6.000000e+00 : f32
    %29 = vector.broadcast %cst_23 : f32 to vector<8x32xf32>
    %30 = arith.maximumf %29, %24 : vector<8x32xf32>
    %31 = vector.broadcast %cst_24 : f32 to vector<8x32xf32>
    %32 = arith.minimumf %31, %30 : vector<8x32xf32>
    %c32 = arith.constant 32 : index
    %c0_25 = arith.constant 0 : index
    %33 = vector.load %arg2[%c32, %c0_25] : memref<400x128xf32, #tpu.memory_space<vmem>>, vector<32x32xf32>
    %cst_26 = arith.constant dense<0.000000e+00> : vector<8x32xf32>
    %34 = tpu.matmul %32, %33, %cst_26 {dimension_numbers = #tpu.dot_dimension_numbers<[1], [0], [0], [1], [0, 0, 1, 1], [], []>} : vector<8x32xf32>, vector<32x32xf32>, vector<8x32xf32> -> vector<8x32xf32>
    %cst_27 = arith.constant dense<0.000000e+00> : vector<32xf32>
    %35 = vector.multi_reduction <add>, %34, %cst_27 [0] : vector<8x32xf32> to vector<32xf32>
    %36 = vector.shape_cast %35 : vector<32xf32> to vector<1x32xf32>
    %cst_28 = arith.constant 1.250000e-01 : f32
    %37 = vector.broadcast %cst_28 : f32 to vector<1x32xf32>
    %38 = arith.mulf %36, %37 : vector<1x32xf32>
    %39 = vector.broadcast %38 : vector<1x32xf32> to vector<8x32xf32>
    %40 = arith.subf %34, %39 : vector<8x32xf32>
    %41 = arith.mulf %40, %40 : vector<8x32xf32>
    %cst_29 = arith.constant dense<0.000000e+00> : vector<32xf32>
    %42 = vector.multi_reduction <add>, %41, %cst_29 [0] : vector<8x32xf32> to vector<32xf32>
    %43 = vector.shape_cast %42 : vector<32xf32> to vector<1x32xf32>
    %cst_30 = arith.constant 1.250000e-01 : f32
    %44 = vector.broadcast %cst_30 : f32 to vector<1x32xf32>
    %45 = arith.mulf %43, %44 : vector<1x32xf32>
    %cst_31 = arith.constant 9.99999974E-6 : f32
    %46 = vector.broadcast %cst_31 : f32 to vector<1x32xf32>
    %47 = arith.addf %45, %46 : vector<1x32xf32>
    %48 = math.rsqrt %47 : vector<1x32xf32>
    %49 = vector.broadcast %27 : f32 to vector<1x32xf32>
    %50 = arith.mulf %48, %49 : vector<1x32xf32>
    %51 = vector.broadcast %50 : vector<1x32xf32> to vector<8x32xf32>
    %52 = arith.mulf %40, %51 : vector<8x32xf32>
    %cst_32 = arith.constant 0.000000e+00 : f32
    %cst_33 = arith.constant 6.000000e+00 : f32
    %53 = vector.broadcast %cst_32 : f32 to vector<8x32xf32>
    %54 = arith.maximumf %53, %26 : vector<8x32xf32>
    %55 = vector.broadcast %cst_33 : f32 to vector<8x32xf32>
    %56 = arith.minimumf %55, %54 : vector<8x32xf32>
    %c64 = arith.constant 64 : index
    %c0_34 = arith.constant 0 : index
    %57 = vector.load %arg2[%c64, %c0_34] : memref<400x128xf32, #tpu.memory_space<vmem>>, vector<32x32xf32>
    %cst_35 = arith.constant dense<0.000000e+00> : vector<8x32xf32>
    %58 = tpu.matmul %56, %57, %cst_35 {dimension_numbers = #tpu.dot_dimension_numbers<[1], [0], [0], [1], [0, 0, 1, 1], [], []>} : vector<8x32xf32>, vector<32x32xf32>, vector<8x32xf32> -> vector<8x32xf32>
    %cst_36 = arith.constant dense<0.000000e+00> : vector<32xf32>
    %59 = vector.multi_reduction <add>, %58, %cst_36 [0] : vector<8x32xf32> to vector<32xf32>
    %60 = vector.shape_cast %59 : vector<32xf32> to vector<1x32xf32>
    %cst_37 = arith.constant 1.250000e-01 : f32
    %61 = vector.broadcast %cst_37 : f32 to vector<1x32xf32>
    %62 = arith.mulf %60, %61 : vector<1x32xf32>
    %63 = vector.broadcast %62 : vector<1x32xf32> to vector<8x32xf32>
    %64 = arith.subf %58, %63 : vector<8x32xf32>
    %65 = arith.mulf %64, %64 : vector<8x32xf32>
    %cst_38 = arith.constant dense<0.000000e+00> : vector<32xf32>
    %66 = vector.multi_reduction <add>, %65, %cst_38 [0] : vector<8x32xf32> to vector<32xf32>
    %67 = vector.shape_cast %66 : vector<32xf32> to vector<1x32xf32>
    %cst_39 = arith.constant 1.250000e-01 : f32
    %68 = vector.broadcast %cst_39 : f32 to vector<1x32xf32>
    %69 = arith.mulf %67, %68 : vector<1x32xf32>
    %cst_40 = arith.constant 9.99999974E-6 : f32
    %70 = vector.broadcast %cst_40 : f32 to vector<1x32xf32>
    %71 = arith.addf %69, %70 : vector<1x32xf32>
    %72 = math.rsqrt %71 : vector<1x32xf32>
    %73 = vector.broadcast %28 : f32 to vector<1x32xf32>
    %74 = arith.mulf %72, %73 : vector<1x32xf32>
    %75 = vector.broadcast %74 : vector<1x32xf32> to vector<8x32xf32>
    %76 = arith.mulf %64, %75 : vector<8x32xf32>
    %77 = arith.addf %52, %76 : vector<8x32xf32>
    %cst_41 = arith.constant dense<0.000000e+00> : vector<32xf32>
    %78 = vector.multi_reduction <add>, %77, %cst_41 [0] : vector<8x32xf32> to vector<32xf32>
    %79 = vector.shape_cast %78 : vector<32xf32> to vector<1x32xf32>
    %cst_42 = arith.constant 1.250000e-01 : f32
    %80 = vector.broadcast %cst_42 : f32 to vector<1x32xf32>
    %81 = arith.mulf %79, %80 : vector<1x32xf32>
    %82 = vector.broadcast %81 : vector<1x32xf32> to vector<8x32xf32>
    %83 = arith.subf %77, %82 : vector<8x32xf32>
    %84 = arith.mulf %83, %83 : vector<8x32xf32>
    %cst_43 = arith.constant dense<0.000000e+00> : vector<32xf32>
    %85 = vector.multi_reduction <add>, %84, %cst_43 [0] : vector<8x32xf32> to vector<32xf32>
    %86 = vector.shape_cast %85 : vector<32xf32> to vector<1x32xf32>
    %cst_44 = arith.constant 1.250000e-01 : f32
    %87 = vector.broadcast %cst_44 : f32 to vector<1x32xf32>
    %88 = arith.mulf %86, %87 : vector<1x32xf32>
    %cst_45 = arith.constant 9.99999974E-6 : f32
    %89 = vector.broadcast %cst_45 : f32 to vector<1x32xf32>
    %90 = arith.addf %88, %89 : vector<1x32xf32>
    %91 = math.rsqrt %90 : vector<1x32xf32>
    %92 = vector.broadcast %91 : vector<1x32xf32> to vector<8x32xf32>
    %93 = arith.mulf %83, %92 : vector<8x32xf32>
    %c2 = arith.constant 2 : index
    %94 = memref.load %arg0[%c2] : memref<12xf32, #tpu.memory_space<smem>>
    %c3 = arith.constant 3 : index
    %95 = memref.load %arg0[%c3] : memref<12xf32, #tpu.memory_space<smem>>
    %cst_46 = arith.constant 0.000000e+00 : f32
    %cst_47 = arith.constant 6.000000e+00 : f32
    %96 = vector.broadcast %cst_46 : f32 to vector<8x32xf32>
    %97 = arith.maximumf %96, %24 : vector<8x32xf32>
    %98 = vector.broadcast %cst_47 : f32 to vector<8x32xf32>
    %99 = arith.minimumf %98, %97 : vector<8x32xf32>
    %c96 = arith.constant 96 : index
    %c0_48 = arith.constant 0 : index
    %100 = vector.load %arg2[%c96, %c0_48] : memref<400x128xf32, #tpu.memory_space<vmem>>, vector<32x32xf32>
    %cst_49 = arith.constant dense<0.000000e+00> : vector<8x32xf32>
    %101 = tpu.matmul %99, %100, %cst_49 {dimension_numbers = #tpu.dot_dimension_numbers<[1], [0], [0], [1], [0, 0, 1, 1], [], []>} : vector<8x32xf32>, vector<32x32xf32>, vector<8x32xf32> -> vector<8x32xf32>
    %cst_50 = arith.constant dense<0.000000e+00> : vector<32xf32>
    %102 = vector.multi_reduction <add>, %101, %cst_50 [0] : vector<8x32xf32> to vector<32xf32>
    %103 = vector.shape_cast %102 : vector<32xf32> to vector<1x32xf32>
    %cst_51 = arith.constant 1.250000e-01 : f32
    %104 = vector.broadcast %cst_51 : f32 to vector<1x32xf32>
    %105 = arith.mulf %103, %104 : vector<1x32xf32>
    %106 = vector.broadcast %105 : vector<1x32xf32> to vector<8x32xf32>
    %107 = arith.subf %101, %106 : vector<8x32xf32>
    %108 = arith.mulf %107, %107 : vector<8x32xf32>
    %cst_52 = arith.constant dense<0.000000e+00> : vector<32xf32>
    %109 = vector.multi_reduction <add>, %108, %cst_52 [0] : vector<8x32xf32> to vector<32xf32>
    %110 = vector.shape_cast %109 : vector<32xf32> to vector<1x32xf32>
    %cst_53 = arith.constant 1.250000e-01 : f32
    %111 = vector.broadcast %cst_53 : f32 to vector<1x32xf32>
    %112 = arith.mulf %110, %111 : vector<1x32xf32>
    %cst_54 = arith.constant 9.99999974E-6 : f32
    %113 = vector.broadcast %cst_54 : f32 to vector<1x32xf32>
    %114 = arith.addf %112, %113 : vector<1x32xf32>
    %115 = math.rsqrt %114 : vector<1x32xf32>
    %116 = vector.broadcast %94 : f32 to vector<1x32xf32>
    %117 = arith.mulf %115, %116 : vector<1x32xf32>
    %118 = vector.broadcast %117 : vector<1x32xf32> to vector<8x32xf32>
    %119 = arith.mulf %107, %118 : vector<8x32xf32>
    %cst_55 = arith.constant 0.000000e+00 : f32
    %cst_56 = arith.constant 6.000000e+00 : f32
    %120 = vector.broadcast %cst_55 : f32 to vector<8x32xf32>
    %121 = arith.maximumf %120, %26 : vector<8x32xf32>
    %122 = vector.broadcast %cst_56 : f32 to vector<8x32xf32>
    %123 = arith.minimumf %122, %121 : vector<8x32xf32>
    %c144 = arith.constant 144 : index
    %c0_57 = arith.constant 0 : index
    %124 = vector.load %arg2[%c144, %c0_57] : memref<400x128xf32, #tpu.memory_space<vmem>>, vector<32x32xf32>
    %cst_58 = arith.constant dense<0.000000e+00> : vector<8x32xf32>
    %125 = tpu.matmul %123, %124, %cst_58 {dimension_numbers = #tpu.dot_dimension_numbers<[1], [0], [0], [1], [0, 0, 1, 1], [], []>} : vector<8x32xf32>, vector<32x32xf32>, vector<8x32xf32> -> vector<8x32xf32>
    %cst_59 = arith.constant dense<0.000000e+00> : vector<32xf32>
    %126 = vector.multi_reduction <add>, %125, %cst_59 [0] : vector<8x32xf32> to vector<32xf32>
    %127 = vector.shape_cast %126 : vector<32xf32> to vector<1x32xf32>
    %cst_60 = arith.constant 1.250000e-01 : f32
    %128 = vector.broadcast %cst_60 : f32 to vector<1x32xf32>
    %129 = arith.mulf %127, %128 : vector<1x32xf32>
    %130 = vector.broadcast %129 : vector<1x32xf32> to vector<8x32xf32>
    %131 = arith.subf %125, %130 : vector<8x32xf32>
    %132 = arith.mulf %131, %131 : vector<8x32xf32>
    %cst_61 = arith.constant dense<0.000000e+00> : vector<32xf32>
    %133 = vector.multi_reduction <add>, %132, %cst_61 [0] : vector<8x32xf32> to vector<32xf32>
    %134 = vector.shape_cast %133 : vector<32xf32> to vector<1x32xf32>
    %cst_62 = arith.constant 1.250000e-01 : f32
    %135 = vector.broadcast %cst_62 : f32 to vector<1x32xf32>
    %136 = arith.mulf %134, %135 : vector<1x32xf32>
    %cst_63 = arith.constant 9.99999974E-6 : f32
    %137 = vector.broadcast %cst_63 : f32 to vector<1x32xf32>
    %138 = arith.addf %136, %137 : vector<1x32xf32>
    %139 = math.rsqrt %138 : vector<1x32xf32>
    %140 = vector.broadcast %95 : f32 to vector<1x32xf32>
    %141 = arith.mulf %139, %140 : vector<1x32xf32>
    %142 = vector.broadcast %141 : vector<1x32xf32> to vector<8x32xf32>
    %143 = arith.mulf %131, %142 : vector<8x32xf32>
    %c176 = arith.constant 176 : index
    %c0_64 = arith.constant 0 : index
    %144 = vector.load %arg3[%c176, %c0_64] : memref<464x512xf32, #tpu.memory_space<vmem>>, vector<32x8xf32>
    %cst_65 = arith.constant dense<0.000000e+00> : vector<32x32xf32>
    %145 = tpu.matmul %144, %119, %cst_65 {dimension_numbers = #tpu.dot_dimension_numbers<[1], [0], [0], [1], [0, 0, 1, 1], [], []>} : vector<32x8xf32>, vector<8x32xf32>, vector<32x32xf32> -> vector<32x32xf32>
    %c176_66 = arith.constant 176 : index
    %c0_67 = arith.constant 0 : index
    %146 = vector.load %arg3[%c176_66, %c0_67] : memref<464x512xf32, #tpu.memory_space<vmem>>, vector<32x8xf32>
    %cst_68 = arith.constant dense<0.000000e+00> : vector<32x32xf32>
    %147 = tpu.matmul %146, %143, %cst_68 {dimension_numbers = #tpu.dot_dimension_numbers<[1], [0], [0], [1], [0, 0, 1, 1], [], []>} : vector<32x8xf32>, vector<8x32xf32>, vector<32x32xf32> -> vector<32x32xf32>
    %148 = arith.addf %145, %147 : vector<32x32xf32>
    %c4 = arith.constant 4 : index
    %149 = memref.load %arg0[%c4] : memref<12xf32, #tpu.memory_space<smem>>
    %c5 = arith.constant 5 : index
    %150 = memref.load %arg0[%c5] : memref<12xf32, #tpu.memory_space<smem>>
    %cst_69 = arith.constant 0.000000e+00 : f32
    %cst_70 = arith.constant 6.000000e+00 : f32
    %151 = vector.broadcast %cst_69 : f32 to vector<32x16xf32>
    %152 = arith.maximumf %151, %16 : vector<32x16xf32>
    %153 = vector.broadcast %cst_70 : f32 to vector<32x16xf32>
    %154 = arith.minimumf %153, %152 : vector<32x16xf32>
    %c128_71 = arith.constant 128 : index
    %c0_72 = arith.constant 0 : index
    %155 = vector.load %arg2[%c128_71, %c0_72] : memref<400x128xf32, #tpu.memory_space<vmem>>, vector<16x32xf32>
    %cst_73 = arith.constant dense<0.000000e+00> : vector<32x32xf32>
    %156 = tpu.matmul %154, %155, %cst_73 {dimension_numbers = #tpu.dot_dimension_numbers<[1], [0], [0], [1], [0, 0, 1, 1], [], []>} : vector<32x16xf32>, vector<16x32xf32>, vector<32x32xf32> -> vector<32x32xf32>
    %cst_74 = arith.constant dense<0.000000e+00> : vector<32xf32>
    %157 = vector.multi_reduction <add>, %156, %cst_74 [0] : vector<32x32xf32> to vector<32xf32>
    %158 = vector.shape_cast %157 : vector<32xf32> to vector<1x32xf32>
    %cst_75 = arith.constant 3.125000e-02 : f32
    %159 = vector.broadcast %cst_75 : f32 to vector<1x32xf32>
    %160 = arith.mulf %158, %159 : vector<1x32xf32>
    %161 = vector.broadcast %160 : vector<1x32xf32> to vector<32x32xf32>
    %162 = arith.subf %156, %161 : vector<32x32xf32>
    %163 = arith.mulf %162, %162 : vector<32x32xf32>
    %cst_76 = arith.constant dense<0.000000e+00> : vector<32xf32>
    %164 = vector.multi_reduction <add>, %163, %cst_76 [0] : vector<32x32xf32> to vector<32xf32>
    %165 = vector.shape_cast %164 : vector<32xf32> to vector<1x32xf32>
    %cst_77 = arith.constant 3.125000e-02 : f32
    %166 = vector.broadcast %cst_77 : f32 to vector<1x32xf32>
    %167 = arith.mulf %165, %166 : vector<1x32xf32>
    %cst_78 = arith.constant 9.99999974E-6 : f32
    %168 = vector.broadcast %cst_78 : f32 to vector<1x32xf32>
    %169 = arith.addf %167, %168 : vector<1x32xf32>
    %170 = math.rsqrt %169 : vector<1x32xf32>
    %171 = vector.broadcast %149 : f32 to vector<1x32xf32>
    %172 = arith.mulf %170, %171 : vector<1x32xf32>
    %173 = vector.broadcast %172 : vector<1x32xf32> to vector<32x32xf32>
    %174 = arith.mulf %162, %173 : vector<32x32xf32>
    %cst_79 = arith.constant 0.000000e+00 : f32
    %cst_80 = arith.constant 6.000000e+00 : f32
    %175 = vector.broadcast %cst_79 : f32 to vector<8x32xf32>
    %176 = arith.maximumf %175, %93 : vector<8x32xf32>
    %177 = vector.broadcast %cst_80 : f32 to vector<8x32xf32>
    %178 = arith.minimumf %177, %176 : vector<8x32xf32>
    %c176_81 = arith.constant 176 : index
    %c0_82 = arith.constant 0 : index
    %179 = vector.load %arg2[%c176_81, %c0_82] : memref<400x128xf32, #tpu.memory_space<vmem>>, vector<32x32xf32>
    %cst_83 = arith.constant dense<0.000000e+00> : vector<8x32xf32>
    %180 = tpu.matmul %178, %179, %cst_83 {dimension_numbers = #tpu.dot_dimension_numbers<[1], [0], [0], [1], [0, 0, 1, 1], [], []>} : vector<8x32xf32>, vector<32x32xf32>, vector<8x32xf32> -> vector<8x32xf32>
    %cst_84 = arith.constant dense<0.000000e+00> : vector<32xf32>
    %181 = vector.multi_reduction <add>, %180, %cst_84 [0] : vector<8x32xf32> to vector<32xf32>
    %182 = vector.shape_cast %181 : vector<32xf32> to vector<1x32xf32>
    %cst_85 = arith.constant 1.250000e-01 : f32
    %183 = vector.broadcast %cst_85 : f32 to vector<1x32xf32>
    %184 = arith.mulf %182, %183 : vector<1x32xf32>
    %185 = vector.broadcast %184 : vector<1x32xf32> to vector<8x32xf32>
    %186 = arith.subf %180, %185 : vector<8x32xf32>
    %187 = arith.mulf %186, %186 : vector<8x32xf32>
    %cst_86 = arith.constant dense<0.000000e+00> : vector<32xf32>
    %188 = vector.multi_reduction <add>, %187, %cst_86 [0] : vector<8x32xf32> to vector<32xf32>
    %189 = vector.shape_cast %188 : vector<32xf32> to vector<1x32xf32>
    %cst_87 = arith.constant 1.250000e-01 : f32
    %190 = vector.broadcast %cst_87 : f32 to vector<1x32xf32>
    %191 = arith.mulf %189, %190 : vector<1x32xf32>
    %cst_88 = arith.constant 9.99999974E-6 : f32
    %192 = vector.broadcast %cst_88 : f32 to vector<1x32xf32>
    %193 = arith.addf %191, %192 : vector<1x32xf32>
    %194 = math.rsqrt %193 : vector<1x32xf32>
    %195 = vector.broadcast %150 : f32 to vector<1x32xf32>
    %196 = arith.mulf %194, %195 : vector<1x32xf32>
    %197 = vector.broadcast %196 : vector<1x32xf32> to vector<8x32xf32>
    %198 = arith.mulf %186, %197 : vector<8x32xf32>
    %c176_89 = arith.constant 176 : index
    %c0_90 = arith.constant 0 : index
    %199 = vector.load %arg3[%c176_89, %c0_90] : memref<464x512xf32, #tpu.memory_space<vmem>>, vector<32x8xf32>
    %cst_91 = arith.constant dense<0.000000e+00> : vector<32x32xf32>
    %200 = tpu.matmul %199, %198, %cst_91 {dimension_numbers = #tpu.dot_dimension_numbers<[1], [0], [0], [1], [0, 0, 1, 1], [], []>} : vector<32x8xf32>, vector<8x32xf32>, vector<32x32xf32> -> vector<32x32xf32>
    %201 = arith.addf %174, %200 : vector<32x32xf32>
    %202 = arith.addf %148, %201 : vector<32x32xf32>
    %cst_92 = arith.constant dense<0.000000e+00> : vector<32xf32>
    %203 = vector.multi_reduction <add>, %202, %cst_92 [0] : vector<32x32xf32> to vector<32xf32>
    %204 = vector.shape_cast %203 : vector<32xf32> to vector<1x32xf32>
    %cst_93 = arith.constant 3.125000e-02 : f32
    %205 = vector.broadcast %cst_93 : f32 to vector<1x32xf32>
    %206 = arith.mulf %204, %205 : vector<1x32xf32>
    %207 = vector.broadcast %206 : vector<1x32xf32> to vector<32x32xf32>
    %208 = arith.subf %202, %207 : vector<32x32xf32>
    %209 = arith.mulf %208, %208 : vector<32x32xf32>
    %cst_94 = arith.constant dense<0.000000e+00> : vector<32xf32>
    %210 = vector.multi_reduction <add>, %209, %cst_94 [0] : vector<32x32xf32> to vector<32xf32>
    %211 = vector.shape_cast %210 : vector<32xf32> to vector<1x32xf32>
    %cst_95 = arith.constant 3.125000e-02 : f32
    %212 = vector.broadcast %cst_95 : f32 to vector<1x32xf32>
    %213 = arith.mulf %211, %212 : vector<1x32xf32>
    %cst_96 = arith.constant 9.99999974E-6 : f32
    %214 = vector.broadcast %cst_96 : f32 to vector<1x32xf32>
    %215 = arith.addf %213, %214 : vector<1x32xf32>
    %216 = math.rsqrt %215 : vector<1x32xf32>
    %217 = vector.broadcast %216 : vector<1x32xf32> to vector<32x32xf32>
    %218 = arith.mulf %208, %217 : vector<32x32xf32>
    %c6 = arith.constant 6 : index
    %219 = memref.load %arg0[%c6] : memref<12xf32, #tpu.memory_space<smem>>
    %c7 = arith.constant 7 : index
    %220 = memref.load %arg0[%c7] : memref<12xf32, #tpu.memory_space<smem>>
    %cst_97 = arith.constant 0.000000e+00 : f32
    %cst_98 = arith.constant 6.000000e+00 : f32
    %221 = vector.broadcast %cst_97 : f32 to vector<8x32xf32>
    %222 = arith.maximumf %221, %24 : vector<8x32xf32>
    %223 = vector.broadcast %cst_98 : f32 to vector<8x32xf32>
    %224 = arith.minimumf %223, %222 : vector<8x32xf32>
    %c208 = arith.constant 208 : index
    %c0_99 = arith.constant 0 : index
    %225 = vector.load %arg2[%c208, %c0_99] : memref<400x128xf32, #tpu.memory_space<vmem>>, vector<32x32xf32>
    %cst_100 = arith.constant dense<0.000000e+00> : vector<8x32xf32>
    %226 = tpu.matmul %224, %225, %cst_100 {dimension_numbers = #tpu.dot_dimension_numbers<[1], [0], [0], [1], [0, 0, 1, 1], [], []>} : vector<8x32xf32>, vector<32x32xf32>, vector<8x32xf32> -> vector<8x32xf32>
    %cst_101 = arith.constant dense<0.000000e+00> : vector<32xf32>
    %227 = vector.multi_reduction <add>, %226, %cst_101 [0] : vector<8x32xf32> to vector<32xf32>
    %228 = vector.shape_cast %227 : vector<32xf32> to vector<1x32xf32>
    %cst_102 = arith.constant 1.250000e-01 : f32
    %229 = vector.broadcast %cst_102 : f32 to vector<1x32xf32>
    %230 = arith.mulf %228, %229 : vector<1x32xf32>
    %231 = vector.broadcast %230 : vector<1x32xf32> to vector<8x32xf32>
    %232 = arith.subf %226, %231 : vector<8x32xf32>
    %233 = arith.mulf %232, %232 : vector<8x32xf32>
    %cst_103 = arith.constant dense<0.000000e+00> : vector<32xf32>
    %234 = vector.multi_reduction <add>, %233, %cst_103 [0] : vector<8x32xf32> to vector<32xf32>
    %235 = vector.shape_cast %234 : vector<32xf32> to vector<1x32xf32>
    %cst_104 = arith.constant 1.250000e-01 : f32
    %236 = vector.broadcast %cst_104 : f32 to vector<1x32xf32>
    %237 = arith.mulf %235, %236 : vector<1x32xf32>
    %cst_105 = arith.constant 9.99999974E-6 : f32
    %238 = vector.broadcast %cst_105 : f32 to vector<1x32xf32>
    %239 = arith.addf %237, %238 : vector<1x32xf32>
    %240 = math.rsqrt %239 : vector<1x32xf32>
    %241 = vector.broadcast %219 : f32 to vector<1x32xf32>
    %242 = arith.mulf %240, %241 : vector<1x32xf32>
    %243 = vector.broadcast %242 : vector<1x32xf32> to vector<8x32xf32>
    %244 = arith.mulf %232, %243 : vector<8x32xf32>
    %cst_106 = arith.constant 0.000000e+00 : f32
    %cst_107 = arith.constant 6.000000e+00 : f32
    %245 = vector.broadcast %cst_106 : f32 to vector<8x32xf32>
    %246 = arith.maximumf %245, %26 : vector<8x32xf32>
    %247 = vector.broadcast %cst_107 : f32 to vector<8x32xf32>
    %248 = arith.minimumf %247, %246 : vector<8x32xf32>
    %c264 = arith.constant 264 : index
    %c0_108 = arith.constant 0 : index
    %249 = vector.load %arg2[%c264, %c0_108] : memref<400x128xf32, #tpu.memory_space<vmem>>, vector<32x32xf32>
    %cst_109 = arith.constant dense<0.000000e+00> : vector<8x32xf32>
    %250 = tpu.matmul %248, %249, %cst_109 {dimension_numbers = #tpu.dot_dimension_numbers<[1], [0], [0], [1], [0, 0, 1, 1], [], []>} : vector<8x32xf32>, vector<32x32xf32>, vector<8x32xf32> -> vector<8x32xf32>
    %cst_110 = arith.constant dense<0.000000e+00> : vector<32xf32>
    %251 = vector.multi_reduction <add>, %250, %cst_110 [0] : vector<8x32xf32> to vector<32xf32>
    %252 = vector.shape_cast %251 : vector<32xf32> to vector<1x32xf32>
    %cst_111 = arith.constant 1.250000e-01 : f32
    %253 = vector.broadcast %cst_111 : f32 to vector<1x32xf32>
    %254 = arith.mulf %252, %253 : vector<1x32xf32>
    %255 = vector.broadcast %254 : vector<1x32xf32> to vector<8x32xf32>
    %256 = arith.subf %250, %255 : vector<8x32xf32>
    %257 = arith.mulf %256, %256 : vector<8x32xf32>
    %cst_112 = arith.constant dense<0.000000e+00> : vector<32xf32>
    %258 = vector.multi_reduction <add>, %257, %cst_112 [0] : vector<8x32xf32> to vector<32xf32>
    %259 = vector.shape_cast %258 : vector<32xf32> to vector<1x32xf32>
    %cst_113 = arith.constant 1.250000e-01 : f32
    %260 = vector.broadcast %cst_113 : f32 to vector<1x32xf32>
    %261 = arith.mulf %259, %260 : vector<1x32xf32>
    %cst_114 = arith.constant 9.99999974E-6 : f32
    %262 = vector.broadcast %cst_114 : f32 to vector<1x32xf32>
    %263 = arith.addf %261, %262 : vector<1x32xf32>
    %264 = math.rsqrt %263 : vector<1x32xf32>
    %265 = vector.broadcast %220 : f32 to vector<1x32xf32>
    %266 = arith.mulf %264, %265 : vector<1x32xf32>
    %267 = vector.broadcast %266 : vector<1x32xf32> to vector<8x32xf32>
    %268 = arith.mulf %256, %267 : vector<8x32xf32>
    %c208_115 = arith.constant 208 : index
    %c0_116 = arith.constant 0 : index
    %269 = vector.load %arg3[%c208_115, %c0_116] : memref<464x512xf32, #tpu.memory_space<vmem>>, vector<128x8xf32>
    %cst_117 = arith.constant dense<0.000000e+00> : vector<128x32xf32>
    %270 = tpu.matmul %269, %244, %cst_117 {dimension_numbers = #tpu.dot_dimension_numbers<[1], [0], [0], [1], [0, 0, 1, 1], [], []>} : vector<128x8xf32>, vector<8x32xf32>, vector<128x32xf32> -> vector<128x32xf32>
    %c208_118 = arith.constant 208 : index
    %c0_119 = arith.constant 0 : index
    %271 = vector.load %arg3[%c208_118, %c0_119] : memref<464x512xf32, #tpu.memory_space<vmem>>, vector<128x8xf32>
    %cst_120 = arith.constant dense<0.000000e+00> : vector<128x32xf32>
    %272 = tpu.matmul %271, %268, %cst_120 {dimension_numbers = #tpu.dot_dimension_numbers<[1], [0], [0], [1], [0, 0, 1, 1], [], []>} : vector<128x8xf32>, vector<8x32xf32>, vector<128x32xf32> -> vector<128x32xf32>
    %273 = arith.addf %270, %272 : vector<128x32xf32>
    %c8_121 = arith.constant 8 : index
    %274 = memref.load %arg0[%c8_121] : memref<12xf32, #tpu.memory_space<smem>>
    %c9 = arith.constant 9 : index
    %275 = memref.load %arg0[%c9] : memref<12xf32, #tpu.memory_space<smem>>
    %cst_122 = arith.constant 0.000000e+00 : f32
    %cst_123 = arith.constant 6.000000e+00 : f32
    %276 = vector.broadcast %cst_122 : f32 to vector<32x16xf32>
    %277 = arith.maximumf %276, %16 : vector<32x16xf32>
    %278 = vector.broadcast %cst_123 : f32 to vector<32x16xf32>
    %279 = arith.minimumf %278, %277 : vector<32x16xf32>
    %c240 = arith.constant 240 : index
    %c0_124 = arith.constant 0 : index
    %280 = vector.load %arg2[%c240, %c0_124] : memref<400x128xf32, #tpu.memory_space<vmem>>, vector<16x32xf32>
    %cst_125 = arith.constant dense<0.000000e+00> : vector<32x32xf32>
    %281 = tpu.matmul %279, %280, %cst_125 {dimension_numbers = #tpu.dot_dimension_numbers<[1], [0], [0], [1], [0, 0, 1, 1], [], []>} : vector<32x16xf32>, vector<16x32xf32>, vector<32x32xf32> -> vector<32x32xf32>
    %cst_126 = arith.constant dense<0.000000e+00> : vector<32xf32>
    %282 = vector.multi_reduction <add>, %281, %cst_126 [0] : vector<32x32xf32> to vector<32xf32>
    %283 = vector.shape_cast %282 : vector<32xf32> to vector<1x32xf32>
    %cst_127 = arith.constant 3.125000e-02 : f32
    %284 = vector.broadcast %cst_127 : f32 to vector<1x32xf32>
    %285 = arith.mulf %283, %284 : vector<1x32xf32>
    %286 = vector.broadcast %285 : vector<1x32xf32> to vector<32x32xf32>
    %287 = arith.subf %281, %286 : vector<32x32xf32>
    %288 = arith.mulf %287, %287 : vector<32x32xf32>
    %cst_128 = arith.constant dense<0.000000e+00> : vector<32xf32>
    %289 = vector.multi_reduction <add>, %288, %cst_128 [0] : vector<32x32xf32> to vector<32xf32>
    %290 = vector.shape_cast %289 : vector<32xf32> to vector<1x32xf32>
    %cst_129 = arith.constant 3.125000e-02 : f32
    %291 = vector.broadcast %cst_129 : f32 to vector<1x32xf32>
    %292 = arith.mulf %290, %291 : vector<1x32xf32>
    %cst_130 = arith.constant 9.99999974E-6 : f32
    %293 = vector.broadcast %cst_130 : f32 to vector<1x32xf32>
    %294 = arith.addf %292, %293 : vector<1x32xf32>
    %295 = math.rsqrt %294 : vector<1x32xf32>
    %296 = vector.broadcast %274 : f32 to vector<1x32xf32>
    %297 = arith.mulf %295, %296 : vector<1x32xf32>
    %298 = vector.broadcast %297 : vector<1x32xf32> to vector<32x32xf32>
    %299 = arith.mulf %287, %298 : vector<32x32xf32>
    %cst_131 = arith.constant 0.000000e+00 : f32
    %cst_132 = arith.constant 6.000000e+00 : f32
    %300 = vector.broadcast %cst_131 : f32 to vector<8x32xf32>
    %301 = arith.maximumf %300, %93 : vector<8x32xf32>
    %302 = vector.broadcast %cst_132 : f32 to vector<8x32xf32>
    %303 = arith.minimumf %302, %301 : vector<8x32xf32>
    %c296 = arith.constant 296 : index
    %c0_133 = arith.constant 0 : index
    %304 = vector.load %arg2[%c296, %c0_133] : memref<400x128xf32, #tpu.memory_space<vmem>>, vector<32x32xf32>
    %cst_134 = arith.constant dense<0.000000e+00> : vector<8x32xf32>
    %305 = tpu.matmul %303, %304, %cst_134 {dimension_numbers = #tpu.dot_dimension_numbers<[1], [0], [0], [1], [0, 0, 1, 1], [], []>} : vector<8x32xf32>, vector<32x32xf32>, vector<8x32xf32> -> vector<8x32xf32>
    %cst_135 = arith.constant dense<0.000000e+00> : vector<32xf32>
    %306 = vector.multi_reduction <add>, %305, %cst_135 [0] : vector<8x32xf32> to vector<32xf32>
    %307 = vector.shape_cast %306 : vector<32xf32> to vector<1x32xf32>
    %cst_136 = arith.constant 1.250000e-01 : f32
    %308 = vector.broadcast %cst_136 : f32 to vector<1x32xf32>
    %309 = arith.mulf %307, %308 : vector<1x32xf32>
    %310 = vector.broadcast %309 : vector<1x32xf32> to vector<8x32xf32>
    %311 = arith.subf %305, %310 : vector<8x32xf32>
    %312 = arith.mulf %311, %311 : vector<8x32xf32>
    %cst_137 = arith.constant dense<0.000000e+00> : vector<32xf32>
    %313 = vector.multi_reduction <add>, %312, %cst_137 [0] : vector<8x32xf32> to vector<32xf32>
    %314 = vector.shape_cast %313 : vector<32xf32> to vector<1x32xf32>
    %cst_138 = arith.constant 1.250000e-01 : f32
    %315 = vector.broadcast %cst_138 : f32 to vector<1x32xf32>
    %316 = arith.mulf %314, %315 : vector<1x32xf32>
    %cst_139 = arith.constant 9.99999974E-6 : f32
    %317 = vector.broadcast %cst_139 : f32 to vector<1x32xf32>
    %318 = arith.addf %316, %317 : vector<1x32xf32>
    %319 = math.rsqrt %318 : vector<1x32xf32>
    %320 = vector.broadcast %275 : f32 to vector<1x32xf32>
    %321 = arith.mulf %319, %320 : vector<1x32xf32>
    %322 = vector.broadcast %321 : vector<1x32xf32> to vector<8x32xf32>
    %323 = arith.mulf %311, %322 : vector<8x32xf32>
    %c336 = arith.constant 336 : index
    %c0_140 = arith.constant 0 : index
    %324 = vector.load %arg3[%c336, %c0_140] : memref<464x512xf32, #tpu.memory_space<vmem>>, vector<128x32xf32>
    %cst_141 = arith.constant dense<0.000000e+00> : vector<128x32xf32>
    %325 = tpu.matmul %324, %299, %cst_141 {dimension_numbers = #tpu.dot_dimension_numbers<[1], [0], [0], [1], [0, 0, 1, 1], [], []>} : vector<128x32xf32>, vector<32x32xf32>, vector<128x32xf32> -> vector<128x32xf32>
    %c208_142 = arith.constant 208 : index
    %c0_143 = arith.constant 0 : index
    %326 = vector.load %arg3[%c208_142, %c0_143] : memref<464x512xf32, #tpu.memory_space<vmem>>, vector<128x8xf32>
    %cst_144 = arith.constant dense<0.000000e+00> : vector<128x32xf32>
    %327 = tpu.matmul %326, %323, %cst_144 {dimension_numbers = #tpu.dot_dimension_numbers<[1], [0], [0], [1], [0, 0, 1, 1], [], []>} : vector<128x8xf32>, vector<8x32xf32>, vector<128x32xf32> -> vector<128x32xf32>
    %328 = arith.addf %325, %327 : vector<128x32xf32>
    %329 = arith.addf %273, %328 : vector<128x32xf32>
    %c10 = arith.constant 10 : index
    %330 = memref.load %arg0[%c10] : memref<12xf32, #tpu.memory_space<smem>>
    %c11 = arith.constant 11 : index
    %331 = memref.load %arg0[%c11] : memref<12xf32, #tpu.memory_space<smem>>
    %cst_145 = arith.constant 0.000000e+00 : f32
    %cst_146 = arith.constant 6.000000e+00 : f32
    %332 = vector.broadcast %cst_145 : f32 to vector<128x8xf32>
    %333 = arith.maximumf %332, %8 : vector<128x8xf32>
    %334 = vector.broadcast %cst_146 : f32 to vector<128x8xf32>
    %335 = arith.minimumf %334, %333 : vector<128x8xf32>
    %c256 = arith.constant 256 : index
    %c0_147 = arith.constant 0 : index
    %336 = vector.load %arg2[%c256, %c0_147] : memref<400x128xf32, #tpu.memory_space<vmem>>, vector<8x32xf32>
    %cst_148 = arith.constant dense<0.000000e+00> : vector<128x32xf32>
    %337 = tpu.matmul %335, %336, %cst_148 {dimension_numbers = #tpu.dot_dimension_numbers<[1], [0], [0], [1], [0, 0, 1, 1], [], []>} : vector<128x8xf32>, vector<8x32xf32>, vector<128x32xf32> -> vector<128x32xf32>
    %cst_149 = arith.constant dense<0.000000e+00> : vector<32xf32>
    %338 = vector.multi_reduction <add>, %337, %cst_149 [0] : vector<128x32xf32> to vector<32xf32>
    %339 = vector.shape_cast %338 : vector<32xf32> to vector<1x32xf32>
    %cst_150 = arith.constant 7.812500e-03 : f32
    %340 = vector.broadcast %cst_150 : f32 to vector<1x32xf32>
    %341 = arith.mulf %339, %340 : vector<1x32xf32>
    %342 = vector.broadcast %341 : vector<1x32xf32> to vector<128x32xf32>
    %343 = arith.subf %337, %342 : vector<128x32xf32>
    %344 = arith.mulf %343, %343 : vector<128x32xf32>
    %cst_151 = arith.constant dense<0.000000e+00> : vector<32xf32>
    %345 = vector.multi_reduction <add>, %344, %cst_151 [0] : vector<128x32xf32> to vector<32xf32>
    %346 = vector.shape_cast %345 : vector<32xf32> to vector<1x32xf32>
    %cst_152 = arith.constant 7.812500e-03 : f32
    %347 = vector.broadcast %cst_152 : f32 to vector<1x32xf32>
    %348 = arith.mulf %346, %347 : vector<1x32xf32>
    %cst_153 = arith.constant 9.99999974E-6 : f32
    %349 = vector.broadcast %cst_153 : f32 to vector<1x32xf32>
    %350 = arith.addf %348, %349 : vector<1x32xf32>
    %351 = math.rsqrt %350 : vector<1x32xf32>
    %352 = vector.broadcast %330 : f32 to vector<1x32xf32>
    %353 = arith.mulf %351, %352 : vector<1x32xf32>
    %354 = vector.broadcast %353 : vector<1x32xf32> to vector<128x32xf32>
    %355 = arith.mulf %343, %354 : vector<128x32xf32>
    %cst_154 = arith.constant 0.000000e+00 : f32
    %cst_155 = arith.constant 6.000000e+00 : f32
    %356 = vector.broadcast %cst_154 : f32 to vector<32x32xf32>
    %357 = arith.maximumf %356, %218 : vector<32x32xf32>
    %358 = vector.broadcast %cst_155 : f32 to vector<32x32xf32>
    %359 = arith.minimumf %358, %357 : vector<32x32xf32>
    %c328 = arith.constant 328 : index
    %c0_156 = arith.constant 0 : index
    %360 = vector.load %arg2[%c328, %c0_156] : memref<400x128xf32, #tpu.memory_space<vmem>>, vector<32x32xf32>
    %cst_157 = arith.constant dense<0.000000e+00> : vector<32x32xf32>
    %361 = tpu.matmul %359, %360, %cst_157 {dimension_numbers = #tpu.dot_dimension_numbers<[1], [0], [0], [1], [0, 0, 1, 1], [], []>} : vector<32x32xf32>, vector<32x32xf32>, vector<32x32xf32> -> vector<32x32xf32>
    %cst_158 = arith.constant dense<0.000000e+00> : vector<32xf32>
    %362 = vector.multi_reduction <add>, %361, %cst_158 [0] : vector<32x32xf32> to vector<32xf32>
    %363 = vector.shape_cast %362 : vector<32xf32> to vector<1x32xf32>
    %cst_159 = arith.constant 3.125000e-02 : f32
    %364 = vector.broadcast %cst_159 : f32 to vector<1x32xf32>
    %365 = arith.mulf %363, %364 : vector<1x32xf32>
    %366 = vector.broadcast %365 : vector<1x32xf32> to vector<32x32xf32>
    %367 = arith.subf %361, %366 : vector<32x32xf32>
    %368 = arith.mulf %367, %367 : vector<32x32xf32>
    %cst_160 = arith.constant dense<0.000000e+00> : vector<32xf32>
    %369 = vector.multi_reduction <add>, %368, %cst_160 [0] : vector<32x32xf32> to vector<32xf32>
    %370 = vector.shape_cast %369 : vector<32xf32> to vector<1x32xf32>
    %cst_161 = arith.constant 3.125000e-02 : f32
    %371 = vector.broadcast %cst_161 : f32 to vector<1x32xf32>
    %372 = arith.mulf %370, %371 : vector<1x32xf32>
    %cst_162 = arith.constant 9.99999974E-6 : f32
    %373 = vector.broadcast %cst_162 : f32 to vector<1x32xf32>
    %374 = arith.addf %372, %373 : vector<1x32xf32>
    %375 = math.rsqrt %374 : vector<1x32xf32>
    %376 = vector.broadcast %331 : f32 to vector<1x32xf32>
    %377 = arith.mulf %375, %376 : vector<1x32xf32>
    %378 = vector.broadcast %377 : vector<1x32xf32> to vector<32x32xf32>
    %379 = arith.mulf %367, %378 : vector<32x32xf32>
    %c336_163 = arith.constant 336 : index
    %c0_164 = arith.constant 0 : index
    %380 = vector.load %arg3[%c336_163, %c0_164] : memref<464x512xf32, #tpu.memory_space<vmem>>, vector<128x32xf32>
    %cst_165 = arith.constant dense<0.000000e+00> : vector<128x32xf32>
    %381 = tpu.matmul %380, %379, %cst_165 {dimension_numbers = #tpu.dot_dimension_numbers<[1], [0], [0], [1], [0, 0, 1, 1], [], []>} : vector<128x32xf32>, vector<32x32xf32>, vector<128x32xf32> -> vector<128x32xf32>
    %382 = arith.addf %355, %381 : vector<128x32xf32>
    %383 = arith.addf %329, %382 : vector<128x32xf32>
    %cst_166 = arith.constant dense<0.000000e+00> : vector<32xf32>
    %384 = vector.multi_reduction <add>, %383, %cst_166 [0] : vector<128x32xf32> to vector<32xf32>
    %385 = vector.shape_cast %384 : vector<32xf32> to vector<1x32xf32>
    %cst_167 = arith.constant 7.812500e-03 : f32
    %386 = vector.broadcast %cst_167 : f32 to vector<1x32xf32>
    %387 = arith.mulf %385, %386 : vector<1x32xf32>
    %388 = vector.broadcast %387 : vector<1x32xf32> to vector<128x32xf32>
    %389 = arith.subf %383, %388 : vector<128x32xf32>
    %390 = arith.mulf %389, %389 : vector<128x32xf32>
    %cst_168 = arith.constant dense<0.000000e+00> : vector<32xf32>
    %391 = vector.multi_reduction <add>, %390, %cst_168 [0] : vector<128x32xf32> to vector<32xf32>
    %392 = vector.shape_cast %391 : vector<32xf32> to vector<1x32xf32>
    %cst_169 = arith.constant 7.812500e-03 : f32
    %393 = vector.broadcast %cst_169 : f32 to vector<1x32xf32>
    %394 = arith.mulf %392, %393 : vector<1x32xf32>
    %cst_170 = arith.constant 9.99999974E-6 : f32
    %395 = vector.broadcast %cst_170 : f32 to vector<1x32xf32>
    %396 = arith.addf %394, %395 : vector<1x32xf32>
    %397 = math.rsqrt %396 : vector<1x32xf32>
    %398 = vector.broadcast %397 : vector<1x32xf32> to vector<128x32xf32>
    %399 = arith.mulf %389, %398 : vector<128x32xf32>
    %cst_171 = arith.constant 0.000000e+00 : f32
    %cst_172 = arith.constant 6.000000e+00 : f32
    %400 = vector.broadcast %cst_171 : f32 to vector<128x32xf32>
    %401 = arith.maximumf %400, %399 : vector<128x32xf32>
    %402 = vector.broadcast %cst_172 : f32 to vector<128x32xf32>
    %403 = arith.minimumf %402, %401 : vector<128x32xf32>
    %c360 = arith.constant 360 : index
    %c0_173 = arith.constant 0 : index
    %404 = vector.load %arg2[%c360, %c0_173] : memref<400x128xf32, #tpu.memory_space<vmem>>, vector<32x128xf32>
    %cst_174 = arith.constant dense<0.000000e+00> : vector<128x128xf32>
    %405 = tpu.matmul %403, %404, %cst_174 {dimension_numbers = #tpu.dot_dimension_numbers<[1], [0], [0], [1], [0, 0, 1, 1], [], []>} : vector<128x32xf32>, vector<32x128xf32>, vector<128x128xf32> -> vector<128x128xf32>
    %c392 = arith.constant 392 : index
    %c0_175 = arith.constant 0 : index
    %406 = vector.load %arg2[%c392, %c0_175] : memref<400x128xf32, #tpu.memory_space<vmem>>, vector<1x128xf32>
    %407 = vector.broadcast %406 : vector<1x128xf32> to vector<128x128xf32>
    %408 = arith.addf %405, %407 : vector<128x128xf32>
    %c0_176 = arith.constant 0 : index
    %c0_177 = arith.constant 0 : index
    %409 = vector.load %arg4[%c0_176, %c0_177] : memref<128x128xf32, #tpu.memory_space<vmem>>, vector<128x128xf32>
    tpu.vector_store %arg4[%c0_176, %c0_177], %408 {strides = array<i32>} : memref<128x128xf32, #tpu.memory_space<vmem>>, vector<128x128xf32>,
    return
  }
}

</mosaic_0001>

<bundles_post_ra>
// kernel: sparse_mask_forward.3
= control target key start
LH: loop header
LB: loop body
LE: loop exit
PB: predicated region body
PF: predicated region fallthrough
CT: control target
= control target key end

     0   :  { %9 = vsyncpa [#allocation4], 0  ;;  %s5801_s0 = inlined_call_operand.vmem [shape: f32[12], index: 0, kind: input, shape index: {}]   ;;  %s5802_s1 = inlined_call_operand.vmem [shape: f32[512,8], index: 1, kind: input, shape index: {}]   ;;  %s5803_s2 = inlined_call_operand.vmem [shape: f32[400,128], index: 2, kind: input, shape index: {}]   ;;  %s5804_s3 = inlined_call_operand.vmem [shape: f32[464,512], index: 3, kind: input, shape index: {}]   ;;  %s5805_s4 = inlined_call_operand.hbm [shape: f32[128,128], index: 4, kind: output, shape index: {}]  }
   0x1   :  { %10 = vsyncpa [#allocation3], 0  ;;  %s16_s17 = sshll.u32 %s5801_s0, 4  ;;  %s3649_s18 = smov [#allocation2]   ;;  %s17_s17 = int_to_ptr.vmem [resolvable:$true] %s16_s17 }
   0x2   :  { %19 = dma.vmem_to_smem %s17_s17, 16, %s3649_s18, [#allocation4]  }
   0x3   :  { %3645 = dma.done.wait [#allocation4], 16  }
   0x4   :  { %3646 = vsyncadd [#allocation4], 4294967280 }
   0x5   :  { %30 = sfence }
   0x6   :  { %v159_v0 = vld [vmem:[%s5803_s2] sm:$0xff]  ;;  %vm160_vm0 = vcmask 64512   ;;  %v96_v2 = vld [vmem:[%s5802_s1 + $0x8] sm:$0xff]  ;;  %v97_v3 = vld [vmem:[%s5802_s1 + $0x10] sm:$0xff]  ;;  %vm1132_vm1 = vcmask 130048   ;;  %vm1182_vm2 = vcmask 261120  }
   0x7   :  { %v95_v1 = vld [vmem:[%s5802_s1] sm:$0xff]  ;;  %368 = vmatpush.msra.mxu0 %v159_v0  ;;  %v98_v4 = vld [vmem:[%s5802_s1 + $0x18] sm:$0xff]  ;;  %v100_v6 = vld [vmem:[%s5802_s1 + $0x28] sm:$0xff]  ;;  %s4558_s10 = sld [smem:[#allocation2]]  ;;  %s3652_s6 = smov 8  }
   0x8   :  { %3297 = vmatmul.msk.f32.vlgmr.msra.gmra.mxu0 %vm160_vm0, %v95_v1  ;;  %v99_v5 = vld [vmem:[%s5802_s1 + $0x20] sm:$0xff]  ;;  %v101_v7 = vld [vmem:[%s5802_s1 + $0x30] sm:$0xff]  ;;  %v102_v8 = vld [vmem:[%s5802_s1 + $0x38] sm:$0xff]  ;;  %s4560_s11 = sld [smem:[#allocation2 + $0x1]] }
   0x9   :  { %v103_v9 = vld [vmem:[%s5802_s1 + $0x40] sm:$0xff]  ;;  %v104_v10 = vld [vmem:[%s5802_s1 + $0x48] sm:$0xff]  ;;  %v105_v11 = vld [vmem:[%s5802_s1 + $0x50] sm:$0xff]  ;;  %s3386_s12 = sld [smem:[#allocation2 + $0x2]] }
   0xa   :  { %v106_v12 = vld [vmem:[%s5802_s1 + $0x58] sm:$0xff]  ;;  %v107_v13 = vld [vmem:[%s5802_s1 + $0x60] sm:$0xff]  ;;  %v108_v14 = vld [vmem:[%s5802_s1 + $0x68] sm:$0xff]  ;;  %s4575_s13 = sld [smem:[#allocation2 + $0x7]] }
   0xb   :  { %v109_v15 = vld [vmem:[%s5802_s1 + $0x70] sm:$0xff]  ;;  %v110_v16 = vld [vmem:[%s5802_s1 + $0x78] sm:$0xff]  ;;  %v111_v18 = vld [vmem:[%s5802_s1 + $0x80] sm:$0xff]  ;;  %s4578_s14 = sld [smem:[#allocation2 + $0x3]] }
   0xc   :  { %v112_v20 = vld [vmem:[%s5802_s1 + $0x88] sm:$0xff]  ;;  %v113_v22 = vld [vmem:[%s5802_s1 + $0x90] sm:$0xff]  ;;  %v114_v24 = vld [vmem:[%s5802_s1 + $0x98] sm:$0xff]  ;;  %s3409_s17 = sld [smem:[#allocation2 + $0x6]] }
   0xd   :  { %v115_v26 = vld [vmem:[%s5802_s1 + $0xa0] sm:$0xff]  ;;  %v116_v28 = vld [vmem:[%s5802_s1 + $0xa8] sm:$0xff]  ;;  %v117_v30 = vld [vmem:[%s5802_s1 + $0xb0] sm:$0xff]  ;;  %s3399_s23 = sld [smem:[#allocation2 + $0x5]] }
   0xe   :  { %v118_v32 = vld [vmem:[%s5802_s1 + $0xb8] sm:$0xff]  ;;  %v119_v34 = vld [vmem:[%s5802_s1 + $0xc0] sm:$0xff]  ;;  %v120_v36 = vld [vmem:[%s5802_s1 + $0xc8] sm:$0xff]  ;;  %s3398_s29 = sld [smem:[#allocation2 + $0x4]] }
   0xf   :  { %v121_v38 = vld [vmem:[%s5802_s1 + $0xd0] sm:$0xff]  ;;  %v122_v40 = vld [vmem:[%s5802_s1 + $0xd8] sm:$0xff]  ;;  %v123_v42 = vld [vmem:[%s5802_s1 + $0xe0] sm:$0xff]  ;;  %s4988_s30 = sld [smem:[#allocation2 + $0x8]] }
  0x10   :  { %3298 = vmatmul.msk.f32.gmra.mxu0 %vm160_vm0, %v96_v2  ;;  %v124_v44 = vld [vmem:[%s5802_s1 + $0xe8] sm:$0xff]  ;;  %v125_v46 = vld [vmem:[%s5802_s1 + $0xf0] sm:$0xff]  ;;  %v126_v48 = vld [vmem:[%s5802_s1 + $0xf8] sm:$0xff]  ;;  %s4992_s5 = sld [smem:[#allocation2 + $0x9]] }
  0x11   :  { %v127_v58 = vld [vmem:[%s5802_s1 + $0x100] sm:$0xff] }
  0x18   :  { %3299 = vmatmul.msk.f32.gmra.mxu0 %vm160_vm0, %v97_v3 }
  0x20   :  { %3300 = vmatmul.msk.f32.gmra.mxu0 %vm160_vm0, %v98_v4  ;;  %v128_v4 = vld [vmem:[%s5802_s1 + $0x108] sm:$0xff] }
  0x28   :  { %3301 = vmatmul.msk.f32.gmra.mxu0 %vm160_vm0, %v99_v5 }
  0x30   :  { %3302 = vmatmul.msk.f32.gmra.mxu0 %vm160_vm0, %v100_v6 }
  0x38   :  { %3303 = vmatmul.msk.f32.gmra.mxu0 %vm160_vm0, %v101_v7 }
  0x40   :  { %3304 = vmatmul.msk.f32.gmra.mxu0 %vm160_vm0, %v102_v8 }
  0x48   :  { %3305 = vmatmul.msk.f32.gmra.mxu0 %vm160_vm0, %v103_v9 }
  0x50   :  { %3306 = vmatmul.msk.f32.gmra.mxu0 %vm160_vm0, %v104_v10 }
  0x58   :  { %3307 = vmatmul.msk.f32.gmra.mxu0 %vm160_vm0, %v105_v11 }
  0x60   :  { %3308 = vmatmul.msk.f32.gmra.mxu0 %vm160_vm0, %v106_v12 }
  0x68   :  { %3309 = vmatmul.msk.f32.gmra.mxu0 %vm160_vm0, %v107_v13 }
  0x70   :  { %3310 = vmatmul.msk.f32.gmra.mxu0 %vm160_vm0, %v108_v14  ;;  %v129_v14 = vld [vmem:[%s5802_s1 + $0x110] sm:$0xff] }
  0x78   :  { %3311 = vmatmul.msk.f32.gmra.mxu0 %vm160_vm0, %v109_v15 }
  0x80   :  { %3312 = vmatmul.msk.f32.gmra.mxu0 %vm160_vm0, %v110_v16 }
  0x85   :  { %v3748_v17 = vpop.f32.mrf.mxu0 }
  0x88   :  { %3313 = vmatmul.msk.f32.gmra.mxu0 %vm160_vm0, %v111_v18 }
  0x8d   :  { %v3754_v19 = vpop.f32.mrf.mxu0 }
  0x8e   :  { %v563_v18 = vmax.f32 %v3754_v19, 0.0 }
  0x90   :  { %3314 = vmatmul.msk.f32.gmra.mxu0 %vm160_vm0, %v112_v20 }
  0x95   :  { %v3760_v21 = vpop.f32.mrf.mxu0 }
  0x96   :  { %v564_v15 = vmax.f32 %v3760_v21, 0.0  ;;  %v130_v21 = vld [vmem:[%s5802_s1 + $0x118] sm:$0xff] }
  0x98   :  { %3315 = vmatmul.msk.f32.gmra.mxu0 %vm160_vm0, %v113_v22  ;;  %v562_v22 = vmax.f32 %v3748_v17, 0.0  ;;  %v131_v17 = vld [vmem:[%s5802_s1 + $0x120] sm:$0xff] }
  0x9d   :  { %v3766_v23 = vpop.f32.mrf.mxu0 }
  0x9e   :  { %v565_v11 = vmax.f32 %v3766_v23, 0.0  ;;  %v628_v23 = vmin.f32 %v564_v15, 6.0 }
  0xa0   :  { %3316 = vmatmul.msk.f32.gmra.mxu0 %vm160_vm0, %v114_v24  ;;  %v629_v20 = vmin.f32 %v565_v11, 6.0  ;;  %v627_v24 = vmin.f32 %v563_v18, 6.0 }
  0xa5   :  { %v3772_v25 = vpop.f32.mrf.mxu0 }
  0xa6   :  { %v566_v9 = vmax.f32 %v3772_v25, 0.0 }
  0xa8   :  { %3317 = vmatmul.msk.f32.gmra.mxu0 %vm160_vm0, %v115_v26  ;;  %v630_v16 = vmin.f32 %v566_v9, 6.0  ;;  %v626_v26 = vmin.f32 %v562_v22, 6.0 }
  0xad   :  { %v3778_v27 = vpop.f32.mrf.mxu0 }
  0xae   :  { %v567_v7 = vmax.f32 %v3778_v27, 0.0 }
  0xb0   :  { %3318 = vmatmul.msk.f32.gmra.mxu0 %vm160_vm0, %v116_v28  ;;  %v631_v12 = vmin.f32 %v567_v7, 6.0  ;;  %v132_v28 = vld [vmem:[%s5802_s1 + $0x128] sm:$0xff] }
  0xb5   :  { %v3784_v29 = vpop.f32.mrf.mxu0 }
  0xb6   :  { %v568_v5 = vmax.f32 %v3784_v29, 0.0 }
  0xb8   :  { %3319 = vmatmul.msk.f32.gmra.mxu0 %vm160_vm0, %v117_v30  ;;  %v632_v10 = vmin.f32 %v568_v5, 6.0  ;;  %v133_v30 = vld [vmem:[%s5802_s1 + $0x130] sm:$0xff] }
  0xbd   :  { %v391_v31 = vpop.f32.mrf.mxu0 }
  0xbe   :  { %v569_v1 = vmax.f32 %v391_v31, 0.0 }
  0xc0   :  { %3320 = vmatmul.msk.f32.gmra.mxu0 %vm160_vm0, %v118_v32  ;;  %v633_v8 = vmin.f32 %v569_v1, 6.0  ;;  %v134_v32 = vld [vmem:[%s5802_s1 + $0x138] sm:$0xff]  ;;  %v35_v1 = vld [vmem:[%s5804_s3 + $0x20] sm:$0xff] }
  0xc5   :  { %v394_v33 = vpop.f32.mrf.mxu0 }
  0xc6   :  { %v570_v63 = vmax.f32 %v394_v33, 0.0 }
  0xc8   :  { %3321 = vmatmul.msk.f32.gmra.mxu0 %vm160_vm0, %v119_v34  ;;  %v634_v6 = vmin.f32 %v570_v63, 6.0  ;;  %v135_v34 = vld [vmem:[%s5802_s1 + $0x140] sm:$0xff] }
  0xcd   :  { %v397_v35 = vpop.f32.mrf.mxu0 }
  0xce   :  { %v571_v61 = vmax.f32 %v397_v35, 0.0 }
  0xd0   :  { %3322 = vmatmul.msk.f32.gmra.mxu0 %vm160_vm0, %v120_v36  ;;  %v635_v2 = vmin.f32 %v571_v61, 6.0  ;;  %v136_v36 = vld [vmem:[%s5802_s1 + $0x148] sm:$0xff] }
  0xd5   :  { %v400_v37 = vpop.f32.mrf.mxu0 }
  0xd6   :  { %v572_v59 = vmax.f32 %v400_v37, 0.0 }
  0xd8   :  { %3323 = vmatmul.msk.f32.gmra.mxu0 %vm160_vm0, %v121_v38  ;;  %v636_v0 = vmin.f32 %v572_v59, 6.0  ;;  %v137_v38 = vld [vmem:[%s5802_s1 + $0x150] sm:$0xff] }
  0xdd   :  { %v403_v39 = vpop.f32.mrf.mxu0 }
  0xde   :  { %v573_v55 = vmax.f32 %v403_v39, 0.0 }
  0xe0   :  { %3324 = vmatmul.msk.f32.gmra.mxu0 %vm160_vm0, %v122_v40  ;;  %v637_v62 = vmin.f32 %v573_v55, 6.0  ;;  %v138_v40 = vld [vmem:[%s5802_s1 + $0x158] sm:$0xff] }
  0xe5   :  { %v406_v41 = vpop.f32.mrf.mxu0 }
  0xe6   :  { %v574_v53 = vmax.f32 %v406_v41, 0.0 }
  0xe8   :  { %3325 = vmatmul.msk.f32.gmra.mxu0 %vm160_vm0, %v123_v42  ;;  %v638_v60 = vmin.f32 %v574_v53, 6.0  ;;  %v139_v42 = vld [vmem:[%s5802_s1 + $0x160] sm:$0xff] }
  0xe9   :  { %v31_v53 = vld [vmem:[%s5804_s3] sm:$0xff] }
  0xed   :  { %v409_v43 = vpop.f32.mrf.mxu0 }
  0xee   :  { %v575_v51 = vmax.f32 %v409_v43, 0.0 }
  0xf0   :  { %3326 = vmatmul.msk.f32.gmra.mxu0 %vm160_vm0, %v124_v44  ;;  %v639_v56 = vmin.f32 %v575_v51, 6.0  ;;  %v140_v44 = vld [vmem:[%s5802_s1 + $0x168] sm:$0xff] }
  0xf5   :  { %v412_v45 = vpop.f32.mrf.mxu0 }
  0xf6   :  { %v576_v49 = vmax.f32 %v412_v45, 0.0 }
  0xf8   :  { %3327 = vmatmul.msk.f32.gmra.mxu0 %vm160_vm0, %v125_v46  ;;  %v640_v54 = vmin.f32 %v576_v49, 6.0  ;;  %v141_v46 = vld [vmem:[%s5802_s1 + $0x170] sm:$0xff] }
  0xfd   :  { %v415_v47 = vpop.f32.mrf.mxu0 }
  0xfe   :  { %v577_v50 = vmax.f32 %v415_v47, 0.0 }
 0x100   :  { %3328 = vmatmul.msk.f32.gmra.mxu0 %vm160_vm0, %v126_v48  ;;  %v641_v52 = vmin.f32 %v577_v50, 6.0  ;;  %v142_v48 = vld [vmem:[%s5802_s1 + $0x178] sm:$0xff] }
 0x102   :  { %690 = vmatpush.msra.mxu1 %v641_v52 }
 0x104   :  { %691 = vmatpush.msra.mxu1 %v640_v54 }
 0x105   :  { %v3826_v57 = vpop.f32.mrf.mxu0 }
 0x106   :  { %692 = vmatpush.msra.mxu1 %v639_v56 }
 0x108   :  { %3329 = vmatmul.msk.f32.gmra.mxu0 %vm160_vm0, %v127_v58  ;;  %693 = vmatpush.msra.mxu1 %v638_v60  ;;  %v143_v60 = vld [vmem:[%s5802_s1 + $0x180] sm:$0xff] }
 0x10a   :  { %694 = vmatpush.msra.mxu1 %v637_v62 }
 0x10c   :  { %695 = vmatpush.msra.mxu1 %v636_v0 }
 0x10d   :  { %v3832_v3 = vpop.f32.mrf.mxu0 }
 0x10e   :  { %696 = vmatpush.msra.mxu1 %v635_v2 }
 0x110   :  { %3330 = vmatmul.msk.f32.gmra.mxu0 %vm160_vm0, %v128_v4  ;;  %697 = vmatpush.msra.mxu1 %v634_v6 }
 0x112   :  { %698 = vmatpush.msra.mxu1 %v633_v8  ;;  %v144_v8 = vld [vmem:[%s5802_s1 + $0x188] sm:$0xff] }
 0x114   :  { %699 = vmatpush.msra.mxu1 %v632_v10 }
 0x115   :  { %v3842_v13 = vpop.f32.mrf.mxu0 }
 0x116   :  { %700 = vmatpush.msra.mxu1 %v631_v12 }
 0x118   :  { %3331 = vmatmul.msk.f32.gmra.mxu0 %vm160_vm0, %v129_v14  ;;  %701 = vmatpush.msra.mxu1 %v630_v16  ;;  %v39_v14 = vld [vmem:[%s5804_s3 + $0x40] sm:$0xff] }
 0x11a   :  { %702 = vmatpush.msra.mxu1 %v629_v20 }
 0x11c   :  { %703 = vmatpush.msra.mxu1 %v628_v23  ;;  %v145_v23 = vld [vmem:[%s5802_s1 + $0x190] sm:$0xff] }
 0x11d   :  { %v3851_v25 = vpop.f32.mrf.mxu0 }
 0x11e   :  { %704 = vmatpush.msra.mxu1 %v627_v24  ;;  %v581_v18 = vmax.f32 %v3851_v25, 0.0  ;;  %v580_v24 = vmax.f32 %v3842_v13, 0.0  ;;  %v43_v25 = vld [vmem:[%s5804_s3 + $0x60] sm:$0xff] }
 0x120   :  { %3332 = vmatmul.msk.f32.gmra.mxu0 %vm160_vm0, %v130_v21  ;;  %705 = vmatpush.msra.mxu1 %v626_v26  ;;  %v579_v26 = vmax.f32 %v3832_v3, 0.0  ;;  %v146_v3 = vld [vmem:[%s5802_s1 + $0x198] sm:$0xff] }
 0x121   :  { %706 = vmatmul.f32.vlgmr.msra.gmra.mxu1 %v31_v53  ;;  %v56_v53 = vld [vmem:[%s5804_s3 + $0xc8] sm:$0xff] }
 0x125   :  { %v3857_v19 = vpop.f32.mrf.mxu0 }
 0x126   :  { %v582_v15 = vmax.f32 %v3857_v19, 0.0  ;;  %v645_v19 = vmin.f32 %v581_v18, 6.0  ;;  %v158_v18 = vld [vmem:[%s5802_s1 + $0x1f8] sm:$0xff] }
 0x128   :  { %3333 = vmatmul.msk.f32.gmra.mxu0 %vm160_vm0, %v131_v17  ;;  %v646_v21 = vmin.f32 %v582_v15, 6.0  ;;  %v578_v17 = vmax.f32 %v3826_v57, 0.0  ;;  %v47_v57 = vld [vmem:[%s5804_s3 + $0x80] sm:$0xff] }
 0x129   :  { %709 = vmatmul.f32.gmra.mxu1 %v35_v1  ;;  %v91_v15 = vld [vmem:[%s5804_s3 + $0x1e0] sm:$0xff] }
 0x12d   :  { %v3863_v27 = vpop.f32.mrf.mxu0 }
 0x12e   :  { %v583_v11 = vmax.f32 %v3863_v27, 0.0  ;;  %v644_v27 = vmin.f32 %v580_v24, 6.0  ;;  %v80_v24 = vld [vmem:[%s5804_s3 + $0x188] sm:$0xff] }
 0x130   :  { %3334 = vmatmul.msk.f32.gmra.mxu0 %vm160_vm0, %v132_v28  ;;  %v647_v20 = vmin.f32 %v583_v11, 6.0  ;;  %v643_v28 = vmin.f32 %v579_v26, 6.0 }
 0x131   :  { %712 = vmatmul.f32.gmra.mxu1 %v39_v14  ;;  %v76_v14 = vld [vmem:[%s5804_s3 + $0x168] sm:$0xff] }
 0x135   :  { %v3869_v29 = vpop.f32.mrf.mxu0 }
 0x136   :  { %v584_v9 = vmax.f32 %v3869_v29, 0.0  ;;  %v642_v29 = vmin.f32 %v578_v17, 6.0 }
 0x138   :  { %3335 = vmatmul.msk.f32.gmra.mxu0 %vm160_vm0, %v133_v30  ;;  %v648_v16 = vmin.f32 %v584_v9, 6.0  ;;  %v32_v30 = vld [vmem:[%s5804_s3 + $0x8] sm:$0xff] }
 0x139   :  { %715 = vmatmul.f32.gmra.mxu1 %v43_v25  ;;  %v72_v9 = vld [vmem:[%s5804_s3 + $0x148] sm:$0xff] }
 0x13d   :  { %v3875_v31 = vpop.f32.mrf.mxu0 }
 0x13e   :  { %v585_v5 = vmax.f32 %v3875_v31, 0.0 }
 0x140   :  { %3336 = vmatmul.msk.f32.gmra.mxu0 %vm160_vm0, %v134_v32  ;;  %v649_v12 = vmin.f32 %v585_v5, 6.0  ;;  %v147_v32 = vld [vmem:[%s5802_s1 + $0x1a0] sm:$0xff] }
 0x141   :  { %718 = vmatmul.f32.gmra.mxu1 %v47_v57  ;;  %v83_v5 = vld [vmem:[%s5804_s3 + $0x1a0] sm:$0xff] }
 0x145   :  { %v442_v33 = vpop.f32.mrf.mxu0 }
 0x146   :  { %v586_v2 = vmax.f32 %v442_v33, 0.0  ;;  %v36_v33 = vld [vmem:[%s5804_s3 + $0x28] sm:$0xff] }
 0x148   :  { %3337 = vmatmul.msk.f32.gmra.mxu0 %vm160_vm0, %v135_v34  ;;  %v650_v10 = vmin.f32 %v586_v2, 6.0  ;;  %v51_v34 = vld [vmem:[%s5804_s3 + $0xa0] sm:$0xff] }
 0x149   :  { %721 = vmatmul.f32.gmra.mxu1 %v51_v34  ;;  %v155_v2 = vld [vmem:[%s5802_s1 + $0x1e0] sm:$0xff] }
 0x14d   :  { %v445_v35 = vpop.f32.mrf.mxu0 }
 0x14e   :  { %v587_v63 = vmax.f32 %v445_v35, 0.0 }
 0x150   :  { %3338 = vmatmul.msk.f32.gmra.mxu0 %vm160_vm0, %v136_v36  ;;  %v651_v6 = vmin.f32 %v587_v63, 6.0  ;;  %v148_v36 = vld [vmem:[%s5802_s1 + $0x1a8] sm:$0xff] }
 0x151   :  { %v64_v63 = vld [vmem:[%s5804_s3 + $0x108] sm:$0xff] }
 0x155   :  { %v448_v37 = vpop.f32.mrf.mxu0 }
 0x156   :  { %v588_v61 = vmax.f32 %v448_v37, 0.0  ;;  %v40_v37 = vld [vmem:[%s5804_s3 + $0x48] sm:$0xff] }
 0x158   :  { %3339 = vmatmul.msk.f32.gmra.mxu0 %vm160_vm0, %v137_v38  ;;  %v652_v4 = vmin.f32 %v588_v61, 6.0  ;;  %v55_v38 = vld [vmem:[%s5804_s3 + $0xc0] sm:$0xff] }
 0x159   :  { %724 = vmatmul.f32.gmra.mxu1 %v55_v38 }
 0x15d   :  { %v451_v39 = vpop.f32.mrf.mxu0 }
 0x15e   :  { %v589_v56 = vmax.f32 %v451_v39, 0.0 }
 0x160   :  { %3340 = vmatmul.msk.f32.gmra.mxu0 %vm160_vm0, %v138_v40  ;;  %v653_v0 = vmin.f32 %v589_v56, 6.0  ;;  %v149_v40 = vld [vmem:[%s5802_s1 + $0x1b0] sm:$0xff] }
 0x161   :  { %v153_v56 = vld [vmem:[%s5802_s1 + $0x1d0] sm:$0xff] }
 0x165   :  { %v454_v41 = vpop.f32.mrf.mxu0 }
 0x166   :  { %v590_v54 = vmax.f32 %v454_v41, 0.0  ;;  %v44_v41 = vld [vmem:[%s5804_s3 + $0x68] sm:$0xff] }
 0x168   :  { %3341 = vmatmul.msk.f32.gmra.mxu0 %vm160_vm0, %v139_v42  ;;  %v654_v62 = vmin.f32 %v590_v54, 6.0  ;;  %v59_v42 = vld [vmem:[%s5804_s3 + $0xe0] sm:$0xff] }
 0x169   :  { %727 = vmatmul.f32.gmra.mxu1 %v59_v42  ;;  %v71_v54 = vld [vmem:[%s5804_s3 + $0x140] sm:$0xff]  ;;  %v88_v42 = vld [vmem:[%s5804_s3 + $0x1c8] sm:$0xff] }
 0x16d   :  { %v457_v43 = vpop.f32.mrf.mxu0 }
 0x16e   :  { %v591_v51 = vmax.f32 %v457_v43, 0.0 }
 0x170   :  { %3342 = vmatmul.msk.f32.gmra.mxu0 %vm160_vm0, %v140_v44  ;;  %v655_v58 = vmin.f32 %v591_v51, 6.0  ;;  %v150_v44 = vld [vmem:[%s5802_s1 + $0x1b8] sm:$0xff] }
 0x175   :  { %v460_v45 = vpop.f32.mrf.mxu0 }
 0x176   :  { %v592_v49 = vmax.f32 %v460_v45, 0.0  ;;  %v48_v45 = vld [vmem:[%s5804_s3 + $0x88] sm:$0xff] }
 0x178   :  { %3343 = vmatmul.msk.f32.gmra.mxu0 %vm160_vm0, %v141_v46  ;;  %v656_v55 = vmin.f32 %v592_v49, 6.0  ;;  %v63_v46 = vld [vmem:[%s5804_s3 + $0x100] sm:$0xff]  ;;  %v52_v49 = vld [vmem:[%s5804_s3 + $0xa8] sm:$0xff] }
 0x179   :  { %730 = vmatmul.f32.gmra.mxu1 %v63_v46 }
 0x17d   :  { %v463_v47 = vpop.f32.mrf.mxu0 }
 0x17e   :  { %v593_v50 = vmax.f32 %v463_v47, 0.0 }
 0x180   :  { %3344 = vmatmul.msk.f32.gmra.mxu0 %vm160_vm0, %v142_v48  ;;  %v657_v52 = vmin.f32 %v593_v50, 6.0  ;;  %v151_v48 = vld [vmem:[%s5802_s1 + $0x1c0] sm:$0xff] }
 0x181   :  { %v67_v50 = vld [vmem:[%s5804_s3 + $0x120] sm:$0xff] }
 0x182   :  { %755 = vmatpush.msra.mxu2 %v657_v52  ;;  %733 = vmatmul.f32.gmra.mxu1 %v67_v50  ;;  %v152_v52 = vld [vmem:[%s5802_s1 + $0x1c8] sm:$0xff] }
 0x184   :  { %756 = vmatpush.msra.mxu2 %v656_v55 }
 0x185   :  { %v3916_v59 = vpop.f32.mrf.mxu0 }
 0x186   :  { %757 = vmatpush.msra.mxu2 %v655_v58  ;;  %v60_v58 = vld [vmem:[%s5804_s3 + $0xe8] sm:$0xff] }
 0x188   :  { %3345 = vmatmul.msk.f32.gmra.mxu0 %vm160_vm0, %v143_v60  ;;  %758 = vmatpush.msra.mxu2 %v654_v62  ;;  %v75_v60 = vld [vmem:[%s5804_s3 + $0x160] sm:$0xff]  ;;  %v154_v62 = vld [vmem:[%s5802_s1 + $0x1d8] sm:$0xff] }
 0x18a   :  { %759 = vmatpush.msra.mxu2 %v653_v0  ;;  %736 = vmatmul.f32.gmra.mxu1 %v71_v54  ;;  %v79_v0 = vld [vmem:[%s5804_s3 + $0x180] sm:$0xff] }
 0x18c   :  { %760 = vmatpush.msra.mxu2 %v652_v4  ;;  %v68_v4 = vld [vmem:[%s5804_s3 + $0x128] sm:$0xff] }
 0x18d   :  { %v3926_v7 = vpop.f32.mrf.mxu0 }
 0x18e   :  { %761 = vmatpush.msra.mxu2 %v651_v6  ;;  %v595_v50 = vmax.f32 %v3926_v7, 0.0  ;;  %v33_v7 = vld [vmem:[%s5804_s3 + $0x10] sm:$0xff] }
 0x190   :  { %3346 = vmatmul.msk.f32.gmra.mxu0 %vm160_vm0, %v144_v8  ;;  %762 = vmatpush.msra.mxu2 %v650_v10  ;;  %v156_v8 = vld [vmem:[%s5802_s1 + $0x1e8] sm:$0xff]  ;;  %v87_v10 = vld [vmem:[%s5804_s3 + $0x1c0] sm:$0xff] }
 0x192   :  { %763 = vmatpush.msra.mxu2 %v649_v12  ;;  %739 = vmatmul.f32.gmra.mxu1 %v75_v60  ;;  %v157_v12 = vld [vmem:[%s5802_s1 + $0x1f0] sm:$0xff]  ;;  %s3484_s1 = sld [smem:[#allocation2 + $0xa]] }
 0x193   :  { %v53_v60 = vld [vmem:[%s5804_s3 + $0xb0] sm:$0xff] }
 0x194   :  { %764 = vmatpush.msra.mxu2 %v648_v16 }
 0x195   :  { %v3939_v22 = vpop.f32.mrf.mxu0 }
 0x196   :  { %765 = vmatpush.msra.mxu2 %v647_v20 }
 0x198   :  { %3347 = vmatmul.msk.f32.gmra.mxu0 %vm160_vm0, %v145_v23  ;;  %766 = vmatpush.msra.mxu2 %v646_v21 }
 0x19a   :  { %767 = vmatpush.msra.mxu2 %v645_v19  ;;  %742 = vmatmul.f32.gmra.mxu1 %v79_v0  ;;  %v65_v0 = vld [vmem:[%s5804_s3 + $0x110] sm:$0xff] }
 0x19c   :  { %768 = vmatpush.msra.mxu2 %v644_v27 }
 0x19d   :  { %v3951_v13 = vpop.f32.mrf.mxu0 }
 0x19e   :  { %769 = vmatpush.msra.mxu2 %v643_v28 }
 0x1a0   :  { %3348 = vmatmul.msk.f32.gmra.mxu0 %vm160_vm0, %v146_v3  ;;  %770 = vmatpush.msra.mxu2 %v642_v29 }
 0x1a1   :  { %771 = vmatmul.f32.vlgmr.msra.gmra.mxu2 %v32_v30  ;;  %v84_v30 = vld [vmem:[%s5804_s3 + $0x1a8] sm:$0xff] }
 0x1a2   :  { %745 = vmatmul.f32.gmra.mxu1 %v83_v5 }
 0x1a5   :  { %v3963_v31 = vpop.f32.mrf.mxu0 }
 0x1a8   :  { %3349 = vmatmul.msk.f32.gmra.mxu0 %vm160_vm0, %v147_v32 }
 0x1a9   :  { %774 = vmatmul.f32.gmra.mxu2 %v36_v33 }
 0x1aa   :  { %748 = vmatmul.f32.gmra.mxu1 %v87_v10 }
 0x1ad   :  { %v3975_v35 = vpop.f32.mrf.mxu0 }
 0x1b0   :  { %3350 = vmatmul.msk.f32.gmra.mxu0 %vm160_vm0, %v148_v36 }
 0x1b1   :  { %777 = vmatmul.f32.gmra.mxu2 %v40_v37 }
 0x1b2   :  { %751 = vmatmul.f32.gmra.mxu1 %v91_v15  ;;  %v4168_v15 = vpop.f32.mrf.mxu1 }
 0x1b5   :  { %v3987_v39 = vpop.f32.mrf.mxu0 }
 0x1b8   :  { %3351 = vmatmul.msk.f32.gmra.mxu0 %vm160_vm0, %v149_v40  ;;  %v600_v40 = vmax.f32 %v3987_v39, 0.0  ;;  %v597_v39 = vmax.f32 %v3951_v13, 0.0  ;;  %v594_v13 = vmax.f32 %v3916_v59, 0.0  ;;  %v49_v59 = vld [vmem:[%s5804_s3 + $0x90] sm:$0xff] }
 0x1b9   :  { %780 = vmatmul.f32.gmra.mxu2 %v44_v41 }
 0x1ba   :  { %v664_v46 = vmin.f32 %v600_v40, 6.0  ;;  %v658_v54 = vmin.f32 %v594_v13, 6.0 }
 0x1bd   :  { %v3999_v43 = vpop.f32.mrf.mxu0 }
 0x1be   :  { %v601_v36 = vmax.f32 %v3999_v43, 0.0  ;;  %v598_v43 = vmax.f32 %v3963_v31, 0.0  ;;  %v92_v31 = vld [vmem:[%s5804_s3 + $0x1e8] sm:$0xff] }
 0x1c0   :  { %3352 = vmatmul.msk.f32.gmra.mxu0 %vm160_vm0, %v150_v44  ;;  %v599_v44 = vmax.f32 %v3975_v35, 0.0  ;;  %v596_v35 = vmax.f32 %v3939_v22, 0.0  ;;  %v659_v22 = vmin.f32 %v595_v50, 6.0 }
 0x1c1   :  { %783 = vmatmul.f32.gmra.mxu2 %v48_v45  ;;  %v665_v45 = vmin.f32 %v601_v36, 6.0 }
 0x1c5   :  { %v4011_v47 = vpop.f32.mrf.mxu0 }
 0x1c6   :  { %v602_v33 = vmax.f32 %v4011_v47, 0.0  ;;  %v663_v47 = vmin.f32 %v599_v44, 6.0 }
 0x1c8   :  { %3353 = vmatmul.msk.f32.gmra.mxu0 %vm160_vm0, %v151_v48  ;;  %v666_v41 = vmin.f32 %v602_v33, 6.0 }
 0x1c9   :  { %786 = vmatmul.f32.gmra.mxu2 %v52_v49  ;;  %v662_v49 = vmin.f32 %v598_v43, 6.0 }
 0x1cd   :  { %v4023_v51 = vpop.f32.mrf.mxu0 }
 0x1ce   :  { %v603_v57 = vmax.f32 %v4023_v51, 0.0  ;;  %v661_v51 = vmin.f32 %v597_v39, 6.0 }
 0x1d0   :  { %3354 = vmatmul.msk.f32.gmra.mxu0 %vm160_vm0, %v152_v52  ;;  %v667_v37 = vmin.f32 %v603_v57, 6.0  ;;  %v660_v52 = vmin.f32 %v596_v35, 6.0 }
 0x1d1   :  { %789 = vmatmul.f32.gmra.mxu2 %v56_v53 }
 0x1d5   :  { %v4035_v55 = vpop.f32.mrf.mxu0 }
 0x1d6   :  { %v604_v3 = vmax.f32 %v4035_v55, 0.0  ;;  %v57_v55 = vld [vmem:[%s5804_s3 + $0xd0] sm:$0xff] }
 0x1d8   :  { %3355 = vmatmul.msk.f32.gmra.mxu0 %vm160_vm0, %v153_v56  ;;  %v668_v34 = vmin.f32 %v604_v3, 6.0 }
 0x1d9   :  { %792 = vmatmul.f32.gmra.mxu2 %v60_v58  ;;  %v37_v58 = vld [vmem:[%s5804_s3 + $0x30] sm:$0xff] }
 0x1dd   :  { %v499_v61 = vpop.f32.mrf.mxu0 }
 0x1de   :  { %v605_v17 = vmax.f32 %v499_v61, 0.0  ;;  %v61_v61 = vld [vmem:[%s5804_s3 + $0xf0] sm:$0xff] }
 0x1e0   :  { %3356 = vmatmul.msk.f32.gmra.mxu0 %vm160_vm0, %v154_v62  ;;  %v669_v32 = vmin.f32 %v605_v17, 6.0 }
 0x1e1   :  { %795 = vmatmul.f32.gmra.mxu2 %v64_v63  ;;  %v41_v63 = vld [vmem:[%s5804_s3 + $0x50] sm:$0xff] }
 0x1e5   :  { %v502_v1 = vpop.f32.mrf.mxu0 }
 0x1e6   :  { %v606_v19 = vmax.f32 %v502_v1, 0.0 }
 0x1e8   :  { %3357 = vmatmul.msk.f32.gmra.mxu0 %vm160_vm0, %v155_v2  ;;  %v670_v29 = vmin.f32 %v606_v19, 6.0  ;;  %v45_v2 = vld [vmem:[%s5804_s3 + $0x70] sm:$0xff] }
 0x1e9   :  { %798 = vmatmul.f32.gmra.mxu2 %v68_v4  ;;  %v69_v4 = vld [vmem:[%s5804_s3 + $0x130] sm:$0xff] }
 0x1ed   :  { %v505_v6 = vpop.f32.mrf.mxu0 }
 0x1ee   :  { %v607_v21 = vmax.f32 %v505_v6, 0.0  ;;  %v73_v6 = vld [vmem:[%s5804_s3 + $0x150] sm:$0xff] }
 0x1f0   :  { %3358 = vmatmul.msk.f32.gmra.mxu0 %vm160_vm0, %v156_v8  ;;  %v671_v27 = vmin.f32 %v607_v21, 6.0 }
 0x1f1   :  { %801 = vmatmul.f32.gmra.mxu2 %v72_v9  ;;  %v77_v9 = vld [vmem:[%s5804_s3 + $0x170] sm:$0xff] }
 0x1f5   :  { %v508_v11 = vpop.f32.mrf.mxu0 }
 0x1f6   :  { %v608_v20 = vmax.f32 %v508_v11, 0.0  ;;  %v81_v11 = vld [vmem:[%s5804_s3 + $0x190] sm:$0xff] }
 0x1f8   :  { %3359 = vmatmul.msk.f32.gmra.mxu0 %vm160_vm0, %v157_v12  ;;  %v672_v25 = vmin.f32 %v608_v20, 6.0  ;;  %v4173_v20 = vpop.f32.mrf.mxu1 }
 0x1f9   :  { %804 = vmatmul.f32.gmra.mxu2 %v76_v14  ;;  %v85_v14 = vld [vmem:[%s5804_s3 + $0x1b0] sm:$0xff] }
 0x1fd   :  { %v511_v16 = vpop.f32.mrf.mxu0 }
 0x1fe   :  { %v609_v23 = vmax.f32 %v511_v16, 0.0 }
 0x200   :  { %v673_v26 = vmin.f32 %v609_v23, 6.0  ;;  %3360 = vmatmul.msk.f32.gmra.mxu0 %vm160_vm0, %v158_v18  ;;  %v89_v18 = vld [vmem:[%s5804_s3 + $0x1d0] sm:$0xff]  ;;  %v4178_v21 = vpop.f32.mrf.mxu1 }
 0x201   :  { %807 = vmatmul.f32.gmra.mxu2 %v80_v24  ;;  %v93_v24 = vld [vmem:[%s5804_s3 + $0x1f0] sm:$0xff] }
 0x202   :  { %820 = vmatpush.msrb.mxu1 %v673_v26  ;;  %3538 = vmatpush.msrb.mxu2 %v673_v26 }
 0x203   :  { %3539 = vmatpush.msra.mxu3 %v673_v26 }
 0x204   :  { %821 = vmatpush.msrb.mxu1 %v672_v25  ;;  %3540 = vmatpush.msrb.mxu2 %v672_v25 }
 0x205   :  { %3541 = vmatpush.msra.mxu3 %v672_v25  ;;  %v4094_v28 = vpop.f32.mrf.mxu0 }
 0x206   :  { %822 = vmatpush.msrb.mxu1 %v671_v27  ;;  %3542 = vmatpush.msrb.mxu2 %v671_v27 }
 0x207   :  { %3543 = vmatpush.msra.mxu3 %v671_v27 }
 0x208   :  { %823 = vmatpush.msrb.mxu1 %v670_v29  ;;  %3544 = vmatpush.msrb.mxu2 %v670_v29  ;;  %v4180_v25 = vpop.f32.mrf.mxu1 }
 0x209   :  { %3545 = vmatpush.msra.mxu3 %v670_v29  ;;  %810 = vmatmul.f32.gmra.mxu2 %v84_v30 }
 0x20a   :  { %824 = vmatpush.msrb.mxu1 %v669_v32  ;;  %3546 = vmatpush.msrb.mxu2 %v669_v32 }
 0x20b   :  { %3547 = vmatpush.msra.mxu3 %v669_v32 }
 0x20c   :  { %825 = vmatpush.msrb.mxu1 %v668_v34  ;;  %3548 = vmatpush.msrb.mxu2 %v668_v34 }
 0x20d   :  { %3549 = vmatpush.msra.mxu3 %v668_v34  ;;  %v4103_v38 = vpop.f32.mrf.mxu0 }
 0x20e   :  { %826 = vmatpush.msrb.mxu1 %v667_v37  ;;  %3550 = vmatpush.msrb.mxu2 %v667_v37 }
 0x20f   :  { %3551 = vmatpush.msra.mxu3 %v667_v37 }
 0x210   :  { %827 = vmatpush.msrb.mxu1 %v666_v41  ;;  %3552 = vmatpush.msrb.mxu2 %v666_v41  ;;  %v4182_v29 = vpop.f32.mrf.mxu1 }
 0x211   :  { %3553 = vmatpush.msra.mxu3 %v666_v41  ;;  %813 = vmatmul.f32.gmra.mxu2 %v88_v42 }
 0x212   :  { %828 = vmatpush.msrb.mxu1 %v665_v45  ;;  %3554 = vmatpush.msrb.mxu2 %v665_v45 }
 0x213   :  { %3555 = vmatpush.msra.mxu3 %v665_v45 }
 0x214   :  { %829 = vmatpush.msrb.mxu1 %v664_v46  ;;  %3556 = vmatpush.msrb.mxu2 %v664_v46 }
 0x215   :  { %3557 = vmatpush.msra.mxu3 %v664_v46  ;;  %v4112_v48 = vpop.f32.mrf.mxu0 }
 0x216   :  { %830 = vmatpush.msrb.mxu1 %v663_v47  ;;  %3558 = vmatpush.msrb.mxu2 %v663_v47 }
 0x217   :  { %3559 = vmatpush.msra.mxu3 %v663_v47 }
 0x218   :  { %831 = vmatpush.msrb.mxu1 %v662_v49  ;;  %3560 = vmatpush.msrb.mxu2 %v662_v49  ;;  %v4184_v45 = vpop.f32.mrf.mxu1 }
 0x219   :  { %3561 = vmatpush.msra.mxu3 %v662_v49  ;;  %816 = vmatmul.f32.gmra.mxu2 %v92_v31 }
 0x21a   :  { %832 = vmatpush.msrb.mxu1 %v661_v51  ;;  %3562 = vmatpush.msrb.mxu2 %v661_v51 }
 0x21b   :  { %3563 = vmatpush.msra.mxu3 %v661_v51 }
 0x21c   :  { %833 = vmatpush.msrb.mxu1 %v660_v52  ;;  %3564 = vmatpush.msrb.mxu2 %v660_v52 }
 0x21d   :  { %3565 = vmatpush.msra.mxu3 %v660_v52  ;;  %v4120_v53 = vpop.f32.mrf.mxu0 }
 0x21e   :  { %834 = vmatpush.msrb.mxu1 %v659_v22  ;;  %3566 = vmatpush.msrb.mxu2 %v659_v22  ;;  %v613_v13 = vmax.f32 %v4120_v53, 0.0 }
 0x21f   :  { %3567 = vmatpush.msra.mxu3 %v659_v22 }
 0x220   :  { %835 = vmatpush.msrb.mxu1 %v658_v54  ;;  %3568 = vmatpush.msrb.mxu2 %v658_v54  ;;  %v4189_v22 = vpop.f32.mrf.mxu1 }
 0x221   :  { %3569 = vmatpush.msra.mxu3 %v658_v54  ;;  %836 = vmatmul.f32.vlgmr.msrb.gmra.mxu1 %v33_v7  ;;  %v612_v54 = vmax.f32 %v4112_v48, 0.0  ;;  %v34_v48 = vld [vmem:[%s5804_s3 + $0x18] sm:$0xff] }
 0x222   :  { %848 = vmatmul.f32.vlgmr.msrb.gmra.mxu2 %v49_v59  ;;  %854 = vmatmul.f32.vlgmr.msra.gmra.mxu3 %v57_v55  ;;  %v611_v59 = vmax.f32 %v4103_v38, 0.0  ;;  %v677_v55 = vmin.f32 %v613_v13, 6.0 }
 0x225   :  { %v4131_v56 = vpop.f32.mrf.mxu0 }
 0x226   :  { %v614_v50 = vmax.f32 %v4131_v56, 0.0  ;;  %v610_v56 = vmax.f32 %v4094_v28, 0.0 }
 0x228   :  { %v678_v7 = vmin.f32 %v614_v50, 6.0  ;;  %v674_v53 = vmin.f32 %v610_v56, 6.0 }
 0x229   :  { %839 = vmatmul.f32.gmra.mxu1 %v37_v58  ;;  %v4193_v58 = vpop.f32.mrf.mxu2 }
 0x22a   :  { %851 = vmatmul.f32.gmra.mxu2 %v53_v60  ;;  %857 = vmatmul.f32.gmra.mxu3 %v61_v61  ;;  %v676_v60 = vmin.f32 %v612_v54, 6.0  ;;  %v675_v61 = vmin.f32 %v611_v59, 6.0 }
 0x22d   :  { %v4142_v62 = vpop.f32.mrf.mxu0 }
 0x22e   :  { %v615_v49 = vmax.f32 %v4142_v62, 0.0  ;;  %v4196_v62 = vpop.f32.mrf.mxu1 }
 0x230   :  { %v679_v52 = vmin.f32 %v615_v49, 6.0 }
 0x231   :  { %842 = vmatmul.f32.gmra.mxu1 %v41_v63  ;;  %v775_v38 = vpop.f32.mrf.mxu2  ;;  %v38_v63 = vld [vmem:[%s5804_s3 + $0x38] sm:$0xff] }
 0x232   :  { %860 = vmatmul.f32.gmra.mxu3 %v65_v0 }
 0x235   :  { %v532_v1 = vpop.f32.mrf.mxu0 }
 0x236   :  { %v616_v47 = vmax.f32 %v532_v1, 0.0  ;;  %v4204_v28 = vpop.f32.mrf.mxu1  ;;  %v42_v1 = vld [vmem:[%s5804_s3 + $0x58] sm:$0xff] }
 0x238   :  { %v680_v51 = vmin.f32 %v616_v47, 6.0 }
 0x239   :  { %845 = vmatmul.f32.gmra.mxu1 %v45_v2  ;;  %v4206_v0 = vpop.f32.mrf.mxu2 }
 0x23a   :  { %863 = vmatmul.f32.gmra.mxu3 %v69_v4 }
 0x23d   :  { %v535_v5 = vpop.f32.mrf.mxu0 }
 0x23e   :  { %v617_v46 = vmax.f32 %v535_v5, 0.0  ;;  %v4211_v2 = vpop.f32.mrf.mxu1  ;;  %v46_v5 = vld [vmem:[%s5804_s3 + $0x78] sm:$0xff] }
 0x240   :  { %v681_v31 = vmin.f32 %v617_v46, 6.0  ;;  %v90_v46 = vld [vmem:[%s5804_s3 + $0x1d8] sm:$0xff] }
 0x241   :  { %v4213_v4 = vpop.f32.mrf.mxu2 }
 0x242   :  { %866 = vmatmul.f32.gmra.mxu3 %v73_v6 }
 0x245   :  { %v538_v8 = vpop.f32.mrf.mxu0 }
 0x246   :  { %v618_v44 = vmax.f32 %v538_v8, 0.0  ;;  %v4218_v6 = vpop.f32.mrf.mxu1  ;;  %v50_v8 = vld [vmem:[%s5804_s3 + $0x98] sm:$0xff] }
 0x248   :  { %v682_v35 = vmin.f32 %v618_v44, 6.0  ;;  %v86_v44 = vld [vmem:[%s5804_s3 + $0x1b8] sm:$0xff] }
 0x24a   :  { %869 = vmatmul.f32.gmra.mxu3 %v77_v9  ;;  %v4223_v9 = vpop.f32.mrf.mxu2 }
 0x24d   :  { %v541_v10 = vpop.f32.mrf.mxu0 }
 0x24e   :  { %v619_v41 = vmax.f32 %v541_v10, 0.0  ;;  %v4225_v10 = vpop.f32.mrf.mxu1 }
 0x250   :  { %v683_v39 = vmin.f32 %v619_v41, 6.0 }
 0x252   :  { %872 = vmatmul.f32.gmra.mxu3 %v81_v11  ;;  %v54_v11 = vld [vmem:[%s5804_s3 + $0xb8] sm:$0xff] }
 0x255   :  { %v544_v12 = vpop.f32.mrf.mxu0 }
 0x256   :  { %v620_v37 = vmax.f32 %v544_v12, 0.0  ;;  %v4230_v12 = vpop.f32.mrf.mxu2 }
 0x258   :  { %v684_v43 = vmin.f32 %v620_v37, 6.0  ;;  %v82_v37 = vld [vmem:[%s5804_s3 + $0x198] sm:$0xff] }
 0x25a   :  { %875 = vmatmul.f32.gmra.mxu3 %v85_v14  ;;  %v58_v14 = vld [vmem:[%s5804_s3 + $0xd8] sm:$0xff] }
 0x25d   :  { %v547_v16 = vpop.f32.mrf.mxu0 }
 0x25e   :  { %v621_v34 = vmax.f32 %v547_v16, 0.0  ;;  %v4235_v16 = vpop.f32.mrf.mxu1 }
 0x260   :  { %v685_v42 = vmin.f32 %v621_v34, 6.0 }
 0x262   :  { %878 = vmatmul.f32.gmra.mxu3 %v89_v18  ;;  %v4237_v18 = vpop.f32.mrf.mxu2 }
 0x265   :  { %v550_v23 = vpop.f32.mrf.mxu0 }
 0x266   :  { %v622_v32 = vmax.f32 %v550_v23, 0.0  ;;  %v62_v23 = vld [vmem:[%s5804_s3 + $0xf8] sm:$0xff] }
 0x268   :  { %v686_v40 = vmin.f32 %v622_v32, 6.0 }
 0x26a   :  { %881 = vmatmul.f32.gmra.mxu3 %v93_v24  ;;  %v4242_v24 = vpop.f32.mrf.mxu1 }
 0x26d   :  { %v553_v26 = vpop.f32.mrf.mxu0 }
 0x26e   :  { %v623_v30 = vmax.f32 %v553_v26, 0.0  ;;  %v4244_v26 = vpop.f32.mrf.mxu2 }
 0x270   :  { %v687_v36 = vmin.f32 %v623_v30, 6.0 }
 0x275   :  { %v556_v19 = vpop.f32.mrf.mxu0 }
 0x276   :  { %v624_v27 = vmax.f32 %v556_v19, 0.0  ;;  %v66_v19 = vld [vmem:[%s5804_s3 + $0x118] sm:$0xff] }
 0x278   :  { %v688_v33 = vmin.f32 %v624_v27, 6.0  ;;  %v70_v27 = vld [vmem:[%s5804_s3 + $0x138] sm:$0xff] }
 0x27d   :  { %v559_v17 = vpop.f32.mrf.mxu0 }
 0x27e   :  { %v625_v3 = vmax.f32 %v559_v17, 0.0  ;;  %v4249_v17 = vpop.f32.mrf.mxu1 }
 0x280   :  { %v689_v57 = vmin.f32 %v625_v3, 6.0  ;;  %v4254_v3 = vpop.f32.mrf.mxu2 }
 0x282   :  { %885 = vmatpush.msra.mxu1 %v689_v57  ;;  %v74_v57 = vld [vmem:[%s5804_s3 + $0x158] sm:$0xff] }
 0x284   :  { %886 = vmatpush.msra.mxu1 %v688_v33  ;;  %v78_v33 = vld [vmem:[%s5804_s3 + $0x178] sm:$0xff] }
 0x286   :  { %887 = vmatpush.msra.mxu1 %v687_v36  ;;  %v4256_v30 = vpop.f32.mrf.mxu1 }
 0x288   :  { %888 = vmatpush.msra.mxu1 %v686_v40  ;;  %v4261_v32 = vpop.f32.mrf.mxu2  ;;  %v954_v40 = vld [vmem:[%s5803_s2 + $0x8] sm:$0xff] }
 0x289   :  { %1018 = vmatpush.msra.mxu2 %v954_v40 }
 0x28a   :  { %889 = vmatpush.msra.mxu1 %v685_v42 }
 0x28c   :  { %890 = vmatpush.msra.mxu1 %v684_v43 }
 0x28e   :  { %891 = vmatpush.msra.mxu1 %v683_v39 }
 0x290   :  { %892 = vmatpush.msra.mxu1 %v682_v35  ;;  %v4266_v36 = vpop.f32.mrf.mxu2  ;;  %v94_v35 = vld [vmem:[%s5804_s3 + $0x1f8] sm:$0xff] }
 0x292   :  { %893 = vmatpush.msra.mxu1 %v681_v31  ;;  %v773_v31 = vadd.f32 %v4193_v58, %v4168_v15  ;;  %v779_v15 = vadd.f32 %v4206_v0, %v4178_v21  ;;  %v785_v21 = vadd.f32 %v4223_v9, %v4182_v29 }
 0x294   :  { %894 = vmatpush.msra.mxu1 %v680_v51 }
 0x296   :  { %895 = vmatpush.msra.mxu1 %v679_v52  ;;  %v776_v52 = vadd.f32 %v775_v38, %v4173_v20  ;;  %v782_v20 = vadd.f32 %v4213_v4, %v4180_v25 }
 0x298   :  { %896 = vmatpush.msra.mxu1 %v678_v7  ;;  %v4274_v42 = vpop.f32.mrf.mxu2 }
 0x29a   :  { %897 = vmatpush.msra.mxu1 %v677_v55 }
 0x29c   :  { %898 = vmatpush.msra.mxu1 %v676_v60 }
 0x29e   :  { %899 = vmatpush.msra.mxu1 %v675_v61  ;;  %v837_v34 = vpop.f32.mrf.mxu1 }
 0x29f   :  { %v838_v50 = vadd.f32 %v837_v34, %v773_v31  ;;  %v794_v34 = vadd.f32 %v4244_v26, %v4196_v62  ;;  %v800_v62 = vadd.f32 %v4261_v32, %v4211_v2  ;;  %v806_v2 = vadd.f32 %v4274_v42, %v4225_v10 }
 0x2a0   :  { %900 = vmatpush.msra.mxu1 %v674_v53  ;;  %v4282_v39 = vpop.f32.mrf.mxu2 }
 0x2a1   :  { %901 = vmatmul.f32.vlgmr.msra.gmra.mxu1 %v34_v48 }
 0x2a6   :  { %v840_v41 = vpop.f32.mrf.mxu1 }
 0x2a7   :  { %v841_v7 = vadd.f32 %v840_v41, %v776_v52 }
 0x2a8   :  { %v4287_v49 = vpop.f32.mrf.mxu2 }
 0x2a9   :  { %904 = vmatmul.f32.gmra.mxu1 %v38_v63  ;;  %v812_v10 = vadd.f32 %v4287_v49, %v4242_v24 }
 0x2ae   :  { %v843_v43 = vpop.f32.mrf.mxu1 }
 0x2af   :  { %v844_v58 = vadd.f32 %v843_v43, %v779_v15 }
 0x2b0   :  { %v4296_v54 = vpop.f32.mrf.mxu2 }
 0x2b1   :  { %907 = vmatmul.f32.gmra.mxu1 %v42_v1  ;;  %v855_v1 = vpop.f32.mrf.mxu3 }
 0x2b6   :  { %v846_v47 = vpop.f32.mrf.mxu1 }
 0x2b7   :  { %v847_v53 = vadd.f32 %v846_v47, %v782_v20 }
 0x2b8   :  { %v4304_v56 = vpop.f32.mrf.mxu2 }
 0x2b9   :  { %910 = vmatmul.f32.gmra.mxu1 %v46_v5  ;;  %v858_v4 = vpop.f32.mrf.mxu3  ;;  %v818_v24 = vadd.f32 %v4304_v56, %v4256_v30 }
 0x2c0   :  { %v849_v63 = vpop.f32.mrf.mxu2 }
 0x2c1   :  { %913 = vmatmul.f32.gmra.mxu1 %v50_v8  ;;  %v850_v0 = vadd.f32 %v849_v63, %v785_v21  ;;  %v861_v29 = vpop.f32.mrf.mxu3 }
 0x2c8   :  { %v852_v25 = vpop.f32.mrf.mxu2 }
 0x2c9   :  { %916 = vmatmul.f32.gmra.mxu1 %v54_v11  ;;  %v788_v11 = vadd.f32 %v4230_v12, %v4184_v45  ;;  %v859_v45 = vadd.f32 %v858_v4, %v794_v34  ;;  %v864_v12 = vpop.f32.mrf.mxu3 }
 0x2ca   :  { %v865_v26 = vadd.f32 %v864_v12, %v800_v62 }
 0x2d1   :  { %919 = vmatmul.f32.gmra.mxu1 %v58_v14  ;;  %v853_v14 = vadd.f32 %v852_v25, %v788_v11  ;;  %v867_v43 = vpop.f32.mrf.mxu3 }
 0x2d9   :  { %922 = vmatmul.f32.gmra.mxu1 %v62_v23 }
 0x2e1   :  { %925 = vmatmul.f32.gmra.mxu1 %v66_v19 }
 0x2e9   :  { %928 = vmatmul.f32.gmra.mxu1 %v70_v27  ;;  %v791_v27 = vadd.f32 %v4237_v18, %v4189_v22  ;;  %v797_v22 = vadd.f32 %v4254_v3, %v4204_v28  ;;  %v803_v28 = vadd.f32 %v4266_v36, %v4218_v6  ;;  %v870_v3 = vpop.f32.mrf.mxu3  ;;  %v809_v6 = vadd.f32 %v4282_v39, %v4235_v16 }
 0x2ea   :  { %v815_v16 = vadd.f32 %v4296_v54, %v4249_v17 }
 0x2eb   :  { %v856_v9 = vadd.f32 %v855_v1, %v791_v27  ;;  %v862_v18 = vadd.f32 %v861_v29, %v797_v22 }
 0x2f1   :  { %931 = vmatmul.f32.gmra.mxu1 %v74_v57  ;;  %v873_v32 = vpop.f32.mrf.mxu3 }
 0x2f2   :  { %v874_v36 = vadd.f32 %v873_v32, %v809_v6 }
 0x2f9   :  { %934 = vmatmul.f32.gmra.mxu1 %v78_v33 }
 0x301   :  { %937 = vmatmul.f32.gmra.mxu1 %v82_v37 }
 0x309   :  { %940 = vmatmul.f32.gmra.mxu1 %v86_v44 }
 0x311   :  { %943 = vmatmul.f32.gmra.mxu1 %v90_v46 }
 0x319   :  { %946 = vmatmul.f32.gmra.mxu1 %v94_v35  ;;  %v868_v35 = vadd.f32 %v867_v43, %v803_v28 }
 0x31e   :  { %v902_v51 = vpop.f32.mrf.mxu1 }
 0x31f   :  { %v4291_v13 = vadd.f32 %v902_v51, %v838_v50  ;;  %v871_v51 = vadd.f32 %v870_v3, %v806_v2 }
 0x321   :  { %3361 = vmatmul.msk.f32.vlgmr.msra.gmra.mxu2 %vm160_vm0, %v4291_v13 }
 0x326   :  { %v905_v59 = vpop.f32.mrf.mxu1 }
 0x327   :  { %v4298_v55 = vadd.f32 %v905_v59, %v841_v7  ;;  %v876_v59 = vpop.f32.mrf.mxu3 }
 0x328   :  { %v877_v42 = vadd.f32 %v876_v59, %v812_v10 }
 0x329   :  { %3362 = vmatmul.msk.f32.gmra.mxu2 %vm160_vm0, %v4298_v55 }
 0x32e   :  { %v908_v60 = vpop.f32.mrf.mxu1 }
 0x32f   :  { %v4306_v61 = vadd.f32 %v908_v60, %v844_v58 }
 0x331   :  { %3363 = vmatmul.msk.f32.gmra.mxu2 %vm160_vm0, %v4306_v61 }
 0x336   :  { %v911_v48 = vpop.f32.mrf.mxu1 }
 0x337   :  { %v4312_v38 = vadd.f32 %v911_v48, %v847_v53  ;;  %v879_v53 = vpop.f32.mrf.mxu3 }
 0x338   :  { %v880_v39 = vadd.f32 %v879_v53, %v815_v16 }
 0x339   :  { %3364 = vmatmul.msk.f32.gmra.mxu2 %vm160_vm0, %v4312_v38 }
 0x33e   :  { %v914_v5 = vpop.f32.mrf.mxu1 }
 0x33f   :  { %v4318_v8 = vadd.f32 %v914_v5, %v850_v0  ;;  %v882_v49 = vpop.f32.mrf.mxu3 }
 0x340   :  { %v883_v1 = vadd.f32 %v882_v49, %v818_v24 }
 0x341   :  { %3365 = vmatmul.msk.f32.gmra.mxu2 %vm160_vm0, %v4318_v8 }
 0x346   :  { %v917_v23 = vpop.f32.mrf.mxu1 }
 0x347   :  { %v4324_v19 = vadd.f32 %v917_v23, %v853_v14 }
 0x349   :  { %3366 = vmatmul.msk.f32.gmra.mxu2 %vm160_vm0, %v4324_v19 }
 0x34e   :  { %v920_v57 = vpop.f32.mrf.mxu1 }
 0x34f   :  { %v4330_v33 = vadd.f32 %v920_v57, %v856_v9 }
 0x351   :  { %3367 = vmatmul.msk.f32.gmra.mxu2 %vm160_vm0, %v4330_v33 }
 0x356   :  { %v923_v37 = vpop.f32.mrf.mxu1 }
 0x357   :  { %v4336_v40 = vadd.f32 %v923_v37, %v859_v45 }
 0x359   :  { %3368 = vmatmul.msk.f32.gmra.mxu2 %vm160_vm0, %v4336_v40 }
 0x35e   :  { %v926_v41 = vpop.f32.mrf.mxu1 }
 0x35f   :  { %v4342_v44 = vadd.f32 %v926_v41, %v862_v18 }
 0x361   :  { %3369 = vmatmul.msk.f32.gmra.mxu2 %vm160_vm0, %v4342_v44 }
 0x366   :  { %v929_v46 = vpop.f32.mrf.mxu1 }
 0x367   :  { %v4348_v47 = vadd.f32 %v929_v46, %v865_v26 }
 0x369   :  { %3370 = vmatmul.msk.f32.gmra.mxu2 %vm160_vm0, %v4348_v47 }
 0x36e   :  { %v932_v31 = vpop.f32.mrf.mxu1 }
 0x36f   :  { %v4354_v50 = vadd.f32 %v932_v31, %v868_v35 }
 0x371   :  { %3371 = vmatmul.msk.f32.gmra.mxu2 %vm160_vm0, %v4354_v50 }
 0x376   :  { %v935_v52 = vpop.f32.mrf.mxu1 }
 0x377   :  { %v4360_v7 = vadd.f32 %v935_v52, %v871_v51 }
 0x379   :  { %3372 = vmatmul.msk.f32.gmra.mxu2 %vm160_vm0, %v4360_v7 }
 0x37e   :  { %v938_v15 = vpop.f32.mrf.mxu1 }
 0x37f   :  { %v4366_v58 = vadd.f32 %v938_v15, %v874_v36 }
 0x381   :  { %3373 = vmatmul.msk.f32.gmra.mxu2 %vm160_vm0, %v4366_v58 }
 0x386   :  { %v941_v60 = vpop.f32.mrf.mxu1 }
 0x387   :  { %v4372_v20 = vadd.f32 %v941_v60, %v877_v42 }
 0x389   :  { %3374 = vmatmul.msk.f32.gmra.mxu2 %vm160_vm0, %v4372_v20 }
 0x38e   :  { %v944_v48 = vpop.f32.mrf.mxu1 }
 0x38f   :  { %v4378_v63 = vadd.f32 %v944_v48, %v880_v39 }
 0x391   :  { %3375 = vmatmul.msk.f32.gmra.mxu2 %vm160_vm0, %v4378_v63 }
 0x396   :  { %v947_v21 = vpop.f32.mrf.mxu1 }
 0x397   :  { %v4384_v0 = vadd.f32 %v947_v21, %v883_v1 }
 0x399   :  { %3376 = vmatmul.msk.f32.gmra.mxu2 %vm160_vm0, %v4384_v0 }
 0x3a4   :  { %v1020_v17 = vpop.f32.mrf.mxu2 }
 0x3a5   :  { %v1068_v24 = vmax.f32 %v1020_v17, 0.0  ;;  %v951_v17 = vld [vmem:[%s5804_s3 + $0x220] sm:$0xff] }
 0x3a7   :  { %v1084_v21 = vmin.f32 %v1068_v24, 6.0  ;;  %v1888_v24 = vld [vmem:[%s5803_s2 + $0x118] sm:$0xff] }
 0x3ac   :  { %v1023_v54 = vpop.f32.mrf.mxu2 }
 0x3ad   :  { %v1069_v39 = vmax.f32 %v1023_v54, 0.0  ;;  %v952_v54 = vld [vmem:[%s5804_s3 + $0x240] sm:$0xff] }
 0x3af   :  { %v1085_v1 = vmin.f32 %v1069_v39, 6.0  ;;  %v1298_v39 = vld [vmem:[%s5803_s2 + $0x58] sm:$0xff] }
 0x3b4   :  { %v1026_v5 = vpop.f32.mrf.mxu2 }
 0x3b5   :  { %v1070_v53 = vmax.f32 %v1026_v5, 0.0  ;;  %v1131_v5 = vld [vmem:[%s5803_s2 + $0x18] sm:$0xff] }
 0x3b7   :  { %v1086_v49 = vmin.f32 %v1070_v53, 6.0  ;;  %v1234_v53 = vld [vmem:[%s5803_s2 + $0x20] sm:$0xff] }
 0x3bc   :  { %v1029_v25 = vpop.f32.mrf.mxu2 }
 0x3bd   :  { %v1071_v42 = vmax.f32 %v1029_v25, 0.0  ;;  %v953_v25 = vld [vmem:[%s5804_s3 + $0x260] sm:$0xff] }
 0x3bf   :  { %v1087_v48 = vmin.f32 %v1071_v42, 6.0 }
 0x3c4   :  { %v1032_v4 = vpop.f32.mrf.mxu2 }
 0x3c5   :  { %v1072_v15 = vmax.f32 %v1032_v4, 0.0  ;;  %v950_v4 = vld [vmem:[%s5804_s3 + $0x200] sm:$0xff] }
 0x3c7   :  { %v1088_v16 = vmin.f32 %v1072_v15, 6.0  ;;  %v1237_v15 = vld [vmem:[%s5803_s2 + $0x38] sm:$0xff] }
 0x3cc   :  { %v1035_v11 = vpop.f32.mrf.mxu2 }
 0x3cd   :  { %v1073_v36 = vmax.f32 %v1035_v11, 0.0  ;;  %v1130_v11 = vld [vmem:[%s5803_s2 + $0x10] sm:$0xff] }
 0x3cf   :  { %v1089_v60 = vmin.f32 %v1073_v36, 6.0  ;;  %v1206_v36 = vld [vmem:[%s5804_s3 + $0x2a0] sm:$0xff] }
 0x3d4   :  { %v1038_v14 = vpop.f32.mrf.mxu2 }
 0x3d5   :  { %v1074_v52 = vmax.f32 %v1038_v14, 0.0  ;;  %v1584_v14 = vld [vmem:[%s5803_s2 + $0x88] sm:$0xff] }
 0x3d6   :  { %1611 = vmatpush.msrb.mxu2 %v1584_v14 }
 0x3d7   :  { %v1090_v10 = vmin.f32 %v1074_v52, 6.0  ;;  %v1129_v52 = vld [vmem:[%s5804_s3 + $0x280] sm:$0xff] }
 0x3dc   :  { %v1041_v23 = vpop.f32.mrf.mxu2 }
 0x3dd   :  { %v1075_v32 = vmax.f32 %v1041_v23, 0.0  ;;  %v1583_v23 = vld [vmem:[%s5803_s2 + $0x80] sm:$0xff] }
 0x3de   :  { %1612 = vmatpush.msrb.mxu2 %v1583_v23 }
 0x3df   :  { %v1091_v59 = vmin.f32 %v1075_v32, 6.0 }
 0x3e4   :  { %v1044_v30 = vpop.f32.mrf.mxu2 }
 0x3e5   :  { %v1076_v31 = vmax.f32 %v1044_v30, 0.0 }
 0x3e7   :  { %v1092_v6 = vmin.f32 %v1076_v31, 6.0 }
 0x3ec   :  { %v1047_v56 = vpop.f32.mrf.mxu2 }
 0x3ed   :  { %v1077_v3 = vmax.f32 %v1047_v56, 0.0 }
 0x3ef   :  { %v1093_v51 = vmin.f32 %v1077_v3, 6.0 }
 0x3f4   :  { %v1050_v27 = vpop.f32.mrf.mxu2 }
 0x3f5   :  { %v1078_v46 = vmax.f32 %v1050_v27, 0.0 }
 0x3f7   :  { %v1094_v2 = vmin.f32 %v1078_v46, 6.0 }
 0x3fc   :  { %v1053_v29 = vpop.f32.mrf.mxu2 }
 0x3fd   :  { %v1079_v62 = vmax.f32 %v1053_v29, 0.0 }
 0x3ff   :  { %v1095_v35 = vmin.f32 %v1079_v62, 6.0 }
 0x404   :  { %v1056_v9 = vpop.f32.mrf.mxu2 }
 0x405   :  { %v1080_v41 = vmax.f32 %v1056_v9, 0.0 }
 0x407   :  { %v1096_v28 = vmin.f32 %v1080_v41, 6.0 }
 0x40c   :  { %v1059_v57 = vpop.f32.mrf.mxu2 }
 0x40d   :  { %v1081_v22 = vmax.f32 %v1059_v57, 0.0 }
 0x40f   :  { %v1097_v26 = vmin.f32 %v1081_v22, 6.0 }
 0x414   :  { %v1062_v34 = vpop.f32.mrf.mxu2 }
 0x415   :  { %v1082_v12 = vmax.f32 %v1062_v34, 0.0 }
 0x417   :  { %v1098_v43 = vmin.f32 %v1082_v12, 6.0 }
 0x41c   :  { %v1065_v45 = vpop.f32.mrf.mxu2 }
 0x41d   :  { %v1083_v37 = vmax.f32 %v1065_v45, 0.0 }
 0x41f   :  { %v1099_v18 = vmin.f32 %v1083_v37, 6.0 }
 0x421   :  { %1100 = vmatpush.msrb.mxu3 %v1099_v18 }
 0x423   :  { %1101 = vmatpush.msrb.mxu3 %v1098_v43 }
 0x425   :  { %1102 = vmatpush.msrb.mxu3 %v1097_v26 }
 0x427   :  { %1103 = vmatpush.msrb.mxu3 %v1096_v28 }
 0x429   :  { %1104 = vmatpush.msrb.mxu3 %v1095_v35 }
 0x42b   :  { %1105 = vmatpush.msrb.mxu3 %v1094_v2 }
 0x42d   :  { %1106 = vmatpush.msrb.mxu3 %v1093_v51 }
 0x42f   :  { %1107 = vmatpush.msrb.mxu3 %v1092_v6  ;;  %v1889_v6 = vld [vmem:[%s5803_s2 + $0x120] sm:$0xff] }
 0x430   :  { %1902 = vmatpush.msra.mxu2 %v1889_v6 }
 0x431   :  { %1108 = vmatpush.msrb.mxu3 %v1091_v59 }
 0x432   :  { %1903 = vmatpush.msra.mxu2 %v1888_v24 }
 0x433   :  { %1109 = vmatpush.msrb.mxu3 %v1090_v10  ;;  %v1236_v10 = vld [vmem:[%s5803_s2 + $0x30] sm:$0xff] }
 0x435   :  { %1110 = vmatpush.msrb.mxu3 %v1089_v60  ;;  %v1235_v60 = vld [vmem:[%s5803_s2 + $0x28] sm:$0xff] }
 0x437   :  { %1111 = vmatpush.msrb.mxu3 %v1088_v16 }
 0x439   :  { %1112 = vmatpush.msrb.mxu3 %v1087_v48  ;;  %v1297_v48 = vld [vmem:[%s5803_s2 + $0x50] sm:$0xff] }
 0x43b   :  { %1113 = vmatpush.msrb.mxu3 %v1086_v49  ;;  %v1296_v49 = vld [vmem:[%s5803_s2 + $0x48] sm:$0xff] }
 0x43d   :  { %1114 = vmatpush.msrb.mxu3 %v1085_v1  ;;  %v1887_v1 = vld [vmem:[%s5803_s2 + $0x110] sm:$0xff] }
 0x43e   :  { %1904 = vmatpush.msra.mxu2 %v1887_v1 }
 0x43f   :  { %1115 = vmatpush.msrb.mxu3 %v1084_v21  ;;  %v1295_v21 = vld [vmem:[%s5803_s2 + $0x40] sm:$0xff] }
 0x440   :  { %1116 = vmatmul.f32.vlgmr.msrb.gmra.mxu3 %v950_v4  ;;  %v1886_v4 = vld [vmem:[%s5803_s2 + $0x108] sm:$0xff] }
 0x441   :  { %1159 = vmatpush.msra.mxu3 %v1131_v5  ;;  %1905 = vmatpush.msra.mxu2 %v1886_v4  ;;  %v1390_v5 = vld [vmem:[%s5803_s2 + $0x78] sm:$0xff] }
 0x443   :  { %1160 = vmatpush.msra.mxu3 %v1130_v11 }
 0x448   :  { %1119 = vmatmul.f32.gmra.mxu3 %v951_v17  ;;  %v1389_v17 = vld [vmem:[%s5803_s2 + $0x70] sm:$0xff] }
 0x450   :  { %1122 = vmatmul.f32.gmra.mxu3 %v952_v54  ;;  %v1388_v54 = vld [vmem:[%s5803_s2 + $0x68] sm:$0xff] }
 0x458   :  { %1125 = vmatmul.f32.gmra.mxu3 %v953_v25  ;;  %v1387_v25 = vld [vmem:[%s5803_s2 + $0x60] sm:$0xff] }
 0x4c3   :  { %v1117_v30 = vpop.f32.mrf.mxu3 }
 0x4c4   :  { %v1575_v56 = vmax.f32 %v1117_v30, 0.0  ;;  %3377 = vmatmul.msk.f32.vlgmr.msra.gmra.mxu3 %vm1132_vm1, %v1117_v30  ;;  %v1446_v30 = vld [vmem:[%s5803_s2 + $0xa8] sm:$0xff] }
 0x4c6   :  { %v4413_v27 = vmin.f32 %v1575_v56, 6.0  ;;  %v1445_v56 = vld [vmem:[%s5803_s2 + $0xa0] sm:$0xff] }
 0x4c8   :  { %3400 = vmatmul.msk.f32.vlgmr.msrb.gmra.mxu2 %vm1132_vm1, %v4413_v27 }
 0x4cb   :  { %v1120_v29 = vpop.f32.mrf.mxu3 }
 0x4cc   :  { %v1576_v9 = vmax.f32 %v1120_v29, 0.0  ;;  %3378 = vmatmul.msk.f32.gmra.mxu3 %vm1132_vm1, %v1120_v29  ;;  %v1444_v29 = vld [vmem:[%s5803_s2 + $0x98] sm:$0xff] }
 0x4ce   :  { %v4418_v57 = vmin.f32 %v1576_v9, 6.0  ;;  %v1443_v9 = vld [vmem:[%s5803_s2 + $0x90] sm:$0xff] }
 0x4d0   :  { %3401 = vmatmul.msk.f32.gmra.mxu2 %vm1132_vm1, %v4418_v57 }
 0x4d3   :  { %v1123_v34 = vpop.f32.mrf.mxu3 }
 0x4d4   :  { %v1577_v45 = vmax.f32 %v1123_v34, 0.0  ;;  %3379 = vmatmul.msk.f32.gmra.mxu3 %vm1132_vm1, %v1123_v34 }
 0x4d6   :  { %v4423_v12 = vmin.f32 %v1577_v45, 6.0 }
 0x4d8   :  { %3402 = vmatmul.msk.f32.gmra.mxu2 %vm1132_vm1, %v4423_v12 }
 0x4db   :  { %v1126_v37 = vpop.f32.mrf.mxu3 }
 0x4dc   :  { %v1578_v22 = vmax.f32 %v1126_v37, 0.0  ;;  %3380 = vmatmul.msk.f32.gmra.mxu3 %vm1132_vm1, %v1126_v37 }
 0x4de   :  { %v4428_v18 = vmin.f32 %v1578_v22, 6.0 }
 0x4e0   :  { %3403 = vmatmul.msk.f32.gmra.mxu2 %vm1132_vm1, %v4428_v18 }
 0x547   :  { %v1162_v41 = vpop.f32.mrf.mxu3 }
 0x548   :  { %v1174_v31 = vmax.f32 %v1162_v41, 0.0 }
 0x54a   :  { %v1178_v51 = vmin.f32 %v1174_v31, 6.0 }
 0x54f   :  { %v1165_v43 = vpop.f32.mrf.mxu3 }
 0x550   :  { %v1175_v3 = vmax.f32 %v1165_v43, 0.0  ;;  %v4510_v43 = vpop.f32.mrf.mxu2 }
 0x552   :  { %v1179_v32 = vmin.f32 %v1175_v3, 6.0 }
 0x557   :  { %v1168_v62 = vpop.f32.mrf.mxu3 }
 0x558   :  { %v1176_v46 = vmax.f32 %v1168_v62, 0.0 }
 0x55a   :  { %v1180_v2 = vmin.f32 %v1176_v46, 6.0 }
 0x55f   :  { %v1171_v26 = vpop.f32.mrf.mxu3 }
 0x560   :  { %v1177_v28 = vmax.f32 %v1171_v26, 0.0 }
 0x562   :  { %v1181_v35 = vmin.f32 %v1177_v28, 6.0  ;;  %v4512_v28 = vpop.f32.mrf.mxu2 }
 0x564   :  { %1198 = vmatpush.msrb.mxu3 %v1181_v35 }
 0x566   :  { %1199 = vmatpush.msrb.mxu3 %v1180_v2 }
 0x568   :  { %1200 = vmatpush.msrb.mxu3 %v1179_v32 }
 0x56a   :  { %1201 = vmatpush.msrb.mxu3 %v1178_v51  ;;  %v4516_v31 = vpop.f32.mrf.mxu2 }
 0x56b   :  { %3381 = vmatmul.msk.f32.vlgmr.msrb.gmra.mxu3 %vm1182_vm2, %v1129_v52 }
 0x572   :  { %v4521_v52 = vpop.f32.mrf.mxu2 }
 0x5ee   :  { %v1203_v59 = vpop.f32.mrf.mxu3 }
 0x5ef   :  { %1225 = vmatpush.msra.mxu3 %v1203_v59  ;;  %v1232_v42 = vmax.f32 %v1203_v59, 0.0 }
 0x5f0   :  { %3382 = vmatmul.msk.f32.vlgmr.msra.gmra.mxu3 %vm160_vm0, %v1206_v36 }
 0x5f1   :  { %1253 = vmatpush.msrb.mxu3 %v1237_v15  ;;  %v4455_v16 = vmin.f32 %v1232_v42, 6.0 }
 0x5f3   :  { %1254 = vmatpush.msrb.mxu3 %v1236_v10 }
 0x5f5   :  { %1255 = vmatpush.msrb.mxu3 %v1235_v60 }
 0x5f7   :  { %1256 = vmatpush.msrb.mxu3 %v1234_v53 }
 0x5f8   :  { %3384 = vmatmul.msk.f32.vlgmr.msrb.gmra.mxu3 %vm1182_vm2, %v4455_v16 }
 0x5f9   :  { %1314 = vmatpush.msra.mxu3 %v1298_v39 }
 0x5fb   :  { %1315 = vmatpush.msra.mxu3 %v1297_v48 }
 0x5fd   :  { %1316 = vmatpush.msra.mxu3 %v1296_v49 }
 0x5ff   :  { %1317 = vmatpush.msra.mxu3 %v1295_v21 }
 0x601   :  { %1403 = vmatpush.msrb.mxu3 %v1390_v5 }
 0x603   :  { %1404 = vmatpush.msrb.mxu3 %v1389_v17 }
 0x605   :  { %1405 = vmatpush.msrb.mxu3 %v1388_v54 }
 0x607   :  { %1406 = vmatpush.msrb.mxu3 %v1387_v25 }
 0x673   :  { %v1227_v11 = vpop.f32.mrf.mxu3 }
 0x674   :  { %v1293_v14 = vmax.f32 %v1227_v11, 0.0 }
 0x676   :  { %v1294_v23 = vmin.f32 %v1293_v14, 6.0 }
 0x678   :  { %3385 = vmatmul.msk.f32.vlgmr.msra.gmra.mxu3 %vm1182_vm2, %v1294_v23  ;;  %3412 = vmatmul.msk.f32.vlgmr.msra.gmra.mxu2 %vm1182_vm2, %v1294_v23 }
 0x679   :  { %1459 = vmatpush.msra.mxu3 %v1446_v30 }
 0x67b   :  { %1460 = vmatpush.msra.mxu3 %v1445_v56  ;;  %v1258_v34 = vpop.f32.mrf.mxu3 }
 0x67c   :  { %v1261_v45 = vsel %vm1182_vm2, %v1258_v34, 0.0 }
 0x67d   :  { %1461 = vmatpush.msra.mxu3 %v1444_v29  ;;  %v1262_v37 = vrot.slane %v1261_v45, 4 }
 0x67f   :  { %1462 = vmatpush.msra.mxu3 %v1443_v9  ;;  %v1263_v22 = vadd.f32 %v1262_v37, %v1261_v45 }
 0x680   :  { %3388 = vmatmul.msk.f32.vlgmr.msrb.gmra.mxu3 %vm1182_vm2, %v4455_v16 }
 0x681   :  { %v1264_v41 = vrot.slane %v1263_v22, 2 }
 0x683   :  { %v1265_v62 = vadd.f32 %v1264_v41, %v1263_v22 }
 0x685   :  { %v1266_v26 = vrot.slane %v1265_v62, 1 }
 0x687   :  { %v1267_v46 = vadd.f32 %v1266_v26, %v1265_v62 }
 0x688   :  { %3389 = vmatmul.msk.f32.vlgmr.msra.gmra.mxu3 %vm1182_vm2, %v1294_v23 }
 0x689   :  { %v1268_v3 = vmul.f32 0.125, %v1267_v46 }
 0x68b   :  { %v4514_v35 = vsub.f32 %v1258_v34, %v1268_v3 }
 0x68d   :  { %v1270_v2 = vmul.f32 %v4514_v35, %v4514_v35 }
 0x68f   :  { %v1271_v32 = vsel %vm1182_vm2, %v1270_v2, 0.0 }
 0x690   :  { %v1272_v51 = vrot.slane %v1271_v32, 4 }
 0x692   :  { %v1273_v6 = vadd.f32 %v1272_v51, %v1271_v32 }
 0x694   :  { %v1274_v36 = vrot.slane %v1273_v6, 2 }
 0x696   :  { %v1275_v10 = vadd.f32 %v1274_v36, %v1273_v6 }
 0x698   :  { %v1276_v49 = vrot.slane %v1275_v10, 1 }
 0x69a   :  { %v1277_v54 = vadd.f32 %v1276_v49, %v1275_v10 }
 0x69c   :  { %v1278_v9 = vmul.f32 0.125, %v1277_v54 }
 0x69e   :  { %v4530_v46 = vadd.f32 1e-05, %v1278_v9 }
 0x6a0   :  { %3579 = vrsqrt.f32 %v4530_v46  ;;  %vm1286_vm4 = vweird.f32 %v4530_v46 }
 0x6fb   :  { %v1319_v59 = vpop.f32.mrf.mxu3  ;;  %v1907_v15 = vpop.f32.mrf.mxu2 }
 0x6fc   :  { %v1322_v42 = vsel %vm1182_vm2, %v1319_v59, 0.0  ;;  %v1910_v60 = vsel %vm1182_vm2, %v1907_v15, 0.0 }
 0x6fd   :  { %v1323_v53 = vrot.slane %v1322_v42, 4  ;;  %v1911_v39 = vrot.slane %v1910_v60, 4 }
 0x6ff   :  { %v1324_v48 = vadd.f32 %v1323_v53, %v1322_v42  ;;  %v1912_v24 = vadd.f32 %v1911_v39, %v1910_v60 }
 0x701   :  { %v1325_v1 = vrot.slane %v1324_v48, 2  ;;  %v1913_v21 = vrot.slane %v1912_v24, 2 }
 0x703   :  { %v1326_v4 = vadd.f32 %v1325_v1, %v1324_v48  ;;  %v1914_v5 = vadd.f32 %v1913_v21, %v1912_v24  ;;  %v1408_v17 = vpop.f32.mrf.mxu3 }
 0x704   :  { %v1411_v25 = vsel %vm1182_vm2, %v1408_v17, 0.0 }
 0x705   :  { %v1327_v11 = vrot.slane %v1326_v4, 1  ;;  %v1915_v14 = vrot.slane %v1914_v5, 1  ;;  %v1412_v23 = vrot.slane %v1411_v25, 4 }
 0x707   :  { %v1328_v30 = vadd.f32 %v1327_v11, %v1326_v4  ;;  %v1916_v56 = vadd.f32 %v1915_v14, %v1914_v5  ;;  %v1413_v29 = vadd.f32 %v1412_v23, %v1411_v25  ;;  %v4544_v25 = vpop.eup %3579 }
 0x708   :  { %vm1287_vm3 = vweird.f32 %v4544_v25 }
 0x709   :  { %v1329_v34 = vmul.f32 0.125, %v1328_v30  ;;  %v1917_v45 = vmul.f32 0.125, %v1916_v56  ;;  %v1414_v37 = vrot.slane %v1413_v29, 2  ;;  %vm1288_vm5 = vmor %vm1286_vm4, %vm1287_vm3 }
 0x70b   :  { %v4526_v22 = vsub.f32 %v1319_v59, %v1329_v34  ;;  %v4528_v41 = vsub.f32 %v1907_v15, %v1917_v45  ;;  %v1415_v62 = vadd.f32 %v1414_v37, %v1413_v29  ;;  %v1464_v26 = vpop.f32.mrf.mxu3 }
 0x70c   :  { %v1467_v3 = vsel %vm1182_vm2, %v1464_v26, 0.0 }
 0x70d   :  { %v1331_v2 = vmul.f32 %v4526_v22, %v4526_v22  ;;  %v1919_v32 = vmul.f32 %v4528_v41, %v4528_v41  ;;  %v1416_v51 = vrot.slane %v1415_v62, 1  ;;  %v1468_v6 = vrot.slane %v1467_v3, 4 }
 0x70f   :  { %v1332_v36 = vsel %vm1182_vm2, %v1331_v2, 0.0  ;;  %v1920_v59 = vsel %vm1182_vm2, %v1919_v32, 0.0  ;;  %v1417_v15 = vadd.f32 %v1416_v51, %v1415_v62  ;;  %v1469_v10 = vadd.f32 %v1468_v6, %v1467_v3 }
 0x710   :  { %v1333_v42 = vrot.slane %v1332_v36, 4  ;;  %v1921_v60 = vrot.slane %v1920_v59, 4 }
 0x711   :  { %v1418_v53 = vmul.f32 0.125, %v1417_v15  ;;  %v1470_v39 = vrot.slane %v1469_v10, 2 }
 0x712   :  { %v1334_v48 = vadd.f32 %v1333_v42, %v1332_v36  ;;  %v1922_v24 = vadd.f32 %v1921_v60, %v1920_v59 }
 0x713   :  { %v4540_v49 = vsub.f32 %v1408_v17, %v1418_v53  ;;  %v1471_v1 = vadd.f32 %v1470_v39, %v1469_v10  ;;  %v1281_v17 = vmul.f32 %v4544_v25, %v4530_v46 }
 0x714   :  { %v1335_v21 = vrot.slane %v1334_v48, 2  ;;  %v1923_v4 = vrot.slane %v1922_v24, 2 }
 0x715   :  { %v1420_v5 = vmul.f32 %v4540_v49, %v4540_v49  ;;  %v1472_v54 = vrot.slane %v1471_v1, 1  ;;  %v1282_v6 = vmul.f32 %v4544_v25, %v1281_v17 }
 0x716   :  { %v1336_v11 = vadd.f32 %v1335_v21, %v1334_v48  ;;  %v1924_v14 = vadd.f32 %v1923_v4, %v1922_v24 }
 0x717   :  { %v1421_v23 = vsel %vm1182_vm2, %v1420_v5, 0.0  ;;  %v1473_v30 = vadd.f32 %v1472_v54, %v1471_v1  ;;  %v1283_v53 = vmul.f32 0.5, %v1282_v6 }
 0x718   :  { %v1337_v56 = vrot.slane %v1336_v11, 1  ;;  %v1925_v29 = vrot.slane %v1924_v14, 1  ;;  %v1422_v9 = vrot.slane %v1421_v23, 4 }
 0x719   :  { %v1474_v34 = vmul.f32 0.125, %v1473_v30  ;;  %v1284_v1 = vsub.f32 1.5, %v1283_v53 }
 0x71a   :  { %v1338_v45 = vadd.f32 %v1337_v56, %v1336_v11  ;;  %v1926_v37 = vadd.f32 %v1925_v29, %v1924_v14  ;;  %v1423_v62 = vadd.f32 %v1422_v9, %v1421_v23 }
 0x71b   :  { %v4549_v3 = vsub.f32 %v1464_v26, %v1474_v34  ;;  %v1285_v23 = vmul.f32 %v4544_v25, %v1284_v1  ;;  %v1290_v34 = vstv %s4558_s10 }
 0x71c   :  { %v1339_v2 = vmul.f32 0.125, %v1338_v45  ;;  %v1927_v32 = vmul.f32 0.125, %v1926_v37  ;;  %v1424_v51 = vrot.slane %v1423_v62, 2 }
 0x71d   :  { %v1476_v36 = vmul.f32 %v4549_v3, %v4549_v3  ;;  %v1289_v45 = vsel %vm1288_vm5, %v4544_v25, %v1285_v23 }
 0x71e   :  { %v1340_v59 = vadd.f32 1e-05, %v1339_v2  ;;  %v4554_v15 = vadd.f32 1e-05, %v1927_v32  ;;  %v1425_v10 = vadd.f32 %v1424_v51, %v1423_v62  ;;  %v1351_v32 = vstv %s4560_s11 }
 0x71f   :  { %v1477_v42 = vsel %vm1182_vm2, %v1476_v36, 0.0 }
 0x720   :  { %3581 = vrsqrt.f32 %v1340_v59  ;;  %v1426_v60 = vrot.slane %v1425_v10, 1  ;;  %v1478_v26 = vrot.slane %v1477_v42, 4  ;;  %vm1347_vm7 = vweird.f32 %v1340_v59 }
 0x721   :  { %3583 = vrsqrt.f32 %v4554_v15  ;;  %vm1935_vm13 = vweird.f32 %v4554_v15 }
 0x722   :  { %v1427_v39 = vadd.f32 %v1426_v60, %v1425_v10  ;;  %v1479_v48 = vadd.f32 %v1478_v26, %v1477_v42  ;;  %v1291_v42 = vmul.f32 %v1290_v34, %v1289_v45  ;;  %v4587_v34 = vld [vmem:[%s5804_s3 + $0x2c0] sm:$0xff] }
 0x724   :  { %v1428_v24 = vmul.f32 0.125, %v1427_v39  ;;  %v1480_v21 = vrot.slane %v1479_v48, 2  ;;  %v1292_v39 = vmul.f32 %v1291_v42, %v4514_v35 }
 0x726   :  { %v3582_v4 = vpop.eup %3581  ;;  %v1429_v5 = vadd.f32 1e-05, %v1428_v24  ;;  %v1481_v14 = vadd.f32 %v1480_v21, %v1479_v48 }
 0x727   :  { %v4562_v54 = vpop.eup %3583  ;;  %v1342_v11 = vmul.f32 %v3582_v4, %v1340_v59  ;;  %vm1348_vm6 = vweird.f32 %v3582_v4 }
 0x728   :  { %3585 = vrsqrt.f32 %v1429_v5  ;;  %v1482_v56 = vrot.slane %v1481_v14, 1  ;;  %v1930_v29 = vmul.f32 %v4562_v54, %v4554_v15  ;;  %vm1349_vm8 = vmor %vm1347_vm7, %vm1348_vm6  ;;  %vm1436_vm10 = vweird.f32 %v1429_v5  ;;  %v1832_v15 = vld [vmem:[%s5803_s2 + $0xe0] sm:$0xff] }
 0x729   :  { %v1343_v30 = vmul.f32 %v3582_v4, %v1342_v11  ;;  %vm1936_vm12 = vweird.f32 %v4562_v54 }
 0x72a   :  { %v1483_v17 = vadd.f32 %v1482_v56, %v1481_v14  ;;  %v1931_v51 = vmul.f32 %v4562_v54, %v1930_v29  ;;  %v1440_v14 = vstv %s3386_s12  ;;  %vm1937_vm14 = vmor %vm1935_vm13, %vm1936_vm12 }
 0x72b   :  { %v1344_v9 = vmul.f32 0.5, %v1343_v30 }
 0x72c   :  { %v1484_v62 = vmul.f32 0.125, %v1483_v17  ;;  %v1932_v26 = vmul.f32 0.5, %v1931_v51 }
 0x72d   :  { %v1345_v37 = vsub.f32 1.5, %v1344_v9 }
 0x72e   :  { %v3586_v2 = vpop.eup %3585  ;;  %v1485_v10 = vadd.f32 1e-05, %v1484_v62  ;;  %v1933_v59 = vsub.f32 1.5, %v1932_v26  ;;  %v1830_v26 = vld [vmem:[%s5803_s2 + $0xd0] sm:$0xff] }
 0x72f   :  { %v1346_v6 = vmul.f32 %v3582_v4, %v1345_v37  ;;  %v1431_v36 = vmul.f32 %v3586_v2, %v1429_v5  ;;  %vm1437_vm9 = vweird.f32 %v3586_v2  ;;  %v1833_v37 = vld [vmem:[%s5803_s2 + $0xe8] sm:$0xff] }
 0x730   :  { %3587 = vrsqrt.f32 %v1485_v10  ;;  %vm1438_vm11 = vmor %vm1436_vm10, %vm1437_vm9  ;;  %vm1492_vm3 = vweird.f32 %v1485_v10 }
 0x731   :  { %v1350_v46 = vsel %vm1349_vm8, %v3582_v4, %v1346_v6  ;;  %v1432_v60 = vmul.f32 %v3586_v2, %v1431_v36  ;;  %v1496_v6 = vstv %s4578_s14 }
 0x732   :  { %v1352_v53 = vmul.f32 %v1351_v32, %v1350_v46 }
 0x733   :  { %v1433_v25 = vmul.f32 0.5, %v1432_v60 }
 0x734   :  { %v1353_v48 = vmul.f32 %v1352_v53, %v4526_v22  ;;  %v1934_v22 = vmul.f32 %v4562_v54, %v1933_v59 }
 0x735   :  { %v1434_v24 = vsub.f32 1.5, %v1433_v25 }
 0x736   :  { %v1354_v1 = vadd.f32 %v1353_v48, %v1292_v39  ;;  %v3588_v21 = vpop.eup %3587  ;;  %v1938_v62 = vsel %vm1937_vm14, %v4562_v54, %v1934_v22  ;;  %v1831_v54 = vld [vmem:[%s5803_s2 + $0xd8] sm:$0xff]  ;;  %v4611_v48 = vld [vmem:[%s5804_s3 + $0x2e0] sm:$0xff] }
 0x737   :  { %v1435_v11 = vmul.f32 %v3586_v2, %v1434_v24  ;;  %v1487_v23 = vmul.f32 %v3588_v21, %v1485_v10  ;;  %vm1493_vm15 = vweird.f32 %v3588_v21 }
 0x738   :  { %v1355_v4 = vsel %vm1182_vm2, %v1354_v1, 0.0  ;;  %vm1494_vm4 = vmor %vm1492_vm3, %vm1493_vm15 }
 0x739   :  { %v1356_v35 = vrot.slane %v1355_v4, 4  ;;  %v1439_v30 = vsel %vm1438_vm11, %v3586_v2, %v1435_v11  ;;  %v1488_v29 = vmul.f32 %v3588_v21, %v1487_v23  ;;  %v1939_v2 = vstv %s4575_s13  ;;  %v1682_v23 = vld [vmem:[%s5803_s2 + $0xb8] sm:$0xff] }
 0x73a   :  { %v1441_v56 = vmul.f32 %v1440_v14, %v1439_v30  ;;  %v1940_v42 = vmul.f32 %v1939_v2, %v1938_v62  ;;  %v1683_v14 = vld [vmem:[%s5803_s2 + $0xc0] sm:$0xff]  ;;  %v1681_v30 = vld [vmem:[%s5803_s2 + $0xb0] sm:$0xff] }
 0x73b   :  { %v1357_v9 = vadd.f32 %v1356_v35, %v1355_v4  ;;  %v1489_v17 = vmul.f32 0.5, %v1488_v29 }
 0x73c   :  { %v1442_v5 = vmul.f32 %v1441_v56, %v4540_v49  ;;  %v1941_v10 = vmul.f32 %v1940_v42, %v4528_v41  ;;  %v4642_v56 = vld [vmem:[%s5804_s3 + $0x320] sm:$0xff] }
 0x73d   :  { %v1358_v45 = vrot.slane %v1357_v9, 2  ;;  %v1490_v32 = vsub.f32 1.5, %v1489_v17 }
 0x73e   :  { %1559 = vmatpush.msrb.mxu1 %v1442_v5 }
 0x73f   :  { %v1359_v49 = vadd.f32 %v1358_v45, %v1357_v9  ;;  %3394 = vmatmul.msk.f32.vlgmr.msrb.gmra.mxu1 %vm160_vm0, %v4587_v34  ;;  %v1491_v51 = vmul.f32 %v3588_v21, %v1490_v32 }
 0x740   :  { %1846 = vmatpush.msra.mxu1 %v1833_v37 }
 0x741   :  { %v1360_v36 = vrot.slane %v1359_v49, 1  ;;  %v1495_v46 = vsel %vm1494_vm4, %v3588_v21, %v1491_v51 }
 0x742   :  { %1847 = vmatpush.msra.mxu1 %v1832_v15  ;;  %v1497_v53 = vmul.f32 %v1496_v6, %v1495_v46 }
 0x743   :  { %v1361_v60 = vadd.f32 %v1360_v36, %v1359_v49 }
 0x744   :  { %1848 = vmatpush.msra.mxu1 %v1831_v54  ;;  %v1498_v39 = vmul.f32 %v1497_v53, %v4549_v3  ;;  %v4621_v3 = vld [vmem:[%s5804_s3 + $0x300] sm:$0xff] }
 0x745   :  { %v1362_v25 = vmul.f32 0.125, %v1361_v60 }
 0x746   :  { %1849 = vmatpush.msra.mxu1 %v1830_v26  ;;  %1530 = vmatpush.msrb.mxu3 %v1498_v39 }
 0x747   :  { %v1363_v24 = vsub.f32 %v1354_v1, %v1362_v25  ;;  %3395 = vmatmul.msk.f32.gmra.mxu1 %vm160_vm0, %v4611_v48  ;;  %3390 = vmatmul.msk.f32.vlgmr.msrb.gmra.mxu3 %vm160_vm0, %v4587_v34  ;;  %v1684_v1 = vld [vmem:[%s5803_s2 + $0xc8] sm:$0xff] }
 0x748   :  { %2021 = vmatpush.msrb.mxu1 %v1941_v10  ;;  %1700 = vmatpush.msra.mxu3 %v1684_v1 }
 0x749   :  { %v1364_v59 = vmul.f32 %v1363_v24, %v1363_v24 }
 0x74a   :  { %1701 = vmatpush.msra.mxu3 %v1683_v14 }
 0x74b   :  { %v1365_v41 = vsel %vm1182_vm2, %v1364_v59, 0.0 }
 0x74c   :  { %v1366_v21 = vrot.slane %v1365_v41, 4  ;;  %1702 = vmatpush.msra.mxu3 %v1682_v23 }
 0x74e   :  { %v1367_v11 = vadd.f32 %v1366_v21, %v1365_v41  ;;  %1703 = vmatpush.msra.mxu3 %v1681_v30 }
 0x74f   :  { %3396 = vmatmul.msk.f32.gmra.mxu1 %vm160_vm0, %v4621_v3  ;;  %3391 = vmatmul.msk.f32.gmra.mxu3 %vm160_vm0, %v4611_v48 }
 0x750   :  { %v1368_v4 = vrot.slane %v1367_v11, 2 }
 0x752   :  { %v1369_v35 = vadd.f32 %v1368_v4, %v1367_v11 }
 0x754   :  { %v1370_v22 = vrot.slane %v1369_v35, 1 }
 0x756   :  { %v1371_v29 = vadd.f32 %v1370_v22, %v1369_v35 }
 0x757   :  { %3397 = vmatmul.msk.f32.gmra.mxu1 %vm160_vm0, %v4642_v56  ;;  %3392 = vmatmul.msk.f32.gmra.mxu3 %vm160_vm0, %v4621_v3 }
 0x758   :  { %v1372_v9 = vmul.f32 0.125, %v1371_v29 }
 0x75a   :  { %v1373_v5 = vadd.f32 1e-05, %v1372_v9 }
 0x75c   :  { %3589 = vrsqrt.f32 %v1373_v5  ;;  %vm1380_vm6 = vweird.f32 %v1373_v5 }
 0x75f   :  { %3411 = vmatmul.msk.f32.vlgmr.msra.gmra.mxu1 %vm1182_vm2, %v4455_v16  ;;  %3393 = vmatmul.msk.f32.gmra.mxu3 %vm160_vm0, %v4642_v56 }
 0x762   :  { %v3590_v17 = vpop.eup %3589 }
 0x763   :  { %v1375_v45 = vmul.f32 %v3590_v17, %v1373_v5  ;;  %vm1381_vm5 = vweird.f32 %v3590_v17 }
 0x764   :  { %vm1382_vm7 = vmor %vm1380_vm6, %vm1381_vm5 }
 0x765   :  { %v1376_v37 = vmul.f32 %v3590_v17, %v1375_v45 }
 0x767   :  { %v1377_v62 = vmul.f32 0.5, %v1376_v37 }
 0x769   :  { %v1378_v2 = vsub.f32 1.5, %v1377_v62 }
 0x76b   :  { %v1379_v32 = vmul.f32 %v3590_v17, %v1378_v2 }
 0x76d   :  { %v1383_v49 = vsel %vm1382_vm7, %v3590_v17, %v1379_v32  ;;  %v4678_v17 = vld [vmem:[%s5804_s3 + $0x340] sm:$0xff] }
 0x76e   :  { %v1384_v15 = vmul.f32 %v1383_v49, %v1363_v24  ;;  %3413 = vmatmul.msk.f32.vlgmr.msrb.gmra.mxu1 %vm160_vm0, %v4678_v17 }
 0x770   :  { %v1679_v51 = vmax.f32 %v1384_v15, 0.0 }
 0x772   :  { %v4652_v6 = vmin.f32 %v1679_v51, 6.0 }
 0x774   :  { %3404 = vmatmul.msk.f32.vlgmr.msra.gmra.mxu3 %vm1182_vm2, %v4652_v6 }
 0x7bc   :  { %v4656_v16 = vpop.f32.mrf.mxu1 }
 0x7c4   :  { %v4658_v36 = vpop.f32.mrf.mxu1 }
 0x7ca   :  { %v4662_v54 = vpop.f32.mrf.mxu3 }
 0x7cc   :  { %v4660_v42 = vpop.f32.mrf.mxu1 }
 0x7d2   :  { %v4666_v60 = vpop.f32.mrf.mxu3 }
 0x7d4   :  { %v4664_v46 = vpop.f32.mrf.mxu1 }
 0x7da   :  { %v4669_v24 = vpop.f32.mrf.mxu3 }
 0x7dc   :  { %v1851_v53 = vpop.f32.mrf.mxu1 }
 0x7dd   :  { %v1854_v26 = vsel %vm1182_vm2, %v1851_v53, 0.0 }
 0x7de   :  { %v1855_v25 = vrot.slane %v1854_v26, 4 }
 0x7e0   :  { %v1856_v10 = vadd.f32 %v1855_v25, %v1854_v26 }
 0x7e2   :  { %v1857_v39 = vrot.slane %v1856_v10, 2  ;;  %v4671_v14 = vpop.f32.mrf.mxu3 }
 0x7e4   :  { %v1858_v59 = vadd.f32 %v1857_v39, %v1856_v10 }
 0x7e6   :  { %v1859_v41 = vrot.slane %v1858_v59, 1 }
 0x7e8   :  { %v1860_v21 = vadd.f32 %v1859_v41, %v1858_v59  ;;  %v4692_v41 = vld [vmem:[%s5804_s3 + $0x380] sm:$0xff] }
 0x7ea   :  { %v1861_v1 = vmul.f32 0.125, %v1860_v21 }
 0x7ec   :  { %v1862_v11 = vsub.f32 %v1851_v53, %v1861_v1  ;;  %v4685_v53 = vld [vmem:[%s5804_s3 + $0x360] sm:$0xff] }
 0x7ed   :  { %3414 = vmatmul.msk.f32.gmra.mxu1 %vm160_vm0, %v4685_v53 }
 0x7ee   :  { %v1863_v4 = vmul.f32 %v1862_v11, %v1862_v11 }
 0x7f0   :  { %v1864_v23 = vsel %vm1182_vm2, %v1863_v4, 0.0 }
 0x7f1   :  { %v1865_v35 = vrot.slane %v1864_v23, 4 }
 0x7f3   :  { %v1866_v30 = vadd.f32 %v1865_v35, %v1864_v23 }
 0x7f5   :  { %v1867_v22 = vrot.slane %v1866_v30, 2  ;;  %3415 = vmatmul.msk.f32.gmra.mxu1 %vm160_vm0, %v4692_v41 }
 0x7f7   :  { %v1705_v29 = vpop.f32.mrf.mxu3  ;;  %v1868_v9 = vadd.f32 %v1867_v22, %v1866_v30 }
 0x7f8   :  { %v1708_v5 = vsel %vm1182_vm2, %v1705_v29, 0.0 }
 0x7f9   :  { %v1709_v45 = vrot.slane %v1708_v5, 4  ;;  %v1869_v37 = vrot.slane %v1868_v9, 1 }
 0x7fb   :  { %v1710_v62 = vadd.f32 %v1709_v45, %v1708_v5  ;;  %v1870_v2 = vadd.f32 %v1869_v37, %v1868_v9  ;;  %v4700_v5 = vld [vmem:[%s5804_s3 + $0x3a0] sm:$0xff]  ;;  %v1883_v37 = vstv %s3409_s17 }
 0x7fd   :  { %v1711_v32 = vrot.slane %v1710_v62, 2  ;;  %v1871_v49 = vmul.f32 0.125, %v1870_v2  ;;  %3416 = vmatmul.msk.f32.gmra.mxu1 %vm160_vm0, %v4700_v5 }
 0x7ff   :  { %v1712_v15 = vadd.f32 %v1711_v32, %v1710_v62  ;;  %v1872_v51 = vadd.f32 1e-05, %v1871_v49 }
 0x801   :  { %v1713_v26 = vrot.slane %v1712_v15, 1  ;;  %3591 = vrsqrt.f32 %v1872_v51  ;;  %vm1879_vm9 = vweird.f32 %v1872_v51 }
 0x803   :  { %v1714_v25 = vadd.f32 %v1713_v26, %v1712_v15 }
 0x805   :  { %v1715_v10 = vmul.f32 0.125, %v1714_v25 }
 0x807   :  { %v1716_v39 = vsub.f32 %v1705_v29, %v1715_v10  ;;  %v3592_v59 = vpop.eup %3591  ;;  %v4707_v10 = vld [vmem:[%s5804_s3 + $0x3c0] sm:$0xff] }
 0x808   :  { %v1874_v21 = vmul.f32 %v3592_v59, %v1872_v51  ;;  %vm1880_vm8 = vweird.f32 %v3592_v59  ;;  %3417 = vmatmul.msk.f32.gmra.mxu1 %vm160_vm0, %v4707_v10 }
 0x809   :  { %v1717_v1 = vmul.f32 %v1716_v39, %v1716_v39  ;;  %vm1881_vm10 = vmor %vm1879_vm9, %vm1880_vm8 }
 0x80a   :  { %v1875_v4 = vmul.f32 %v3592_v59, %v1874_v21 }
 0x80b   :  { %v1718_v23 = vsel %vm1182_vm2, %v1717_v1, 0.0 }
 0x80c   :  { %v1719_v35 = vrot.slane %v1718_v23, 4  ;;  %v1876_v30 = vmul.f32 0.5, %v1875_v4 }
 0x80e   :  { %v1720_v22 = vadd.f32 %v1719_v35, %v1718_v23  ;;  %v1877_v9 = vsub.f32 1.5, %v1876_v30  ;;  %v4725_v23 = vld [vmem:[%s5804_s3 + $0x400] sm:$0xff] }
 0x810   :  { %v1721_v29 = vrot.slane %v1720_v22, 2  ;;  %v1878_v45 = vmul.f32 %v3592_v59, %v1877_v9 }
 0x812   :  { %v1722_v62 = vadd.f32 %v1721_v29, %v1720_v22  ;;  %v1882_v2 = vsel %vm1881_vm10, %v3592_v59, %v1878_v45  ;;  %v1737_v22 = vstv %s3399_s23 }
 0x813   :  { %v1884_v32 = vmul.f32 %v1883_v37, %v1882_v2  ;;  %v4734_v37 = vld [vmem:[%s5804_s3 + $0x420] sm:$0xff] }
 0x814   :  { %v1723_v49 = vrot.slane %v1722_v62, 1  ;;  %v4751_v2 = vld [vmem:[%s5804_s3 + $0x440] sm:$0xff] }
 0x815   :  { %v1885_v15 = vmul.f32 %v1884_v32, %v1862_v11  ;;  %v4716_v11 = vld [vmem:[%s5804_s3 + $0x3e0] sm:$0xff] }
 0x816   :  { %v1724_v26 = vadd.f32 %v1723_v49, %v1722_v62  ;;  %3418 = vmatmul.msk.f32.gmra.mxu1 %vm160_vm0, %v4716_v11  ;;  %v2139_v62 = vld [vmem:[%s5803_s2 + $0xf8] sm:$0xff]  ;;  %v4773_v32 = vld [vmem:[%s5804_s3 + $0x480] sm:$0xff]  ;;  %v2223_v49 = vld [vmem:[%s5803_s2 + $0x130] sm:$0xff] }
 0x817   :  { %2086 = vmatpush.msrb.mxu2 %v1885_v15  ;;  %v2222_v15 = vld [vmem:[%s5803_s2 + $0x128] sm:$0xff] }
 0x818   :  { %v1725_v25 = vmul.f32 0.125, %v1724_v26  ;;  %3429 = vmatmul.msk.f32.vlgmr.msrb.gmra.mxu2 %vm160_vm0, %v4678_v17  ;;  %v4809_v26 = vld [vmem:[%s5804_s3 + $0x4c0] sm:$0xff] }
 0x81a   :  { %v1726_v51 = vadd.f32 1e-05, %v1725_v25  ;;  %v2522_v25 = vld [vmem:[%s5803_s2 + $0x100] sm:$0xff] }
 0x81b   :  { %2586 = vmatpush.msra.mxu2 %v2522_v25 }
 0x81c   :  { %3593 = vrsqrt.f32 %v1726_v51  ;;  %vm1733_vm12 = vweird.f32 %v1726_v51 }
 0x81e   :  { %3419 = vmatmul.msk.f32.gmra.mxu1 %vm160_vm0, %v4725_v23 }
 0x820   :  { %3430 = vmatmul.msk.f32.gmra.mxu2 %vm160_vm0, %v4685_v53 }
 0x822   :  { %v3594_v59 = vpop.eup %3593 }
 0x823   :  { %v1728_v21 = vmul.f32 %v3594_v59, %v1726_v51  ;;  %vm1734_vm11 = vweird.f32 %v3594_v59 }
 0x824   :  { %vm1735_vm13 = vmor %vm1733_vm12, %vm1734_vm11 }
 0x825   :  { %v1729_v1 = vmul.f32 %v3594_v59, %v1728_v21 }
 0x826   :  { %3420 = vmatmul.msk.f32.gmra.mxu1 %vm160_vm0, %v4734_v37 }
 0x827   :  { %v1730_v4 = vmul.f32 0.5, %v1729_v1  ;;  %v1626_v1 = vsel %vm1182_vm2, %v4510_v43, 0.0 }
 0x828   :  { %3431 = vmatmul.msk.f32.gmra.mxu2 %vm160_vm0, %v4692_v41 }
 0x829   :  { %v1731_v35 = vsub.f32 1.5, %v1730_v4  ;;  %v1629_v4 = vsel %vm1182_vm2, %v4516_v31, 0.0 }
 0x82b   :  { %v1732_v30 = vmul.f32 %v3594_v59, %v1731_v35 }
 0x82d   :  { %v1736_v9 = vsel %vm1735_vm13, %v3594_v59, %v1732_v30  ;;  %v2491_v59 = vmax.f32 %v4298_v55, 0.0  ;;  %v2492_v30 = vmax.f32 %v4306_v61, 0.0 }
 0x82e   :  { %v1738_v29 = vmul.f32 %v1737_v22, %v1736_v9  ;;  %3421 = vmatmul.msk.f32.gmra.mxu1 %vm160_vm0, %v4751_v2 }
 0x82f   :  { %v2507_v21 = vmin.f32 %v2491_v59, 6.0  ;;  %v2508_v9 = vmin.f32 %v2492_v30, 6.0  ;;  %v2497_v30 = vmax.f32 %v4336_v40, 0.0  ;;  %v2498_v40 = vmax.f32 %v4342_v44, 0.0 }
 0x830   :  { %v1739_v45 = vmul.f32 %v1738_v29, %v1716_v39  ;;  %3432 = vmatmul.msk.f32.gmra.mxu2 %vm160_vm0, %v4700_v5  ;;  %v2138_v39 = vld [vmem:[%s5803_s2 + $0xf0] sm:$0xff] }
 0x832   :  { %1755 = vmatpush.msrb.mxu3 %v1739_v45  ;;  %v2493_v45 = vmax.f32 %v4312_v38, 0.0 }
 0x833   :  { %3405 = vmatmul.msk.f32.vlgmr.msrb.gmra.mxu3 %vm160_vm0, %v4587_v34  ;;  %v4762_v34 = vld [vmem:[%s5804_s3 + $0x460] sm:$0xff] }
 0x834   :  { %2154 = vmatpush.msra.mxu3 %v2139_v62 }
 0x836   :  { %2155 = vmatpush.msra.mxu3 %v2138_v39  ;;  %3422 = vmatmul.msk.f32.gmra.mxu1 %vm160_vm0, %v4762_v34  ;;  %v2509_v39 = vmin.f32 %v2493_v45, 6.0 }
 0x838   :  { %3433 = vmatmul.msk.f32.gmra.mxu2 %vm160_vm0, %v4707_v10 }
 0x83b   :  { %3406 = vmatmul.msk.f32.gmra.mxu3 %vm160_vm0, %v4611_v48  ;;  %v2225_v48 = vld [vmem:[%s5803_s2 + $0x140] sm:$0xff] }
 0x83c   :  { %2238 = vmatpush.msrb.mxu3 %v2225_v48 }
 0x83e   :  { %3423 = vmatmul.msk.f32.gmra.mxu1 %vm160_vm0, %v4773_v32 }
 0x840   :  { %3434 = vmatmul.msk.f32.gmra.mxu2 %vm160_vm0, %v4716_v11 }
 0x843   :  { %3407 = vmatmul.msk.f32.gmra.mxu3 %vm160_vm0, %v4621_v3  ;;  %v2224_v3 = vld [vmem:[%s5803_s2 + $0x138] sm:$0xff] }
 0x844   :  { %2239 = vmatpush.msrb.mxu3 %v2224_v3  ;;  %v2494_v3 = vmax.f32 %v4318_v8, 0.0 }
 0x846   :  { %2240 = vmatpush.msrb.mxu3 %v2223_v49  ;;  %v2510_v25 = vmin.f32 %v2494_v3, 6.0 }
 0x848   :  { %3435 = vmatmul.msk.f32.gmra.mxu2 %vm160_vm0, %v4725_v23  ;;  %2241 = vmatpush.msrb.mxu3 %v2222_v15 }
 0x84b   :  { %3408 = vmatmul.msk.f32.gmra.mxu3 %vm160_vm0, %v4642_v56  ;;  %v4795_v56 = vld [vmem:[%s5804_s3 + $0x4a0] sm:$0xff] }
 0x84c   :  { %3424 = vmatmul.msk.f32.gmra.mxu1 %vm160_vm0, %v4795_v56 }
 0x850   :  { %3436 = vmatmul.msk.f32.gmra.mxu2 %vm160_vm0, %v4734_v37 }
 0x853   :  { %3447 = vmatmul.msk.f32.vlgmr.msra.gmra.mxu3 %vm1132_vm1, %v4413_v27  ;;  %v4820_v27 = vld [vmem:[%s5804_s3 + $0x4e0] sm:$0xff] }
 0x854   :  { %3425 = vmatmul.msk.f32.gmra.mxu1 %vm160_vm0, %v4809_v26 }
 0x858   :  { %3437 = vmatmul.msk.f32.gmra.mxu2 %vm160_vm0, %v4751_v2 }
 0x85b   :  { %3448 = vmatmul.msk.f32.gmra.mxu3 %vm1132_vm1, %v4418_v57  ;;  %v4831_v57 = vld [vmem:[%s5804_s3 + $0x500] sm:$0xff] }
 0x85c   :  { %3426 = vmatmul.msk.f32.gmra.mxu1 %vm160_vm0, %v4820_v27 }
 0x860   :  { %3438 = vmatmul.msk.f32.gmra.mxu2 %vm160_vm0, %v4762_v34 }
 0x863   :  { %3449 = vmatmul.msk.f32.gmra.mxu3 %vm1132_vm1, %v4423_v12  ;;  %v4842_v12 = vld [vmem:[%s5804_s3 + $0x520] sm:$0xff] }
 0x864   :  { %3427 = vmatmul.msk.f32.gmra.mxu1 %vm160_vm0, %v4831_v57 }
 0x868   :  { %3439 = vmatmul.msk.f32.gmra.mxu2 %vm160_vm0, %v4773_v32 }
 0x86b   :  { %3450 = vmatmul.msk.f32.gmra.mxu3 %vm1132_vm1, %v4428_v18  ;;  %v2490_v18 = vmax.f32 %v4291_v13, 0.0  ;;  %v1631_v13 = vsel %vm1182_vm2, %v4521_v52, 0.0 }
 0x86c   :  { %3428 = vmatmul.msk.f32.gmra.mxu1 %vm160_vm0, %v4842_v12 }
 0x86d   :  { %v2506_v51 = vmin.f32 %v2490_v18, 6.0  ;;  %v2495_v18 = vmax.f32 %v4324_v19, 0.0 }
 0x86f   :  { %v2511_v38 = vmin.f32 %v2495_v18, 6.0  ;;  %v2499_v18 = vmax.f32 %v4348_v47, 0.0  ;;  %v2501_v47 = vmax.f32 %v4360_v7, 0.0 }
 0x870   :  { %3440 = vmatmul.msk.f32.gmra.mxu2 %vm160_vm0, %v4795_v56 }
 0x871   :  { %v2515_v44 = vmin.f32 %v2499_v18, 6.0 }
 0x873   :  { %3451 = vmatmul.msk.f32.vlgmr.msrb.gmra.mxu3 %vm1182_vm2, %v4652_v6  ;;  %v1627_v6 = vsel %vm1182_vm2, %v4512_v28, 0.0 }
 0x874   :  { %v1628_v35 = vadd.f32 %v1627_v6, %v1626_v1 }
 0x876   :  { %v1630_v22 = vadd.f32 %v1629_v4, %v1628_v35 }
 0x878   :  { %3441 = vmatmul.msk.f32.gmra.mxu2 %vm160_vm0, %v4809_v26  ;;  %v1632_v55 = vadd.f32 %v1631_v13, %v1630_v22 }
 0x87a   :  { %v1633_v29 = vrot.slane %v1632_v55, 4 }
 0x87c   :  { %v1634_v62 = vadd.f32 %v1633_v29, %v1632_v55 }
 0x87e   :  { %v1635_v48 = vrot.slane %v1634_v62, 2 }
 0x880   :  { %3442 = vmatmul.msk.f32.gmra.mxu2 %vm160_vm0, %v4820_v27  ;;  %v1636_v49 = vadd.f32 %v1635_v48, %v1634_v62 }
 0x882   :  { %v1637_v61 = vrot.slane %v1636_v49, 1 }
 0x888   :  { %3443 = vmatmul.msk.f32.gmra.mxu2 %vm160_vm0, %v4831_v57 }
 0x890   :  { %3444 = vmatmul.msk.f32.gmra.mxu2 %vm160_vm0, %v4842_v12 }
 0x898   :  { %3486 = vmatmul.msk.f32.vlgmr.msra.gmra.mxu2 %vm160_vm0, %v2506_v51  ;;  %v1638_v51 = vadd.f32 %v1637_v61, %v1636_v49 }
 0x89a   :  { %v1639_v6 = vmul.f32 0.03125, %v1638_v51 }
 0x89c   :  { %v4885_v8 = vsub.f32 %v4512_v28, %v1639_v6  ;;  %v4888_v1 = vsub.f32 %v4510_v43, %v1639_v6  ;;  %v4901_v28 = vpop.f32.mrf.mxu2  ;;  %v4908_v29 = vsub.f32 %v4521_v52, %v1639_v6 }
 0x89e   :  { %v1644_v19 = vmul.f32 %v4888_v1, %v4888_v1  ;;  %v1645_v13 = vmul.f32 %v4885_v8, %v4885_v8 }
 0x8a0   :  { %3487 = vmatmul.msk.f32.gmra.mxu2 %vm160_vm0, %v2507_v21  ;;  %v2496_v21 = vmax.f32 %v4330_v33, 0.0  ;;  %v4899_v33 = vsub.f32 %v4516_v31, %v1639_v6  ;;  %v1648_v43 = vsel %vm1182_vm2, %v1644_v19, 0.0  ;;  %v1649_v22 = vsel %vm1182_vm2, %v1645_v13, 0.0 }
 0x8a1   :  { %v1650_v62 = vadd.f32 %v1649_v22, %v1648_v43  ;;  %v1647_v31 = vmul.f32 %v4908_v29, %v4908_v29 }
 0x8a2   :  { %v2512_v35 = vmin.f32 %v2496_v21, 6.0  ;;  %v1646_v45 = vmul.f32 %v4899_v33, %v4899_v33 }
 0x8a3   :  { %v1653_v52 = vsel %vm1182_vm2, %v1647_v31, 0.0 }
 0x8a4   :  { %v4917_v3 = vpop.f32.mrf.mxu2 }
 0x8a5   :  { %5806 = vst [vmem:[#allocation8_spill] sm:$0xff] %v4917_v3 }
 0x8a8   :  { %3488 = vmatmul.msk.f32.gmra.mxu2 %vm160_vm0, %v2508_v9  ;;  %v2513_v9 = vmin.f32 %v2497_v30, 6.0 }
 0x8ac   :  { %v4922_v6 = vpop.f32.mrf.mxu2 }
 0x8ad   :  { %5807 = vst [vmem:[#allocation9_spill] sm:$0xff] %v4922_v6 }
 0x8b0   :  { %3489 = vmatmul.msk.f32.gmra.mxu2 %vm160_vm0, %v2509_v39  ;;  %v1651_v39 = vsel %vm1182_vm2, %v1646_v45, 0.0 }
 0x8b1   :  { %v1652_v48 = vadd.f32 %v1651_v39, %v1650_v62 }
 0x8b3   :  { %v1654_v61 = vadd.f32 %v1653_v52, %v1652_v48  ;;  %v2517_v48 = vmin.f32 %v2501_v47, 6.0 }
 0x8b4   :  { %v4926_v22 = vpop.f32.mrf.mxu2 }
 0x8b5   :  { %v1655_v51 = vrot.slane %v1654_v61, 4  ;;  %5808 = vst [vmem:[#allocation10_spill] sm:$0xff] %v4926_v22 }
 0x8b6   :  { %v4876_v15 = vpop.f32.mrf.mxu3 }
 0x8b7   :  { %v1656_v21 = vadd.f32 %v1655_v51, %v1654_v61  ;;  %v2502_v51 = vmax.f32 %v4366_v58, 0.0 }
 0x8b8   :  { %3490 = vmatmul.msk.f32.gmra.mxu2 %vm160_vm0, %v2510_v25  ;;  %v2514_v25 = vmin.f32 %v2498_v40, 6.0 }
 0x8b9   :  { %v1657_v19 = vrot.slane %v1656_v21, 2 }
 0x8bb   :  { %v1658_v43 = vadd.f32 %v1657_v19, %v1656_v21 }
 0x8bd   :  { %v1659_v40 = vrot.slane %v1658_v43, 1 }
 0x8be   :  { %v4880_v59 = vpop.f32.mrf.mxu3 }
 0x8bf   :  { %v1660_v52 = vadd.f32 %v1659_v40, %v1658_v43 }
 0x8c0   :  { %3491 = vmatmul.msk.f32.gmra.mxu2 %vm160_vm0, %v2511_v38 }
 0x8c1   :  { %v1661_v7 = vmul.f32 0.03125, %v1660_v52 }
 0x8c6   :  { %v4890_v4 = vpop.f32.mrf.mxu3 }
 0x8c8   :  { %3492 = vmatmul.msk.f32.gmra.mxu2 %vm160_vm0, %v2512_v35  ;;  %v2500_v35 = vmax.f32 %v4354_v50, 0.0 }
 0x8ca   :  { %v2516_v30 = vmin.f32 %v2500_v35, 6.0 }
 0x8ce   :  { %v4905_v55 = vpop.f32.mrf.mxu3 }
 0x8d0   :  { %3493 = vmatmul.msk.f32.gmra.mxu2 %vm160_vm0, %v2513_v9 }
 0x8d6   :  { %v2157_v49 = vpop.f32.mrf.mxu3 }
 0x8d7   :  { %v2169_v45 = vsel %vm1182_vm2, %v2157_v49, 0.0 }
 0x8d8   :  { %3494 = vmatmul.msk.f32.gmra.mxu2 %vm160_vm0, %v2514_v25 }
 0x8de   :  { %v2160_v38 = vpop.f32.mrf.mxu3 }
 0x8df   :  { %v2170_v9 = vsel %vm1182_vm2, %v2160_v38, 0.0 }
 0x8e0   :  { %3495 = vmatmul.msk.f32.gmra.mxu2 %vm160_vm0, %v2515_v44  ;;  %v2171_v31 = vadd.f32 %v2170_v9, %v2169_v45  ;;  %v4936_v44 = vpop.f32.mrf.mxu2  ;;  %v4939_v45 = vadd.f32 1e-05, %v1661_v7 }
 0x8e1   :  { %5809 = vst [vmem:[#allocation11_spill] sm:$0xff] %v4936_v44 }
 0x8e2   :  { %3595 = vrsqrt.f32 %v4939_v45  ;;  %vm1669_vm14 = vweird.f32 %v4939_v45 }
 0x8e6   :  { %v2163_v13 = vpop.f32.mrf.mxu3 }
 0x8e7   :  { %v2172_v62 = vsel %vm1182_vm2, %v2163_v13, 0.0 }
 0x8e8   :  { %3496 = vmatmul.msk.f32.gmra.mxu2 %vm160_vm0, %v2516_v30  ;;  %v2173_v39 = vadd.f32 %v2172_v62, %v2171_v31  ;;  %v2518_v30 = vmin.f32 %v2502_v51, 6.0  ;;  %v2503_v31 = vmax.f32 %v4372_v20, 0.0  ;;  %v3596_v20 = vpop.eup %3595 }
 0x8e9   :  { %vm1670_vm1 = vweird.f32 %v3596_v20 }
 0x8ea   :  { %vm1671_vm15 = vmor %vm1669_vm14, %vm1670_vm1 }
 0x8ee   :  { %v2166_v50 = vpop.f32.mrf.mxu3 }
 0x8ef   :  { %v2174_v25 = vsel %vm1182_vm2, %v2166_v50, 0.0 }
 0x8f0   :  { %v2175_v61 = vadd.f32 %v2174_v25, %v2173_v39  ;;  %3497 = vmatmul.msk.f32.gmra.mxu2 %vm160_vm0, %v2517_v48  ;;  %v4944_v48 = vpop.f32.mrf.mxu2 }
 0x8f1   :  { %5810 = vst [vmem:[#allocation12_spill] sm:$0xff] %v4944_v48 }
 0x8f2   :  { %v2176_v18 = vrot.slane %v2175_v61, 4 }
 0x8f4   :  { %v2177_v21 = vadd.f32 %v2176_v18, %v2175_v61  ;;  %v2519_v61 = vmin.f32 %v2503_v31, 6.0 }
 0x8f6   :  { %v2178_v35 = vrot.slane %v2177_v21, 2  ;;  %v2243_v19 = vpop.f32.mrf.mxu3 }
 0x8f7   :  { %v2246_v9 = vsel %vm1182_vm2, %v2243_v19, 0.0 }
 0x8f8   :  { %v2179_v47 = vadd.f32 %v2178_v35, %v2177_v21  ;;  %v2247_v62 = vrot.slane %v2246_v9, 4  ;;  %3498 = vmatmul.msk.f32.gmra.mxu2 %vm160_vm0, %v2518_v30 }
 0x8fa   :  { %v2180_v43 = vrot.slane %v2179_v47, 1  ;;  %v2248_v40 = vadd.f32 %v2247_v62, %v2246_v9 }
 0x8fc   :  { %v2181_v58 = vadd.f32 %v2180_v43, %v2179_v47  ;;  %v2249_v39 = vrot.slane %v2248_v40, 2  ;;  %v1664_v43 = vmul.f32 %v3596_v20, %v4939_v45 }
 0x8fe   :  { %v2182_v25 = vmul.f32 0.03125, %v2181_v58  ;;  %v2250_v52 = vadd.f32 %v2249_v39, %v2248_v40 }
 0x900   :  { %v4946_v18 = vsub.f32 %v2157_v49, %v2182_v25  ;;  %v4948_v51 = vsub.f32 %v2160_v38, %v2182_v25  ;;  %v4950_v7 = vsub.f32 %v2163_v13, %v2182_v25  ;;  %v4952_v21 = vsub.f32 %v2166_v50, %v2182_v25  ;;  %3499 = vmatmul.msk.f32.gmra.mxu2 %vm160_vm0, %v2519_v61  ;;  %v4968_v25 = vpop.f32.mrf.mxu2 }
 0x901   :  { %v2251_v35 = vrot.slane %v2250_v52, 1  ;;  %v2504_v38 = vmax.f32 %v4378_v63, 0.0  ;;  %5811 = vst [vmem:[#allocation13_spill] sm:$0xff] %v4968_v25 }
 0x902   :  { %v2187_v30 = vmul.f32 %v4946_v18, %v4946_v18  ;;  %v2188_v9 = vmul.f32 %v4948_v51, %v4948_v51  ;;  %v2189_v49 = vmul.f32 %v4950_v7, %v4950_v7  ;;  %v2190_v13 = vmul.f32 %v4952_v21, %v4952_v21 }
 0x903   :  { %v2252_v47 = vadd.f32 %v2251_v35, %v2250_v52  ;;  %v2520_v39 = vmin.f32 %v2504_v38, 6.0  ;;  %v1665_v52 = vmul.f32 %v3596_v20, %v1664_v43 }
 0x904   :  { %v2191_v50 = vsel %vm1182_vm2, %v2187_v30, 0.0  ;;  %v2192_v62 = vsel %vm1182_vm2, %v2188_v9, 0.0  ;;  %v2194_v58 = vsel %vm1182_vm2, %v2189_v49, 0.0  ;;  %v2196_v63 = vsel %vm1182_vm2, %v2190_v13, 0.0 }
 0x905   :  { %v2193_v40 = vadd.f32 %v2192_v62, %v2191_v50  ;;  %v2253_v31 = vmul.f32 0.125, %v2252_v47  ;;  %v2505_v9 = vmax.f32 %v4384_v0, 0.0  ;;  %v1666_v50 = vmul.f32 0.5, %v1665_v52  ;;  %v4981_v52 = vpop.f32.mrf.mxu1 }
 0x907   :  { %v2195_v61 = vadd.f32 %v2194_v58, %v2193_v40  ;;  %v4970_v48 = vsub.f32 %v2243_v19, %v2253_v31  ;;  %v2521_v19 = vmin.f32 %v2505_v9, 6.0  ;;  %v1667_v13 = vsub.f32 1.5, %v1666_v50 }
 0x908   :  { %3500 = vmatmul.msk.f32.gmra.mxu2 %vm160_vm0, %v2520_v39  ;;  %v4978_v43 = vpop.f32.mrf.mxu2 }
 0x909   :  { %v2197_v35 = vadd.f32 %v2196_v63, %v2195_v61  ;;  %v2255_v30 = vmul.f32 %v4970_v48, %v4970_v48  ;;  %5812 = vst [vmem:[#allocation14_spill] sm:$0xff] %v4978_v43  ;;  %v1668_v25 = vmul.f32 %v3596_v20, %v1667_v13 }
 0x90b   :  { %v2198_v47 = vrot.slane %v2197_v35, 4  ;;  %v2256_v49 = vsel %vm1182_vm2, %v2255_v30, 0.0 }
 0x90c   :  { %v2257_v38 = vrot.slane %v2256_v49, 4 }
 0x90d   :  { %v2199_v62 = vadd.f32 %v2198_v47, %v2197_v35  ;;  %v1672_v47 = vsel %vm1671_vm15, %v3596_v20, %v1668_v25 }
 0x90e   :  { %v2258_v40 = vadd.f32 %v2257_v38, %v2256_v49  ;;  %v1673_v49 = vstv %s3398_s29 }
 0x90f   :  { %v2200_v31 = vrot.slane %v2199_v62, 2 }
 0x910   :  { %v2259_v58 = vrot.slane %v2258_v40, 2  ;;  %3501 = vmatmul.msk.f32.gmra.mxu2 %vm160_vm0, %v2521_v19 }
 0x911   :  { %v2201_v61 = vadd.f32 %v2200_v31, %v2199_v62  ;;  %v1674_v62 = vmul.f32 %v1673_v49, %v1672_v47 }
 0x912   :  { %v2260_v39 = vadd.f32 %v2259_v58, %v2258_v40  ;;  %v4984_v40 = vpop.f32.mrf.mxu1 }
 0x913   :  { %v2202_v63 = vrot.slane %v2201_v61, 1  ;;  %5813 = vst [vmem:[#allocation15_spill] sm:$0xff] %v4984_v40  ;;  %v1676_v19 = vmul.f32 %v1674_v62, %v4885_v8  ;;  %v1677_v20 = vmul.f32 %v1674_v62, %v4899_v33  ;;  %v1568_v33 = vadd.f32 %v4660_v42, %v4669_v24 }
 0x914   :  { %v2261_v0 = vrot.slane %v2260_v39, 1 }
 0x915   :  { %v2203_v30 = vadd.f32 %v2202_v63, %v2201_v61  ;;  %v1770_v13 = vadd.f32 %v4880_v59, %v1676_v19  ;;  %v1565_v61 = vadd.f32 %v4658_v36, %v4666_v60  ;;  %v1771_v63 = vadd.f32 %v4890_v4, %v1677_v20 }
 0x916   :  { %v2262_v44 = vadd.f32 %v2261_v0, %v2260_v39  ;;  %v1678_v59 = vmul.f32 %v1674_v62, %v4908_v29 }
 0x917   :  { %v2204_v35 = vmul.f32 0.03125, %v2203_v30  ;;  %v4999_v30 = vadd.f32 %v1770_v13, %v1565_v61 }
 0x918   :  { %v2263_v9 = vmul.f32 0.125, %v2262_v44  ;;  %v1675_v44 = vmul.f32 %v1674_v62, %v4888_v1  ;;  %v1562_v1 = vadd.f32 %v4656_v16, %v4662_v54  ;;  %v1772_v36 = vadd.f32 %v4905_v55, %v1678_v59 }
 0x919   :  { %v2205_v38 = vadd.f32 1e-05, %v2204_v35  ;;  %v1778_v16 = vsel %vm1182_vm2, %v4999_v30, 0.0  ;;  %v2216_v54 = vstv %s4988_s30  ;;  %s3284_s30 = sshll.u32 %s5805_s4, 4  ;;  %s3285_s30 = int_to_ptr.hbm [resolvable:$true] %s3284_s30 }
 0x91a   :  { %v2264_v50 = vadd.f32 1e-05, %v2263_v9  ;;  %v1769_v8 = vadd.f32 %v4876_v15, %v1675_v44  ;;  %v1571_v15 = vadd.f32 %v4664_v46, %v4671_v14  ;;  %v5008_v9 = vadd.f32 %v1771_v63, %v1568_v33  ;;  %v5010_v49 = vpop.f32.mrf.mxu1  ;;  %v5063_v33 = vld [vmem:[%s5804_s3 + $0x5a0] sm:$0xff] }
 0x91b   :  { %3597 = vrsqrt.f32 %v2205_v38  ;;  %5814 = vst [vmem:[#allocation16_spill] sm:$0xff] %v5010_v49  ;;  %vm2212_vm5 = vweird.f32 %v2205_v38  ;;  %v2275_v46 = vstv %s4992_s5  ;;  %s3651_s5 = smov 128  }
 0x91c   :  { %3599 = vrsqrt.f32 %v2264_v50  ;;  %v1773_v29 = vadd.f32 %v1769_v8, %v1562_v1  ;;  %v1776_v24 = vadd.f32 %v1772_v36, %v1571_v15  ;;  %vm2271_vm7 = vweird.f32 %v2264_v50 }
 0x91d   :  { %v1780_v19 = vsel %vm1182_vm2, %v5008_v9, 0.0 }
 0x91e   :  { %v1777_v62 = vsel %vm1182_vm2, %v1773_v29, 0.0 }
 0x91f   :  { %v1779_v44 = vadd.f32 %v1778_v16, %v1777_v62 }
 0x921   :  { %v3598_v31 = vpop.eup %3597  ;;  %v1781_v61 = vadd.f32 %v1780_v19, %v1779_v44  ;;  %v5116_v19 = vld [vmem:[%s5804_s3 + $0x600] sm:$0xff] }
 0x922   :  { %v3600_v58 = vpop.eup %3599  ;;  %v2207_v45 = vmul.f32 %v3598_v31, %v2205_v38  ;;  %vm2213_vm3 = vweird.f32 %v3598_v31  ;;  %v5026_v8 = vpop.f32.mrf.mxu1 }
 0x923   :  { %v2266_v25 = vmul.f32 %v3600_v58, %v2264_v50  ;;  %vm2272_vm4 = vweird.f32 %v3600_v58  ;;  %vm2214_vm6 = vmor %vm2212_vm5, %vm2213_vm3  ;;  %5815 = vst [vmem:[#allocation17_spill] sm:$0xff] %v5026_v8 }
 0x924   :  { %v2208_v39 = vmul.f32 %v3598_v31, %v2207_v45  ;;  %vm2273_vm8 = vmor %vm2271_vm7, %vm2272_vm4 }
 0x925   :  { %v2267_v0 = vmul.f32 %v3600_v58, %v2266_v25  ;;  %v1782_v25 = vsel %vm1182_vm2, %v1776_v24, 0.0 }
 0x926   :  { %v2209_v35 = vmul.f32 0.5, %v2208_v39 }
 0x927   :  { %v2268_v60 = vmul.f32 0.5, %v2267_v0  ;;  %v5052_v0 = vld [vmem:[%s5804_s3 + $0x580] sm:$0xff] }
 0x928   :  { %v2210_v4 = vsub.f32 1.5, %v2209_v35 }
 0x929   :  { %v2269_v47 = vsub.f32 1.5, %v2268_v60 }
 0x92a   :  { %v2211_v42 = vmul.f32 %v3598_v31, %v2210_v4 }
 0x92b   :  { %v2270_v55 = vmul.f32 %v3600_v58, %v2269_v47 }
 0x92c   :  { %v2215_v14 = vsel %vm2214_vm6, %v3598_v31, %v2211_v42  ;;  %v1783_v31 = vadd.f32 %v1782_v25, %v1781_v61 }
 0x92d   :  { %v2217_v13 = vmul.f32 %v2216_v54, %v2215_v14  ;;  %v2274_v45 = vsel %vm2273_vm8, %v3600_v58, %v2270_v55 }
 0x92e   :  { %v2276_v20 = vmul.f32 %v2275_v46, %v2274_v45 }
 0x92f   :  { %v2221_v38 = vmul.f32 %v2217_v13, %v4952_v21  ;;  %v2220_v50 = vmul.f32 %v2217_v13, %v4950_v7  ;;  %v2219_v58 = vmul.f32 %v2217_v13, %v4948_v51  ;;  %v2218_v63 = vmul.f32 %v2217_v13, %v4946_v18  ;;  %v5043_v18 = vpop.f32.mrf.mxu1 }
 0x930   :  { %v2277_v39 = vmul.f32 %v2276_v20, %v4970_v48  ;;  %v5032_v48 = vld [vmem:[%s5804_s3 + $0x540] sm:$0xff]  ;;  %v1784_v21 = vrot.slane %v1783_v31, 4  ;;  %5816 = vst [vmem:[#allocation18_spill] sm:$0xff] %v5043_v18 }
 0x931   :  { %2419 = vmatpush.msra.mxu1 %v2221_v38 }
 0x932   :  { %2309 = vmatpush.msra.mxu3 %v2277_v39  ;;  %v1785_v7 = vadd.f32 %v1784_v21, %v1783_v31  ;;  %v5146_v31 = vpop.f32.mrf.mxu2 }
 0x933   :  { %3452 = vmatmul.msk.f32.vlgmr.msra.gmra.mxu3 %vm160_vm0, %v4678_v17  ;;  %2420 = vmatpush.msra.mxu1 %v2220_v50  ;;  %v5041_v17 = vld [vmem:[%s5804_s3 + $0x560] sm:$0xff]  ;;  %5823 = vst [vmem:[#allocation25_spill] sm:$0xff] %v5146_v31 }
 0x934   :  { %v1786_v51 = vrot.slane %v1785_v7, 2 }
 0x935   :  { %2421 = vmatpush.msra.mxu1 %v2219_v58 }
 0x936   :  { %v1787_v59 = vadd.f32 %v1786_v51, %v1785_v7  ;;  %v2783_v51 = vld [vmem:[%s5803_s2 + $0x158] sm:$0xff] }
 0x937   :  { %2422 = vmatpush.msra.mxu1 %v2218_v63  ;;  %v5054_v35 = vpop.f32.mrf.mxu1 }
 0x938   :  { %3468 = vmatmul.msk.f32.vlgmr.msra.gmra.mxu1 %vm1182_vm2, %v5032_v48  ;;  %5817 = vst [vmem:[#allocation19_spill] sm:$0xff] %v5054_v35 }
 0x93a   :  { %v5164_v7 = vpop.f32.mrf.mxu2 }
 0x93b   :  { %3453 = vmatmul.msk.f32.gmra.mxu3 %vm160_vm0, %v4685_v53  ;;  %v1788_v53 = vrot.slane %v1787_v59, 1  ;;  %5825 = vst [vmem:[#allocation27_spill] sm:$0xff] %v5164_v7 }
 0x93d   :  { %v1789_v1 = vadd.f32 %v1788_v53, %v1787_v59  ;;  %v5179_v59 = vld [vmem:[%s5804_s3 + $0x6a0] sm:$0xff] }
 0x93f   :  { %v5067_v36 = vpop.f32.mrf.mxu1 }
 0x940   :  { %3469 = vmatmul.msk.f32.gmra.mxu1 %vm1182_vm2, %v5041_v17  ;;  %5818 = vst [vmem:[#allocation20_spill] sm:$0xff] %v5067_v36 }
 0x943   :  { %3454 = vmatmul.msk.f32.gmra.mxu3 %vm160_vm0, %v4692_v41  ;;  %v1790_v41 = vmul.f32 0.03125, %v1789_v1 }
 0x945   :  { %v5069_v60 = vsub.f32 %v1773_v29, %v1790_v41  ;;  %v5072_v15 = vsub.f32 %v4999_v30, %v1790_v41  ;;  %v5086_v29 = vsub.f32 %v5008_v9, %v1790_v41  ;;  %v5096_v42 = vsub.f32 %v1776_v24, %v1790_v41  ;;  %v5103_v9 = vld [vmem:[%s5804_s3 + $0x5e0] sm:$0xff]  ;;  %v2781_v41 = vld [vmem:[%s5803_s2 + $0x148] sm:$0xff] }
 0x947   :  { %v1795_v4 = vmul.f32 %v5069_v60, %v5069_v60  ;;  %v1796_v47 = vmul.f32 %v5072_v15, %v5072_v15  ;;  %v5094_v16 = vpop.f32.mrf.mxu1  ;;  %v1797_v54 = vmul.f32 %v5086_v29, %v5086_v29  ;;  %v1798_v46 = vmul.f32 %v5096_v42, %v5096_v42 }
 0x948   :  { %3470 = vmatmul.msk.f32.gmra.mxu1 %vm1182_vm2, %v5052_v0  ;;  %5819 = vst [vmem:[#allocation21_spill] sm:$0xff] %v5094_v16 }
 0x949   :  { %v1799_v30 = vsel %vm1182_vm2, %v1795_v4, 0.0  ;;  %v1802_v14 = vsel %vm1182_vm2, %v1797_v54, 0.0  ;;  %v1804_v24 = vsel %vm1182_vm2, %v1798_v46, 0.0  ;;  %v5191_v4 = vpop.f32.mrf.mxu2 }
 0x94a   :  { %5826 = vst [vmem:[#allocation28_spill] sm:$0xff] %v5191_v4 }
 0x94b   :  { %3455 = vmatmul.msk.f32.gmra.mxu3 %vm160_vm0, %v4700_v5  ;;  %v5079_v5 = vld [vmem:[%s5804_s3 + $0x5c0] sm:$0xff] }
 0x94f   :  { %v5118_v13 = vpop.f32.mrf.mxu1 }
 0x950   :  { %3471 = vmatmul.msk.f32.gmra.mxu1 %vm1182_vm2, %v5063_v33  ;;  %5820 = vst [vmem:[#allocation22_spill] sm:$0xff] %v5118_v13 }
 0x951   :  { %v5204_v46 = vpop.f32.mrf.mxu2 }
 0x952   :  { %5827 = vst [vmem:[#allocation29_spill] sm:$0xff] %v5204_v46 }
 0x953   :  { %3456 = vmatmul.msk.f32.gmra.mxu3 %vm160_vm0, %v4707_v10  ;;  %v1800_v10 = vsel %vm1182_vm2, %v1796_v47, 0.0 }
 0x954   :  { %v1801_v55 = vadd.f32 %v1800_v10, %v1799_v30  ;;  %v5198_v30 = vld [vmem:[%s5804_s3 + $0x6c0] sm:$0xff] }
 0x957   :  { %v5129_v20 = vpop.f32.mrf.mxu1 }
 0x958   :  { %3472 = vmatmul.msk.f32.gmra.mxu1 %vm1182_vm2, %v5079_v5  ;;  %5821 = vst [vmem:[#allocation23_spill] sm:$0xff] %v5129_v20 }
 0x95b   :  { %3457 = vmatmul.msk.f32.gmra.mxu3 %vm160_vm0, %v4716_v11  ;;  %v1803_v11 = vadd.f32 %v1802_v14, %v1801_v55 }
 0x95d   :  { %v1805_v62 = vadd.f32 %v1804_v24, %v1803_v11 }
 0x95f   :  { %v1806_v45 = vrot.slane %v1805_v62, 4  ;;  %v5142_v39 = vpop.f32.mrf.mxu1 }
 0x960   :  { %3473 = vmatmul.msk.f32.gmra.mxu1 %vm1182_vm2, %v5103_v9  ;;  %5822 = vst [vmem:[#allocation24_spill] sm:$0xff] %v5142_v39 }
 0x961   :  { %v1807_v44 = vadd.f32 %v1806_v45, %v1805_v62  ;;  %v2124_v62 = vpop.f32.mrf.mxu2 }
 0x963   :  { %3458 = vmatmul.msk.f32.gmra.mxu3 %vm160_vm0, %v4725_v23  ;;  %v5127_v23 = vld [vmem:[%s5804_s3 + $0x620] sm:$0xff]  ;;  %v1808_v25 = vrot.slane %v1807_v44, 2 }
 0x965   :  { %v1809_v38 = vadd.f32 %v1808_v25, %v1807_v44 }
 0x967   :  { %v1810_v61 = vrot.slane %v1809_v38, 1  ;;  %v5157_v63 = vpop.f32.mrf.mxu1 }
 0x968   :  { %3474 = vmatmul.msk.f32.gmra.mxu1 %vm1182_vm2, %v5116_v19  ;;  %5824 = vst [vmem:[#allocation26_spill] sm:$0xff] %v5157_v63 }
 0x969   :  { %v1811_v50 = vadd.f32 %v1810_v61, %v1809_v38  ;;  %v5234_v38 = vld [vmem:[%s5804_s3 + $0x720] sm:$0xff]  ;;  %v2127_v61 = vpop.f32.mrf.mxu2 }
 0x96b   :  { %3459 = vmatmul.msk.f32.gmra.mxu3 %vm160_vm0, %v4734_v37  ;;  %v5138_v37 = vld [vmem:[%s5804_s3 + $0x640] sm:$0xff]  ;;  %v1812_v58 = vmul.f32 0.03125, %v1811_v50 }
 0x96d   :  { %v1813_v21 = vadd.f32 1e-05, %v1812_v58 }
 0x96f   :  { %3601 = vrsqrt.f32 %v1813_v21  ;;  %v5181_v53 = vpop.f32.mrf.mxu1  ;;  %vm1820_vm10 = vweird.f32 %v1813_v21 }
 0x970   :  { %3475 = vmatmul.msk.f32.gmra.mxu1 %vm1182_vm2, %v5127_v23 }
 0x973   :  { %3460 = vmatmul.msk.f32.gmra.mxu3 %vm160_vm0, %v4751_v2  ;;  %v5151_v2 = vld [vmem:[%s5804_s3 + $0x660] sm:$0xff] }
 0x975   :  { %v3602_v1 = vpop.eup %3601 }
 0x976   :  { %v1815_v47 = vmul.f32 %v3602_v1, %v1813_v21  ;;  %vm1821_vm9 = vweird.f32 %v3602_v1 }
 0x977   :  { %v5200_v54 = vpop.f32.mrf.mxu1  ;;  %vm1822_vm11 = vmor %vm1820_vm10, %vm1821_vm9 }
 0x978   :  { %3476 = vmatmul.msk.f32.gmra.mxu1 %vm1182_vm2, %v5138_v37  ;;  %v1816_v10 = vmul.f32 %v3602_v1, %v1815_v47 }
 0x97a   :  { %v1817_v55 = vmul.f32 0.5, %v1816_v10 }
 0x97b   :  { %3461 = vmatmul.msk.f32.gmra.mxu3 %vm160_vm0, %v4762_v34  ;;  %v5162_v34 = vld [vmem:[%s5804_s3 + $0x680] sm:$0xff] }
 0x97c   :  { %v1818_v14 = vsub.f32 1.5, %v1817_v55 }
 0x97e   :  { %v1819_v24 = vmul.f32 %v3602_v1, %v1818_v14 }
 0x97f   :  { %v5215_v11 = vpop.f32.mrf.mxu1 }
 0x980   :  { %3477 = vmatmul.msk.f32.gmra.mxu1 %vm1182_vm2, %v5151_v2  ;;  %v1823_v45 = vsel %vm1822_vm11, %v3602_v1, %v1819_v24 }
 0x981   :  { %v1824_v44 = vmul.f32 %v1823_v45, %v5069_v60  ;;  %v1825_v58 = vmul.f32 %v1823_v45, %v5072_v15  ;;  %v1827_v15 = vmul.f32 %v1823_v45, %v5096_v42 }
 0x983   :  { %3462 = vmatmul.msk.f32.gmra.mxu3 %vm160_vm0, %v4773_v32  ;;  %v2784_v32 = vld [vmem:[%s5803_s2 + $0x160] sm:$0xff]  ;;  %v2776_v24 = vmax.f32 %v1827_v15, 0.0 }
 0x984   :  { %2809 = vmatpush.msrb.mxu3 %v2784_v32  ;;  %v2130_v32 = vpop.f32.mrf.mxu2 }
 0x986   :  { %2810 = vmatpush.msrb.mxu3 %v2783_v51 }
 0x987   :  { %v5229_v25 = vpop.f32.mrf.mxu1 }
 0x988   :  { %3478 = vmatmul.msk.f32.gmra.mxu1 %vm1182_vm2, %v5162_v34 }
 0x98b   :  { %3463 = vmatmul.msk.f32.gmra.mxu3 %vm160_vm0, %v4795_v56  ;;  %v2782_v56 = vld [vmem:[%s5803_s2 + $0x150] sm:$0xff] }
 0x98c   :  { %2811 = vmatpush.msrb.mxu3 %v2782_v56  ;;  %v1826_v56 = vmul.f32 %v1823_v45, %v5086_v29  ;;  %v2133_v55 = vpop.f32.mrf.mxu2 }
 0x98e   :  { %2812 = vmatpush.msrb.mxu3 %v2781_v41  ;;  %v2775_v41 = vmax.f32 %v1826_v56, 0.0 }
 0x990   :  { %3479 = vmatmul.msk.f32.gmra.mxu1 %vm1182_vm2, %v5179_v59  ;;  %v2779_v10 = vmin.f32 %v2775_v41, 6.0 }
 0x993   :  { %3464 = vmatmul.msk.f32.gmra.mxu3 %vm160_vm0, %v4809_v26  ;;  %v5211_v26 = vld [vmem:[%s5804_s3 + $0x6e0] sm:$0xff] }
 0x994   :  { %v5257_v29 = vpop.f32.mrf.mxu2 }
 0x998   :  { %3480 = vmatmul.msk.f32.gmra.mxu1 %vm1182_vm2, %v5198_v30 }
 0x99b   :  { %3465 = vmatmul.msk.f32.gmra.mxu3 %vm160_vm0, %v4820_v27  ;;  %v5222_v27 = vld [vmem:[%s5804_s3 + $0x700] sm:$0xff]  ;;  %s3485_s3 = sld [smem:[#allocation2 + $0xb]] }
 0x99c   :  { %v5267_v45 = vpop.f32.mrf.mxu2 }
 0x9a0   :  { %3481 = vmatmul.msk.f32.gmra.mxu1 %vm1182_vm2, %v5211_v26 }
 0x9a3   :  { %3466 = vmatmul.msk.f32.gmra.mxu3 %vm160_vm0, %v4831_v57  ;;  %v2773_v57 = vmax.f32 %v1824_v44, 0.0 }
 0x9a4   :  { %v5273_v41 = vpop.f32.mrf.mxu2 }
 0x9a5   :  { %v2777_v50 = vmin.f32 %v2773_v57, 6.0  ;;  %v2780_v57 = vmin.f32 %v2776_v24, 6.0 }
 0x9a8   :  { %3482 = vmatmul.msk.f32.gmra.mxu1 %vm1182_vm2, %v5222_v27 }
 0x9ab   :  { %3467 = vmatmul.msk.f32.gmra.mxu3 %vm160_vm0, %v4842_v12  ;;  %v2774_v12 = vmax.f32 %v1825_v58, 0.0 }
 0x9ac   :  { %v5279_v24 = vpop.f32.mrf.mxu2 }
 0x9ad   :  { %v2778_v51 = vmin.f32 %v2774_v12, 6.0 }
 0x9b0   :  { %3483 = vmatmul.msk.f32.gmra.mxu1 %vm1182_vm2, %v5234_v38 }
 0x9b3   :  { %3502 = vmatmul.msk.f32.vlgmr.msrb.gmra.mxu3 %vm1182_vm2, %v2777_v50 }
 0x9b4   :  { %v5285_v63 = vpop.f32.mrf.mxu2 }
 0x9b5   :  { %v5240_v60 = vpop.f32.mrf.mxu1 }
 0x9b6   :  { %v5242_v21 = vpop.f32.mrf.mxu3 }
 0x9bb   :  { %3503 = vmatmul.msk.f32.gmra.mxu3 %vm1182_vm2, %v2778_v51 }
 0x9bc   :  { %v5295_v31 = vpop.f32.mrf.mxu2 }
 0x9bd   :  { %v5246_v1 = vpop.f32.mrf.mxu1 }
 0x9be   :  { %5828 = vst [vmem:[#allocation30_spill] sm:$0xff] %v5246_v1  ;;  %v5248_v47 = vpop.f32.mrf.mxu3 }
 0x9bf   :  { %5829 = vst [vmem:[#allocation31_spill] sm:$0xff] %v5248_v47 }
 0x9c3   :  { %3504 = vmatmul.msk.f32.gmra.mxu3 %vm1182_vm2, %v2779_v10 }
 0x9c4   :  { %v5301_v16 = vpop.f32.mrf.mxu2 }
 0x9c5   :  { %v5252_v14 = vpop.f32.mrf.mxu1 }
 0x9c6   :  { %5830 = vst [vmem:[#allocation32_spill] sm:$0xff] %v5252_v14  ;;  %v5254_v44 = vpop.f32.mrf.mxu3 }
 0x9c7   :  { %5831 = vst [vmem:[#allocation33_spill] sm:$0xff] %v5254_v44 }
 0x9cb   :  { %3505 = vmatmul.msk.f32.gmra.mxu3 %vm1182_vm2, %v2780_v57 }
 0x9cd   :  { %v5259_v50 = vpop.f32.mrf.mxu1 }
 0x9ce   :  { %5832 = vst [vmem:[#allocation34_spill] sm:$0xff] %v5259_v50  ;;  %v5261_v58 = vpop.f32.mrf.mxu3 }
 0x9cf   :  { %5833 = vst [vmem:[#allocation35_spill] sm:$0xff] %v5261_v58  ;;  %v2645_v58 = vsel %vm1182_vm2, %v5295_v31, 0.0 }
 0x9d5   :  { %v5263_v12 = vpop.f32.mrf.mxu1 }
 0x9d6   :  { %5834 = vst [vmem:[#allocation36_spill] sm:$0xff] %v5263_v12  ;;  %v5265_v42 = vpop.f32.mrf.mxu3 }
 0x9d7   :  { %5835 = vst [vmem:[#allocation37_spill] sm:$0xff] %v5265_v42 }
 0x9dd   :  { %v5269_v51 = vpop.f32.mrf.mxu1 }
 0x9de   :  { %5836 = vst [vmem:[#allocation38_spill] sm:$0xff] %v5269_v51  ;;  %v5271_v56 = vpop.f32.mrf.mxu3 }
 0x9df   :  { %5837 = vst [vmem:[#allocation39_spill] sm:$0xff] %v5271_v56 }
 0x9e5   :  { %v5275_v15 = vpop.f32.mrf.mxu1 }
 0x9e6   :  { %5838 = vst [vmem:[#allocation40_spill] sm:$0xff] %v5275_v15  ;;  %v5277_v10 = vpop.f32.mrf.mxu3  ;;  %v5307_v15 = vpop.f32.mrf.mxu2 }
 0x9e7   :  { %5839 = vst [vmem:[#allocation41_spill] sm:$0xff] %v5277_v10 }
 0x9ed   :  { %v5281_v57 = vpop.f32.mrf.mxu1 }
 0x9ee   :  { %5840 = vst [vmem:[#allocation42_spill] sm:$0xff] %v5281_v57  ;;  %v5283_v46 = vpop.f32.mrf.mxu3  ;;  %v5312_v36 = vpop.f32.mrf.mxu2 }
 0x9ef   :  { %5841 = vst [vmem:[#allocation43_spill] sm:$0xff] %v5283_v46  ;;  %v2651_v22 = vsel %vm1182_vm2, %v5312_v36, 0.0 }
 0x9f5   :  { %v5287_v4 = vpop.f32.mrf.mxu1 }
 0x9f6   :  { %5842 = vst [vmem:[#allocation44_spill] sm:$0xff] %v5287_v4  ;;  %v5289_v39 = vpop.f32.mrf.mxu3  ;;  %v2125_v4 = vadd.f32 %v2124_v62, %v5181_v53  ;;  %v5318_v42 = vpop.f32.mrf.mxu2 }
 0x9f7   :  { %5843 = vst [vmem:[#allocation45_spill] sm:$0xff] %v5289_v39 }
 0x9fd   :  { %v5291_v7 = vpop.f32.mrf.mxu1 }
 0x9fe   :  { %5844 = vst [vmem:[#allocation46_spill] sm:$0xff] %v5291_v7  ;;  %v5293_v20 = vpop.f32.mrf.mxu3 }
 0x9ff   :  { %5845 = vst [vmem:[#allocation47_spill] sm:$0xff] %v5293_v20 }
 0xa05   :  { %v5297_v13 = vpop.f32.mrf.mxu1 }
 0xa06   :  { %5846 = vst [vmem:[#allocation48_spill] sm:$0xff] %v5297_v13  ;;  %v5299_v43 = vpop.f32.mrf.mxu3  ;;  %v2128_v13 = vadd.f32 %v2127_v61, %v5200_v54  ;;  %v5323_v54 = vpop.f32.mrf.mxu2 }
 0xa07   :  { %5847 = vst [vmem:[#allocation49_spill] sm:$0xff] %v5299_v43 }
 0xa0d   :  { %v5303_v57 = vpop.f32.mrf.mxu1 }
 0xa0e   :  { %5848 = vst [vmem:[#allocation50_spill] sm:$0xff] %v5303_v57  ;;  %v5305_v46 = vpop.f32.mrf.mxu3  ;;  %v2131_v57 = vadd.f32 %v2130_v32, %v5215_v11 }
 0xa0f   :  { %5849 = vst [vmem:[#allocation51_spill] sm:$0xff] %v5305_v46 }
 0xa15   :  { %v2460_v39 = vpop.f32.mrf.mxu1 }
 0xa16   :  { %v2347_v7 = vpop.f32.mrf.mxu3 }
 0xa17   :  { %v2461_v10 = vadd.f32 %v2460_v39, %v2347_v7  ;;  %v2134_v39 = vadd.f32 %v2133_v55, %v5229_v25 }
 0xa19   :  { %v5310_v20 = vadd.f32 %v2461_v10, %v2125_v4 }
 0xa1b   :  { %5850 = vst [vmem:[#allocation52_spill] sm:$0xff] %v5310_v20  ;;  %v2643_v20 = vsel %vm1182_vm2, %v5285_v63, 0.0 }
 0xa1d   :  { %v2463_v43 = vpop.f32.mrf.mxu1 }
 0xa1e   :  { %v2350_v51 = vpop.f32.mrf.mxu3 }
 0xa1f   :  { %v2464_v56 = vadd.f32 %v2463_v43, %v2350_v51 }
 0xa21   :  { %v5315_v35 = vadd.f32 %v2464_v56, %v2128_v13  ;;  %v5327_v13 = vpop.f32.mrf.mxu2  ;;  %v2636_v56 = vsel %vm1182_vm2, %v5257_v29, 0.0 }
 0xa23   :  { %5851 = vst [vmem:[#allocation53_spill] sm:$0xff] %v5315_v35 }
 0xa25   :  { %v2466_v46 = vpop.f32.mrf.mxu1 }
 0xa26   :  { %v2353_v12 = vpop.f32.mrf.mxu3 }
 0xa27   :  { %v2467_v53 = vadd.f32 %v2466_v46, %v2353_v12  ;;  %v2637_v12 = vsel %vm1182_vm2, %v5267_v45, 0.0 }
 0xa29   :  { %v5320_v62 = vadd.f32 %v2467_v53, %v2131_v57  ;;  %v5329_v32 = vpop.f32.mrf.mxu2  ;;  %v2639_v57 = vsel %vm1182_vm2, %v5273_v41, 0.0 }
 0xa2b   :  { %5852 = vst [vmem:[#allocation54_spill] sm:$0xff] %v5320_v62 }
 0xa2d   :  { %v2469_v7 = vpop.f32.mrf.mxu1 }
 0xa2e   :  { %v2356_v4 = vpop.f32.mrf.mxu3 }
 0xa2f   :  { %v2470_v10 = vadd.f32 %v2469_v7, %v2356_v4  ;;  %v2641_v7 = vsel %vm1182_vm2, %v5279_v24, 0.0 }
 0xa31   :  { %v5325_v61 = vadd.f32 %v2470_v10, %v2134_v39  ;;  %v2638_v39 = vadd.f32 %v2637_v12, %v2636_v56  ;;  %v5342_v35 = vpop.f32.mrf.mxu2 }
 0xa33   :  { %5853 = vst [vmem:[#allocation55_spill] sm:$0xff] %v5325_v61  ;;  %v2640_v61 = vadd.f32 %v2639_v57, %v2638_v39  ;;  %v2649_v57 = vsel %vm1182_vm2, %v5307_v15, 0.0 }
 0xa35   :  { %v2642_v50 = vadd.f32 %v2641_v7, %v2640_v61 }
 0xa36   :  { %v2814_v43 = vpop.f32.mrf.mxu3 }
 0xa37   :  { %v2826_v25 = vsel %vm1182_vm2, %v2814_v43, 0.0  ;;  %v2644_v12 = vadd.f32 %v2643_v20, %v2642_v50  ;;  %v2653_v20 = vsel %vm1182_vm2, %v5318_v42, 0.0 }
 0xa39   :  { %v2646_v56 = vadd.f32 %v2645_v58, %v2644_v12  ;;  %v5355_v7 = vpop.f32.mrf.mxu2  ;;  %v2657_v12 = vsel %vm1182_vm2, %v5327_v13, 0.0 }
 0xa3e   :  { %v2817_v11 = vpop.f32.mrf.mxu3 }
 0xa3f   :  { %v2827_v46 = vsel %vm1182_vm2, %v2817_v11, 0.0 }
 0xa40   :  { %v2828_v53 = vadd.f32 %v2827_v46, %v2826_v25  ;;  %v2647_v25 = vsel %vm1182_vm2, %v5301_v16, 0.0 }
 0xa41   :  { %v2648_v39 = vadd.f32 %v2647_v25, %v2646_v56 }
 0xa43   :  { %v2650_v61 = vadd.f32 %v2649_v57, %v2648_v39 }
 0xa46   :  { %v2820_v51 = vpop.f32.mrf.mxu3 }
 0xa47   :  { %v2829_v55 = vsel %vm1182_vm2, %v2820_v51, 0.0 }
 0xa48   :  { %v2830_v4 = vadd.f32 %v2829_v55, %v2828_v53 }
 0xa4e   :  { %v2823_v10 = vpop.f32.mrf.mxu3 }
 0xa4f   :  { %v2831_v62 = vsel %vm1182_vm2, %v2823_v10, 0.0 }
 0xa50   :  { %v2832_v18 = vadd.f32 %v2831_v62, %v2830_v4  ;;  %v2652_v4 = vadd.f32 %v2651_v22, %v2650_v61  ;;  %v2661_v61 = vsel %vm1182_vm2, %v5342_v35, 0.0 }
 0xa52   :  { %v2833_v46 = vrot.slane %v2832_v18, 4 }
 0xa54   :  { %v2834_v55 = vadd.f32 %v2833_v46, %v2832_v18  ;;  %v2655_v18 = vsel %vm1182_vm2, %v5323_v54, 0.0  ;;  %v2654_v46 = vadd.f32 %v2653_v20, %v2652_v4 }
 0xa56   :  { %v2835_v53 = vrot.slane %v2834_v55, 2  ;;  %v2656_v56 = vadd.f32 %v2655_v18, %v2654_v46  ;;  %v5375_v18 = vpop.f32.mrf.mxu2 }
 0xa58   :  { %v2836_v62 = vadd.f32 %v2835_v53, %v2834_v55  ;;  %v2659_v55 = vsel %vm1182_vm2, %v5329_v32, 0.0  ;;  %v2658_v22 = vadd.f32 %v2657_v12, %v2656_v56  ;;  %v2665_v12 = vsel %vm1182_vm2, %v5375_v18, 0.0 }
 0xa5a   :  { %v2837_v50 = vrot.slane %v2836_v62, 1  ;;  %v2660_v4 = vadd.f32 %v2659_v55, %v2658_v22 }
 0xa5c   :  { %v2838_v58 = vadd.f32 %v2837_v50, %v2836_v62 }
 0xa5e   :  { %v2839_v25 = vmul.f32 0.03125, %v2838_v58  ;;  %v2662_v58 = vadd.f32 %v2661_v61, %v2660_v4 }
 0xa60   :  { %v5365_v57 = vsub.f32 %v2814_v43, %v2839_v25  ;;  %v5367_v53 = vsub.f32 %v2817_v11, %v2839_v25  ;;  %v2842_v39 = vsub.f32 %v2820_v51, %v2839_v25  ;;  %v2843_v8 = vsub.f32 %v2823_v10, %v2839_v25 }
 0xa61   :  { %v2663_v43 = vsel %vm1182_vm2, %v5355_v7, 0.0 }
 0xa62   :  { %v2844_v62 = vmul.f32 %v5365_v57, %v5365_v57  ;;  %v2845_v20 = vmul.f32 %v5367_v53, %v5367_v53  ;;  %v2846_v50 = vmul.f32 %v2842_v39, %v2842_v39  ;;  %v2847_v11 = vmul.f32 %v2843_v8, %v2843_v8 }
 0xa63   :  { %v2664_v56 = vadd.f32 %v2663_v43, %v2662_v58 }
 0xa64   :  { %v2848_v51 = vsel %vm1182_vm2, %v2844_v62, 0.0  ;;  %v2849_v10 = vsel %vm1182_vm2, %v2845_v20, 0.0  ;;  %v2851_v25 = vsel %vm1182_vm2, %v2846_v50, 0.0  ;;  %v2853_v55 = vsel %vm1182_vm2, %v2847_v11, 0.0 }
 0xa65   :  { %v2850_v46 = vadd.f32 %v2849_v10, %v2848_v51  ;;  %v2666_v22 = vadd.f32 %v2665_v12, %v2664_v56 }
 0xa67   :  { %v2852_v14 = vadd.f32 %v2851_v25, %v2850_v46  ;;  %v2667_v49 = vrot.slane %v2666_v22, 4 }
 0xa69   :  { %v2854_v44 = vadd.f32 %v2853_v55, %v2852_v14  ;;  %v2668_v62 = vadd.f32 %v2667_v49, %v2666_v22 }
 0xa6b   :  { %v2855_v6 = vrot.slane %v2854_v44, 4  ;;  %v2669_v61 = vrot.slane %v2668_v62, 2 }
 0xa6d   :  { %v2856_v1 = vadd.f32 %v2855_v6, %v2854_v44  ;;  %v2670_v10 = vadd.f32 %v2669_v61, %v2668_v62 }
 0xa6f   :  { %v2857_v47 = vrot.slane %v2856_v1, 2  ;;  %v2671_v50 = vrot.slane %v2670_v10, 1 }
 0xa71   :  { %v2858_v3 = vadd.f32 %v2857_v47, %v2856_v1  ;;  %v2672_v58 = vadd.f32 %v2671_v50, %v2670_v10  ;;  %v2873_v47 = vstv %s3485_s3 }
 0xa73   :  { %v2859_v20 = vrot.slane %v2858_v3, 1  ;;  %v5385_v14 = vmul.f32 0.0078125, %v2672_v58 }
 0xa75   :  { %v2860_v4 = vadd.f32 %v2859_v20, %v2858_v3  ;;  %v5389_v49 = vsub.f32 %v5257_v29, %v5385_v14  ;;  %v5393_v3 = vsub.f32 %v5267_v45, %v5385_v14  ;;  %v5401_v29 = vsub.f32 %v5273_v41, %v5385_v14 }
 0xa76   :  { %v5408_v61 = vsub.f32 %v5279_v24, %v5385_v14  ;;  %v5444_v58 = vsub.f32 %v5307_v15, %v5385_v14 }
 0xa77   :  { %v2861_v51 = vmul.f32 0.03125, %v2860_v4  ;;  %v2690_v56 = vmul.f32 %v5389_v49, %v5389_v49  ;;  %v2691_v55 = vmul.f32 %v5393_v3, %v5393_v3  ;;  %v5415_v4 = vsub.f32 %v5285_v63, %v5385_v14 }
 0xa79   :  { %v2862_v40 = vadd.f32 1e-05, %v2861_v51  ;;  %v2707_v62 = vsel %vm1182_vm2, %v2691_v55, 0.0  ;;  %v2694_v63 = vmul.f32 %v5415_v4, %v5415_v4 }
 0xa7b   :  { %3603 = vrsqrt.f32 %v2862_v40  ;;  %vm2869_vm12 = vweird.f32 %v2862_v40 }
 0xa81   :  { %v3604_v43 = vpop.eup %3603 }
 0xa82   :  { %v2864_v46 = vmul.f32 %v3604_v43, %v2862_v40  ;;  %vm2870_vm0 = vweird.f32 %v3604_v43  ;;  %v2706_v40 = vsel %vm1182_vm2, %v2690_v56, 0.0  ;;  %v5476_v56 = vsub.f32 %v5327_v13, %v5385_v14 }
 0xa83   :  { %vm2871_vm13 = vmor %vm2869_vm12, %vm2870_vm0  ;;  %v2708_v41 = vadd.f32 %v2707_v62, %v2706_v40  ;;  %v5492_v62 = vsub.f32 %v5342_v35, %v5385_v14 }
 0xa84   :  { %v2865_v11 = vmul.f32 %v3604_v43, %v2864_v46  ;;  %v2701_v40 = vmul.f32 %v5476_v56, %v5476_v56 }
 0xa86   :  { %v2866_v12 = vmul.f32 0.5, %v2865_v11 }
 0xa88   :  { %v2867_v6 = vsub.f32 1.5, %v2866_v12  ;;  %v5451_v12 = vsub.f32 %v5312_v36, %v5385_v14 }
 0xa8a   :  { %v2868_v1 = vmul.f32 %v3604_v43, %v2867_v6  ;;  %v5460_v6 = vsub.f32 %v5318_v42, %v5385_v14 }
 0xa8c   :  { %v2872_v44 = vsel %vm2871_vm13, %v3604_v43, %v2868_v1  ;;  %v5433_v43 = vsub.f32 %v5301_v16, %v5385_v14  ;;  %v2698_v1 = vmul.f32 %v5451_v12, %v5451_v12 }
 0xa8d   :  { %v2874_v25 = vmul.f32 %v2873_v47, %v2872_v44  ;;  %v5467_v44 = vsub.f32 %v5323_v54, %v5385_v14 }
 0xa8e   :  { %v2696_v16 = vmul.f32 %v5433_v43, %v5433_v43 }
 0xa8f   :  { %v2878_v22 = vmul.f32 %v2874_v25, %v2843_v8  ;;  %v2877_v45 = vmul.f32 %v2874_v25, %v2842_v39  ;;  %v2876_v20 = vmul.f32 %v2874_v25, %v5367_v53  ;;  %v2692_v8 = vmul.f32 %v5401_v29, %v5401_v29 }
 0xa90   :  { %v2875_v39 = vmul.f32 %v2874_v25, %v5365_v57  ;;  %v2693_v53 = vmul.f32 %v5408_v61, %v5408_v61  ;;  %v5426_v57 = vsub.f32 %v5295_v31, %v5385_v14  ;;  %v2699_v25 = vmul.f32 %v5460_v6, %v5460_v6 }
 0xa91   :  { %2891 = vmatpush.msrb.mxu0 %v2878_v22  ;;  %3570 = vmatpush.msrb.mxu2 %v2878_v22  ;;  %v2709_v24 = vsel %vm1182_vm2, %v2692_v8, 0.0  ;;  %v2700_v55 = vmul.f32 %v5467_v44, %v5467_v44  ;;  %v2727_v8 = vsel %vm1182_vm2, %v2701_v40, 0.0  ;;  %v5856_v40 = vld [vmem:[#allocation31_spill] sm:$0xff] }
 0xa92   :  { %v2710_v51 = vadd.f32 %v2709_v24, %v2708_v41  ;;  %v2711_v10 = vsel %vm1182_vm2, %v2693_v53, 0.0  ;;  %v2723_v22 = vsel %vm1182_vm2, %v2699_v25, 0.0  ;;  %v5499_v41 = vsub.f32 %v5355_v7, %v5385_v14 }
 0xa93   :  { %2892 = vmatpush.msrb.mxu0 %v2877_v45  ;;  %3571 = vmatpush.msrb.mxu2 %v2877_v45  ;;  %v5483_v45 = vsub.f32 %v5329_v32, %v5385_v14  ;;  %v5508_v53 = vsub.f32 %v5375_v18, %v5385_v14 }
 0xa94   :  { %v2712_v50 = vadd.f32 %v2711_v10, %v2710_v51  ;;  %v2704_v24 = vmul.f32 %v5499_v41, %v5499_v41 }
 0xa95   :  { %2893 = vmatpush.msrb.mxu0 %v2876_v20  ;;  %3572 = vmatpush.msrb.mxu2 %v2876_v20  ;;  %v2702_v20 = vmul.f32 %v5483_v45, %v5483_v45 }
 0xa96   :  { %v2733_v10 = vsel %vm1182_vm2, %v2704_v24, 0.0 }
 0xa97   :  { %2894 = vmatpush.msrb.mxu0 %v2875_v39  ;;  %3573 = vmatpush.msrb.mxu2 %v2875_v39  ;;  %v2703_v39 = vmul.f32 %v5492_v62, %v5492_v62 }
 0xa98   :  { %3506 = vmatmul.msk.f32.vlgmr.msrb.gmra.mxu0 %vm1182_vm2, %v5032_v48  ;;  %3520 = vmatmul.msk.f32.vlgmr.msrb.gmra.mxu2 %vm1182_vm2, %v5222_v27  ;;  %v2695_v48 = vmul.f32 %v5426_v57, %v5426_v57  ;;  %v2713_v27 = vsel %vm1182_vm2, %v2694_v63, 0.0  ;;  %v2705_v63 = vmul.f32 %v5508_v53, %v5508_v53 }
 0xa99   :  { %v2714_v31 = vadd.f32 %v2713_v27, %v2712_v50  ;;  %v2731_v51 = vsel %vm1182_vm2, %v2703_v39, 0.0  ;;  %v5860_v39 = vld [vmem:[#allocation33_spill] sm:$0xff] }
 0xa9a   :  { %v2715_v46 = vsel %vm1182_vm2, %v2695_v48, 0.0  ;;  %v2735_v50 = vsel %vm1182_vm2, %v2705_v63, 0.0 }
 0xa9b   :  { %v2716_v11 = vadd.f32 %v2715_v46, %v2714_v31 }
 0xaa0   :  { %3507 = vmatmul.msk.f32.gmra.mxu0 %vm1182_vm2, %v5041_v17  ;;  %3521 = vmatmul.msk.f32.gmra.mxu2 %vm1182_vm2, %v5234_v38  ;;  %v2697_v17 = vmul.f32 %v5444_v58, %v5444_v58  ;;  %v2717_v38 = vsel %vm1182_vm2, %v2696_v16, 0.0 }
 0xaa1   :  { %v2718_v15 = vadd.f32 %v2717_v38, %v2716_v11 }
 0xaa2   :  { %v2719_v47 = vsel %vm1182_vm2, %v2697_v17, 0.0 }
 0xaa3   :  { %v2720_v36 = vadd.f32 %v2719_v47, %v2718_v15  ;;  %v2089_v47 = vadd.f32 %v4901_v28, %v4981_v52 }
 0xaa8   :  { %3508 = vmatmul.msk.f32.gmra.mxu0 %vm1182_vm2, %v5052_v0  ;;  %v2721_v0 = vsel %vm1182_vm2, %v2698_v1, 0.0  ;;  %v2755_v1 = vstv %s3484_s1 }
 0xaa9   :  { %v2722_v42 = vadd.f32 %v2721_v0, %v2720_v36 }
 0xaab   :  { %v2724_v54 = vadd.f32 %v2723_v22, %v2722_v42  ;;  %v5855_v22 = vld [vmem:[#allocation8_spill] sm:$0xff] }
 0xab0   :  { %3509 = vmatmul.msk.f32.gmra.mxu0 %vm1182_vm2, %v5063_v33  ;;  %v2725_v33 = vsel %vm1182_vm2, %v2700_v55, 0.0  ;;  %v5854_v55 = vld [vmem:[#allocation15_spill] sm:$0xff] }
 0xab1   :  { %v2726_v13 = vadd.f32 %v2725_v33, %v2724_v54  ;;  %v2092_v54 = vadd.f32 %v5855_v22, %v5854_v55  ;;  %v5857_v33 = vld [vmem:[#allocation30_spill] sm:$0xff] }
 0xab3   :  { %v2728_v32 = vadd.f32 %v2727_v8, %v2726_v13  ;;  %v2428_v13 = vadd.f32 %v5857_v33, %v5856_v40  ;;  %v5859_v8 = vld [vmem:[#allocation9_spill] sm:$0xff] }
 0xab8   :  { %3510 = vmatmul.msk.f32.gmra.mxu0 %vm1182_vm2, %v5079_v5  ;;  %v2729_v5 = vsel %vm1182_vm2, %v2702_v20, 0.0  ;;  %v2473_v20 = vadd.f32 %v2428_v13, %v2092_v54  ;;  %v5870_v13 = vld [vmem:[#allocation19_spill] sm:$0xff] }
 0xab9   :  { %v2730_v35 = vadd.f32 %v2729_v5, %v2728_v32  ;;  %v5861_v5 = vld [vmem:[#allocation32_spill] sm:$0xff] }
 0xabb   :  { %v2732_v7 = vadd.f32 %v2731_v51, %v2730_v35  ;;  %v2431_v35 = vadd.f32 %v5861_v5, %v5860_v39  ;;  %v5876_v5 = vld [vmem:[#allocation41_spill] sm:$0xff] }
 0xac0   :  { %3511 = vmatmul.msk.f32.gmra.mxu0 %vm1182_vm2, %v5103_v9  ;;  %v2734_v9 = vadd.f32 %v2733_v10, %v2732_v7 }
 0xac2   :  { %v2736_v48 = vadd.f32 %v2735_v50, %v2734_v9 }
 0xac4   :  { %v2737_v18 = vrot.slane %v2736_v48, 4 }
 0xac6   :  { %v2738_v14 = vadd.f32 %v2737_v18, %v2736_v48  ;;  %v5862_v48 = vld [vmem:[#allocation17_spill] sm:$0xff]  ;;  %v5863_v18 = vld [vmem:[#allocation10_spill] sm:$0xff] }
 0xac8   :  { %3512 = vmatmul.msk.f32.gmra.mxu0 %vm1182_vm2, %v5116_v19  ;;  %v2739_v27 = vrot.slane %v2738_v14, 2 }
 0xaca   :  { %v2740_v31 = vadd.f32 %v2739_v27, %v2738_v14  ;;  %v2098_v14 = vadd.f32 %v5863_v18, %v5862_v48  ;;  %v5864_v27 = vld [vmem:[#allocation35_spill] sm:$0xff]  ;;  %v5881_v18 = vld [vmem:[#allocation42_spill] sm:$0xff] }
 0xacb   :  { %v5880_v48 = vld [vmem:[#allocation43_spill] sm:$0xff] }
 0xacc   :  { %v2741_v16 = vrot.slane %v2740_v31, 1 }
 0xace   :  { %v2742_v46 = vadd.f32 %v2741_v16, %v2740_v31  ;;  %v5865_v31 = vld [vmem:[#allocation34_spill] sm:$0xff] }
 0xacf   :  { %v2434_v16 = vadd.f32 %v5865_v31, %v5864_v27 }
 0xad0   :  { %3513 = vmatmul.msk.f32.gmra.mxu0 %vm1182_vm2, %v5127_v23  ;;  %v2743_v19 = vmul.f32 0.0078125, %v2742_v46 }
 0xad2   :  { %v2744_v11 = vadd.f32 1e-05, %v2743_v19 }
 0xad4   :  { %3605 = vrsqrt.f32 %v2744_v11  ;;  %vm2751_vm14 = vweird.f32 %v2744_v11 }
 0xad8   :  { %3514 = vmatmul.msk.f32.gmra.mxu0 %vm1182_vm2, %v5138_v37 }
 0xada   :  { %v3606_v23 = vpop.eup %3605 }
 0xadb   :  { %v2746_v37 = vmul.f32 %v3606_v23, %v2744_v11  ;;  %vm2752_vm1 = vweird.f32 %v3606_v23 }
 0xadc   :  { %vm2753_vm15 = vmor %vm2751_vm14, %vm2752_vm1 }
 0xadd   :  { %v2747_v17 = vmul.f32 %v3606_v23, %v2746_v37 }
 0xae0   :  { %3515 = vmatmul.msk.f32.gmra.mxu0 %vm1182_vm2, %v5151_v2  ;;  %v2748_v2 = vmul.f32 0.5, %v2747_v17 }
 0xae2   :  { %v2749_v38 = vsub.f32 1.5, %v2748_v2  ;;  %v5866_v2 = vld [vmem:[#allocation18_spill] sm:$0xff] }
 0xae4   :  { %v2750_v15 = vmul.f32 %v3606_v23, %v2749_v38  ;;  %v5867_v38 = vld [vmem:[#allocation11_spill] sm:$0xff] }
 0xae8   :  { %3516 = vmatmul.msk.f32.gmra.mxu0 %vm1182_vm2, %v5162_v34  ;;  %v2754_v34 = vsel %vm2753_vm15, %v3606_v23, %v2750_v15  ;;  %v2101_v15 = vadd.f32 %v5867_v38, %v5866_v2  ;;  %v5884_v2 = vld [vmem:[#allocation45_spill] sm:$0xff]  ;;  %v5885_v38 = vld [vmem:[#allocation44_spill] sm:$0xff] }
 0xaf0   :  { %3517 = vmatmul.msk.f32.gmra.mxu0 %vm1182_vm2, %v5179_v59  ;;  %v5533_v59 = vmul.f32 %v2755_v1, %v2754_v34  ;;  %v5868_v34 = vld [vmem:[#allocation37_spill] sm:$0xff]  ;;  %v5869_v1 = vld [vmem:[#allocation36_spill] sm:$0xff] }
 0xaf2   :  { %v2758_v28 = vmul.f32 %v5533_v59, %v5393_v3  ;;  %v2759_v3 = vmul.f32 %v5533_v59, %v5401_v29  ;;  %v2760_v11 = vmul.f32 %v5533_v59, %v5408_v61  ;;  %v2475_v29 = vadd.f32 %v2434_v16, %v2098_v14 }
 0xaf3   :  { %v2446_v14 = vadd.f32 %v5881_v18, %v5880_v48 }
 0xaf8   :  { %3518 = vmatmul.msk.f32.gmra.mxu0 %vm1182_vm2, %v5198_v30  ;;  %v2425_v30 = vadd.f32 %v5240_v60, %v5242_v21 }
 0xafa   :  { %v2472_v25 = vadd.f32 %v2425_v30, %v2089_v47  ;;  %v2437_v47 = vadd.f32 %v5869_v1, %v5868_v34 }
 0xafc   :  { %v2476_v61 = vadd.f32 %v2437_v47, %v2101_v15  ;;  %v2449_v15 = vadd.f32 %v5885_v38, %v5884_v2  ;;  %v2765_v47 = vmul.f32 %v5533_v59, %v5451_v12 }
 0xb00   :  { %3519 = vmatmul.msk.f32.gmra.mxu0 %vm1182_vm2, %v5211_v26  ;;  %v2757_v26 = vmul.f32 %v5533_v59, %v5389_v49  ;;  %v5858_v49 = vld [vmem:[#allocation16_spill] sm:$0xff] }
 0xb01   :  { %v2095_v32 = vadd.f32 %v5859_v8, %v5858_v49  ;;  %v5874_v8 = vld [vmem:[#allocation20_spill] sm:$0xff] }
 0xb03   :  { %v2474_v10 = vadd.f32 %v2431_v35, %v2095_v32  ;;  %v5875_v32 = vld [vmem:[#allocation13_spill] sm:$0xff]  ;;  %v5877_v35 = vld [vmem:[#allocation40_spill] sm:$0xff] }
 0xb04   :  { %v2107_v39 = vadd.f32 %v5875_v32, %v5874_v8 }
 0xb15   :  { %v2896_v36 = vpop.f32.mrf.mxu0 }
 0xb16   :  { %v2944_v0 = vadd.f32 %v2896_v36, %v2757_v26  ;;  %v2761_v36 = vmul.f32 %v5533_v59, %v5415_v4  ;;  %v2762_v4 = vmul.f32 %v5533_v59, %v5426_v57  ;;  %v2764_v57 = vmul.f32 %v5533_v59, %v5444_v58 }
 0xb18   :  { %v5541_v42 = vadd.f32 %v2944_v0, %v2472_v25 }
 0xb1a   :  { %v2976_v24 = vsel %vm1182_vm2, %v5541_v42, 0.0 }
 0xb1d   :  { %v2899_v52 = vpop.f32.mrf.mxu0 }
 0xb1e   :  { %v2945_v60 = vadd.f32 %v2899_v52, %v2758_v28  ;;  %v5871_v28 = vld [vmem:[#allocation12_spill] sm:$0xff] }
 0xb1f   :  { %v2104_v52 = vadd.f32 %v5871_v28, %v5870_v13  ;;  %v5887_v13 = vld [vmem:[#allocation27_spill] sm:$0xff] }
 0xb20   :  { %v5549_v21 = vadd.f32 %v2945_v60, %v2473_v20  ;;  %v5872_v20 = vld [vmem:[#allocation39_spill] sm:$0xff]  ;;  %v5873_v60 = vld [vmem:[#allocation38_spill] sm:$0xff] }
 0xb21   :  { %v2440_v49 = vadd.f32 %v5873_v60, %v5872_v20  ;;  %v5889_v20 = vld [vmem:[#allocation46_spill] sm:$0xff] }
 0xb22   :  { %v2977_v51 = vsel %vm1182_vm2, %v5549_v21, 0.0 }
 0xb23   :  { %v2978_v7 = vadd.f32 %v2977_v51, %v2976_v24  ;;  %v2443_v24 = vadd.f32 %v5877_v35, %v5876_v5  ;;  %v5890_v5 = vld [vmem:[#allocation24_spill] sm:$0xff] }
 0xb24   :  { %v5891_v35 = vld [vmem:[#allocation28_spill] sm:$0xff] }
 0xb25   :  { %v2902_v63 = vpop.f32.mrf.mxu0  ;;  %v2478_v16 = vadd.f32 %v2443_v24, %v2107_v39  ;;  %v2119_v24 = vadd.f32 %v5891_v35, %v5890_v5 }
 0xb26   :  { %v2946_v9 = vadd.f32 %v2902_v63, %v2759_v3  ;;  %v5878_v3 = vld [vmem:[#allocation21_spill] sm:$0xff]  ;;  %v5879_v63 = vld [vmem:[#allocation14_spill] sm:$0xff] }
 0xb28   :  { %v5561_v50 = vadd.f32 %v2946_v9, %v2474_v10  ;;  %v2110_v10 = vadd.f32 %v5879_v63, %v5878_v3  ;;  %v2477_v9 = vadd.f32 %v2440_v49, %v2104_v52  ;;  %v5888_v52 = vld [vmem:[#allocation47_spill] sm:$0xff]  ;;  %v2766_v49 = vmul.f32 %v5533_v59, %v5460_v6 }
 0xb29   :  { %v2452_v60 = vadd.f32 %v5889_v20, %v5888_v52  ;;  %v2770_v52 = vmul.f32 %v5533_v59, %v5492_v62 }
 0xb2a   :  { %v2979_v46 = vsel %vm1182_vm2, %v5561_v50, 0.0 }
 0xb2b   :  { %v2980_v19 = vadd.f32 %v2979_v46, %v2978_v7  ;;  %v2763_v7 = vmul.f32 %v5533_v59, %v5433_v43  ;;  %v5882_v43 = vld [vmem:[#allocation22_spill] sm:$0xff] }
 0xb2d   :  { %v2905_v23 = vpop.f32.mrf.mxu0 }
 0xb2e   :  { %v2947_v37 = vadd.f32 %v2905_v23, %v2760_v11  ;;  %v2479_v11 = vadd.f32 %v2446_v14, %v2110_v10 }
 0xb30   :  { %v5571_v17 = vadd.f32 %v2947_v37, %v2475_v29  ;;  %v5883_v29 = vld [vmem:[#allocation25_spill] sm:$0xff] }
 0xb31   :  { %v2113_v37 = vadd.f32 %v5883_v29, %v5882_v43 }
 0xb32   :  { %v2981_v30 = vsel %vm1182_vm2, %v5571_v17, 0.0 }
 0xb33   :  { %v2982_v26 = vadd.f32 %v2981_v30, %v2980_v19 }
 0xb35   :  { %v2908_v25 = vpop.f32.mrf.mxu0 }
 0xb36   :  { %v2948_v0 = vadd.f32 %v2908_v25, %v2761_v36  ;;  %v2480_v36 = vadd.f32 %v2449_v15, %v2113_v37  ;;  %v2768_v37 = vmul.f32 %v5533_v59, %v5476_v56 }
 0xb38   :  { %v5581_v55 = vadd.f32 %v2948_v0, %v2476_v61 }
 0xb3a   :  { %v2983_v22 = vsel %vm1182_vm2, %v5581_v55, 0.0 }
 0xb3b   :  { %v2984_v54 = vadd.f32 %v2983_v22, %v2982_v26 }
 0xb3d   :  { %v2911_v40 = vpop.f32.mrf.mxu0 }
 0xb3e   :  { %v2949_v51 = vadd.f32 %v2911_v40, %v2762_v4 }
 0xb40   :  { %v5603_v46 = vadd.f32 %v2949_v51, %v2477_v9  ;;  %v5892_v51 = vld [vmem:[#allocation49_spill] sm:$0xff]  ;;  %v2767_v9 = vmul.f32 %v5533_v59, %v5467_v44 }
 0xb42   :  { %v2985_v34 = vsel %vm1182_vm2, %v5603_v46, 0.0 }
 0xb43   :  { %v2986_v30 = vadd.f32 %v2985_v34, %v2984_v54  ;;  %v2938_v34 = vpop.f32.mrf.mxu2 }
 0xb45   :  { %v2914_v33 = vpop.f32.mrf.mxu0 }
 0xb46   :  { %v2950_v27 = vadd.f32 %v2914_v33, %v2763_v7  ;;  %v5886_v33 = vld [vmem:[#allocation23_spill] sm:$0xff]  ;;  %v5893_v7 = vld [vmem:[#allocation48_spill] sm:$0xff] }
 0xb47   :  { %v2116_v28 = vadd.f32 %v5887_v13, %v5886_v33  ;;  %v2455_v3 = vadd.f32 %v5893_v7, %v5892_v51 }
 0xb48   :  { %v5605_v23 = vadd.f32 %v2950_v27, %v2478_v16  ;;  %v5894_v27 = vld [vmem:[#allocation26_spill] sm:$0xff]  ;;  %v5896_v16 = vld [vmem:[#allocation51_spill] sm:$0xff] }
 0xb49   :  { %v2481_v8 = vadd.f32 %v2452_v60, %v2116_v28  ;;  %v2482_v18 = vadd.f32 %v2455_v3, %v2119_v24  ;;  %v2772_v28 = vmul.f32 %v5533_v59, %v5508_v53 }
 0xb4a   :  { %v2987_v58 = vsel %vm1182_vm2, %v5605_v23, 0.0 }
 0xb4b   :  { %v2988_v0 = vadd.f32 %v2987_v58, %v2986_v30  ;;  %v2769_v30 = vmul.f32 %v5533_v59, %v5483_v45 }
 0xb4d   :  { %v2917_v31 = vpop.f32.mrf.mxu0 }
 0xb4e   :  { %v2951_v19 = vadd.f32 %v2917_v31, %v2764_v57  ;;  %v5895_v57 = vld [vmem:[#allocation29_spill] sm:$0xff] }
 0xb4f   :  { %v2122_v31 = vadd.f32 %v5895_v57, %v5894_v27 }
 0xb50   :  { %v5613_v1 = vadd.f32 %v2951_v19, %v2479_v11  ;;  %v5897_v19 = vld [vmem:[#allocation50_spill] sm:$0xff] }
 0xb51   :  { %v2458_v11 = vadd.f32 %v5897_v19, %v5896_v16 }
 0xb52   :  { %v2989_v25 = vsel %vm1182_vm2, %v5613_v1, 0.0 }
 0xb53   :  { %v2990_v40 = vadd.f32 %v2989_v25, %v2988_v0  ;;  %v2483_v38 = vadd.f32 %v2458_v11, %v2122_v31  ;;  %v5898_v25 = vld [vmem:[#allocation52_spill] sm:$0xff]  ;;  %v2771_v0 = vmul.f32 %v5533_v59, %v5499_v41 }
 0xb55   :  { %v2920_v26 = vpop.f32.mrf.mxu0  ;;  %v2958_v13 = vadd.f32 %v2938_v34, %v2771_v0 }
 0xb56   :  { %v2952_v61 = vadd.f32 %v2920_v26, %v2765_v47 }
 0xb58   :  { %v5621_v22 = vadd.f32 %v2952_v61, %v2480_v36 }
 0xb5a   :  { %v2991_v12 = vsel %vm1182_vm2, %v5621_v22, 0.0 }
 0xb5b   :  { %v2992_v54 = vadd.f32 %v2991_v12, %v2990_v40  ;;  %v2941_v40 = vpop.f32.mrf.mxu2  ;;  %v5899_v12 = vld [vmem:[#allocation54_spill] sm:$0xff] }
 0xb5c   :  { %v2959_v45 = vadd.f32 %v2941_v40, %v2772_v28 }
 0xb5d   :  { %v2923_v4 = vpop.f32.mrf.mxu0 }
 0xb5e   :  { %v2953_v32 = vadd.f32 %v2923_v4, %v2766_v49  ;;  %v5900_v49 = vld [vmem:[#allocation53_spill] sm:$0xff] }
 0xb60   :  { %v2969_v39 = vadd.f32 %v2953_v32, %v2481_v8  ;;  %v5901_v8 = vld [vmem:[#allocation55_spill] sm:$0xff] }
 0xb61   :  { %v2975_v41 = vadd.f32 %v2959_v45, %v5901_v8 }
 0xb62   :  { %v2993_v63 = vsel %vm1182_vm2, %v2969_v39, 0.0 }
 0xb63   :  { %v2994_v10 = vadd.f32 %v2993_v63, %v2992_v54  ;;  %v2974_v54 = vadd.f32 %v2958_v13, %v5899_v12  ;;  %v3005_v53 = vsel %vm1182_vm2, %v2975_v41, 0.0 }
 0xb65   :  { %v2926_v48 = vpop.f32.mrf.mxu0  ;;  %v3003_v35 = vsel %vm1182_vm2, %v2974_v54, 0.0 }
 0xb66   :  { %v2954_v14 = vadd.f32 %v2926_v48, %v2767_v9 }
 0xb68   :  { %v2970_v6 = vadd.f32 %v2954_v14, %v2482_v18 }
 0xb6a   :  { %v2995_v43 = vsel %vm1182_vm2, %v2970_v6, 0.0 }
 0xb6b   :  { %v2996_v29 = vadd.f32 %v2995_v43, %v2994_v10 }
 0xb6d   :  { %v2929_v2 = vpop.f32.mrf.mxu0 }
 0xb6e   :  { %v2955_v15 = vadd.f32 %v2929_v2, %v2768_v37 }
 0xb70   :  { %v2971_v44 = vadd.f32 %v2955_v15, %v2483_v38 }
 0xb72   :  { %v2997_v58 = vsel %vm1182_vm2, %v2971_v44, 0.0 }
 0xb73   :  { %v2998_v47 = vadd.f32 %v2997_v58, %v2996_v29 }
 0xb75   :  { %v2932_v26 = vpop.f32.mrf.mxu0 }
 0xb76   :  { %v2956_v36 = vadd.f32 %v2932_v26, %v2769_v30 }
 0xb78   :  { %v2972_v61 = vadd.f32 %v2956_v36, %v5898_v25 }
 0xb7a   :  { %v2999_v56 = vsel %vm1182_vm2, %v2972_v61, 0.0 }
 0xb7b   :  { %v3000_v33 = vadd.f32 %v2999_v56, %v2998_v47 }
 0xb7d   :  { %v2935_v20 = vpop.f32.mrf.mxu0 }
 0xb7e   :  { %v2957_v60 = vadd.f32 %v2935_v20, %v2770_v52 }
 0xb80   :  { %v2973_v4 = vadd.f32 %v2957_v60, %v5900_v49 }
 0xb82   :  { %v3001_v32 = vsel %vm1182_vm2, %v2973_v4, 0.0 }
 0xb83   :  { %v3002_v5 = vadd.f32 %v3001_v32, %v3000_v33 }
 0xb85   :  { %v3004_v24 = vadd.f32 %v3003_v35, %v3002_v5 }
 0xb87   :  { %v3006_v51 = vadd.f32 %v3005_v53, %v3004_v24 }
 0xb89   :  { %v3007_v7 = vrot.slane %v3006_v51, 4 }
 0xb8b   :  { %v3008_v62 = vadd.f32 %v3007_v7, %v3006_v51 }
 0xb8d   :  { %v3009_v59 = vrot.slane %v3008_v62, 2 }
 0xb8f   :  { %v3010_v3 = vadd.f32 %v3009_v59, %v3008_v62 }
 0xb91   :  { %v3011_v63 = vrot.slane %v3010_v3, 1 }
 0xb93   :  { %v3012_v10 = vadd.f32 %v3011_v63, %v3010_v3 }
 0xb95   :  { %v3013_v9 = vmul.f32 0.0078125, %v3012_v10 }
 0xb97   :  { %v5663_v48 = vsub.f32 %v5541_v42, %v3013_v9  ;;  %v5666_v18 = vsub.f32 %v5549_v21, %v3013_v9  ;;  %v5669_v14 = vsub.f32 %v5561_v50, %v3013_v9  ;;  %v5672_v27 = vsub.f32 %v5571_v17, %v3013_v9 }
 0xb98   :  { %v5675_v57 = vsub.f32 %v5581_v55, %v3013_v9  ;;  %v5678_v31 = vsub.f32 %v5621_v22, %v3013_v9  ;;  %v5680_v16 = vsub.f32 %v2969_v39, %v3013_v9  ;;  %v5682_v19 = vsub.f32 %v2970_v6, %v3013_v9 }
 0xb99   :  { %v5684_v42 = vsub.f32 %v2971_v44, %v3013_v9  ;;  %v5686_v21 = vsub.f32 %v2972_v61, %v3013_v9  ;;  %v5688_v11 = vsub.f32 %v2973_v4, %v3013_v9  ;;  %v5690_v50 = vsub.f32 %v2974_v54, %v3013_v9 }
 0xb9a   :  { %v5692_v17 = vsub.f32 %v2975_v41, %v3013_v9  ;;  %v3030_v55 = vmul.f32 %v5663_v48, %v5663_v48  ;;  %v3031_v22 = vmul.f32 %v5666_v18, %v5666_v18  ;;  %v3032_v39 = vmul.f32 %v5669_v14, %v5669_v14 }
 0xb9b   :  { %v5701_v6 = vsub.f32 %v5603_v46, %v3013_v9  ;;  %v3033_v43 = vmul.f32 %v5672_v27, %v5672_v27  ;;  %v5708_v38 = vsub.f32 %v5605_v23, %v3013_v9  ;;  %v3034_v15 = vmul.f32 %v5675_v57, %v5675_v57 }
 0xb9c   :  { %v3046_v29 = vsel %vm1182_vm2, %v3030_v55, 0.0  ;;  %v3047_v37 = vsel %vm1182_vm2, %v3031_v22, 0.0  ;;  %v3049_v44 = vsel %vm1182_vm2, %v3032_v39, 0.0  ;;  %v5714_v46 = vsub.f32 %v5613_v1, %v3013_v9  ;;  %v3146_v39 = vld [vmem:[%s5803_s2 + $0x180] sm:$0xff] }
 0xb9d   :  { %v3048_v2 = vadd.f32 %v3047_v37, %v3046_v29  ;;  %v3035_v58 = vmul.f32 %v5701_v6, %v5701_v6  ;;  %v3051_v47 = vsel %vm1182_vm2, %v3033_v43, 0.0  ;;  %v3036_v26 = vmul.f32 %v5708_v38, %v5708_v38  ;;  %v3145_v43 = vld [vmem:[%s5803_s2 + $0x178] sm:$0xff]  ;;  %3209 = vmatpush.msra.mxu3 %v3146_v39  ;;  %v3144_v37 = vld [vmem:[%s5803_s2 + $0x170] sm:$0xff] }
 0xb9e   :  { %v3053_v23 = vsel %vm1182_vm2, %v3034_v15, 0.0  ;;  %v3037_v25 = vmul.f32 %v5714_v46, %v5714_v46  ;;  %v3038_v1 = vmul.f32 %v5678_v31, %v5678_v31  ;;  %v3039_v33 = vmul.f32 %v5680_v16, %v5680_v16  ;;  %v3143_v15 = vld [vmem:[%s5803_s2 + $0x168] sm:$0xff] }
 0xb9f   :  { %v3050_v34 = vadd.f32 %v3049_v44, %v3048_v2  ;;  %v3055_v61 = vsel %vm1182_vm2, %v3035_v58, 0.0  ;;  %v3057_v56 = vsel %vm1182_vm2, %v3036_v26, 0.0  ;;  %v3040_v52 = vmul.f32 %v5682_v19, %v5682_v19  ;;  %3210 = vmatpush.msra.mxu3 %v3145_v43 }
 0xba0   :  { %v3059_v13 = vsel %vm1182_vm2, %v3037_v25, 0.0  ;;  %v3061_v20 = vsel %vm1182_vm2, %v3038_v1, 0.0  ;;  %v3041_v60 = vmul.f32 %v5684_v42, %v5684_v42  ;;  %v3063_v12 = vsel %vm1182_vm2, %v3039_v33, 0.0 }
 0xba1   :  { %v3052_v30 = vadd.f32 %v3051_v47, %v3050_v34  ;;  %v3042_v49 = vmul.f32 %v5686_v21, %v5686_v21  ;;  %v3065_v4 = vsel %vm1182_vm2, %v3040_v52, 0.0  ;;  %v3043_v41 = vmul.f32 %v5688_v11, %v5688_v11  ;;  %3211 = vmatpush.msra.mxu3 %v3144_v37 }
 0xba2   :  { %v3067_v32 = vsel %vm1182_vm2, %v3041_v60, 0.0  ;;  %v3044_v35 = vmul.f32 %v5690_v50, %v5690_v50  ;;  %v3045_v51 = vmul.f32 %v5692_v17, %v5692_v17 }
 0xba3   :  { %v3054_v36 = vadd.f32 %v3053_v23, %v3052_v30  ;;  %v3069_v24 = vsel %vm1182_vm2, %v3042_v49, 0.0  ;;  %v3071_v7 = vsel %vm1182_vm2, %v3043_v41, 0.0  ;;  %3212 = vmatpush.msra.mxu3 %v3143_v15 }
 0xba4   :  { %v3073_v59 = vsel %vm1182_vm2, %v3044_v35, 0.0  ;;  %v3075_v63 = vsel %vm1182_vm2, %v3045_v51, 0.0 }
 0xba5   :  { %v3056_v0 = vadd.f32 %v3055_v61, %v3054_v36 }
 0xba7   :  { %v3058_v40 = vadd.f32 %v3057_v56, %v3056_v0 }
 0xba9   :  { %v3060_v28 = vadd.f32 %v3059_v13, %v3058_v40 }
 0xbab   :  { %v3062_v45 = vadd.f32 %v3061_v20, %v3060_v28 }
 0xbad   :  { %v3064_v54 = vadd.f32 %v3063_v12, %v3062_v45 }
 0xbaf   :  { %v3066_v8 = vadd.f32 %v3065_v4, %v3064_v54 }
 0xbb1   :  { %v3068_v5 = vadd.f32 %v3067_v32, %v3066_v8 }
 0xbb3   :  { %v3070_v53 = vadd.f32 %v3069_v24, %v3068_v5 }
 0xbb5   :  { %v3072_v62 = vadd.f32 %v3071_v7, %v3070_v53 }
 0xbb7   :  { %v3074_v3 = vadd.f32 %v3073_v59, %v3072_v62 }
 0xbb9   :  { %v3076_v10 = vadd.f32 %v3075_v63, %v3074_v3 }
 0xbbb   :  { %v3077_v9 = vrot.slane %v3076_v10, 4 }
 0xbbd   :  { %v3078_v55 = vadd.f32 %v3077_v9, %v3076_v10 }
 0xbbf   :  { %v3079_v22 = vrot.slane %v3078_v55, 2 }
 0xbc1   :  { %v3080_v29 = vadd.f32 %v3079_v22, %v3078_v55 }
 0xbc3   :  { %v3081_v2 = vrot.slane %v3080_v29, 1 }
 0xbc5   :  { %v3082_v44 = vadd.f32 %v3081_v2, %v3080_v29 }
 0xbc7   :  { %v3083_v34 = vmul.f32 0.0078125, %v3082_v44 }
 0xbc9   :  { %v3084_v58 = vadd.f32 1e-05, %v3083_v34 }
 0xbcb   :  { %3607 = vrsqrt.f32 %v3084_v58  ;;  %vm3091_vm4 = vweird.f32 %v3084_v58 }
 0xbd1   :  { %v3608_v47 = vpop.eup %3607 }
 0xbd2   :  { %v3086_v30 = vmul.f32 %v3608_v47, %v3084_v58  ;;  %vm3092_vm3 = vweird.f32 %v3608_v47 }
 0xbd3   :  { %vm3093_vm5 = vmor %vm3091_vm4, %vm3092_vm3 }
 0xbd4   :  { %v3087_v26 = vmul.f32 %v3608_v47, %v3086_v30 }
 0xbd6   :  { %v3088_v23 = vmul.f32 0.5, %v3087_v26 }
 0xbd8   :  { %v3089_v36 = vsub.f32 1.5, %v3088_v23 }
 0xbda   :  { %v3090_v25 = vmul.f32 %v3608_v47, %v3089_v36 }
 0xbdc   :  { %v3094_v61 = vsel %vm3093_vm5, %v3608_v47, %v3090_v25 }
 0xbdd   :  { %v3095_v0 = vmul.f32 %v3094_v61, %v5663_v48  ;;  %v3096_v40 = vmul.f32 %v3094_v61, %v5666_v18  ;;  %v3097_v28 = vmul.f32 %v3094_v61, %v5669_v14  ;;  %v3098_v45 = vmul.f32 %v3094_v61, %v5672_v27 }
 0xbde   :  { %v3099_v12 = vmul.f32 %v3094_v61, %v5675_v57  ;;  %v3100_v49 = vmul.f32 %v3094_v61, %v5701_v6  ;;  %v3101_v8 = vmul.f32 %v3094_v61, %v5708_v38  ;;  %v3102_v32 = vmul.f32 %v3094_v61, %v5714_v46 }
 0xbdf   :  { %v3111_v1 = vmax.f32 %v3095_v0, 0.0  ;;  %v3112_v33 = vmax.f32 %v3096_v40, 0.0  ;;  %v3113_v52 = vmax.f32 %v3097_v28, 0.0  ;;  %v3114_v60 = vmax.f32 %v3098_v45, 0.0 }
 0xbe0   :  { %v3115_v18 = vmax.f32 %v3099_v12, 0.0  ;;  %v3116_v14 = vmax.f32 %v3100_v49, 0.0  ;;  %v3117_v27 = vmax.f32 %v3101_v8, 0.0  ;;  %v3118_v57 = vmax.f32 %v3102_v32, 0.0 }
 0xbe1   :  { %v3127_v56 = vmin.f32 %v3111_v1, 6.0  ;;  %v3128_v13 = vmin.f32 %v3112_v33, 6.0  ;;  %v3129_v20 = vmin.f32 %v3113_v52, 6.0  ;;  %v3130_v48 = vmin.f32 %v3114_v60, 6.0 }
 0xbe2   :  { %v3131_v54 = vmin.f32 %v3115_v18, 6.0  ;;  %v3132_v4 = vmin.f32 %v3116_v14, 6.0  ;;  %v3133_v41 = vmin.f32 %v3117_v27, 6.0  ;;  %v3134_v5 = vmin.f32 %v3118_v57, 6.0 }
 0xbe3   :  { %3522 = vmatmul.msk.f32.vlgmr.msra.gmra.mxu3 %vm1182_vm2, %v3127_v56  ;;  %v3103_v35 = vmul.f32 %v3094_v61, %v5678_v31  ;;  %v3104_v53 = vmul.f32 %v3094_v61, %v5680_v16  ;;  %v3105_v7 = vmul.f32 %v3094_v61, %v5682_v19  ;;  %v3106_v59 = vmul.f32 %v3094_v61, %v5684_v42 }
 0xbe4   :  { %v3107_v63 = vmul.f32 %v3094_v61, %v5686_v21  ;;  %v3108_v10 = vmul.f32 %v3094_v61, %v5688_v11  ;;  %v3109_v22 = vmul.f32 %v3094_v61, %v5690_v50  ;;  %v3110_v43 = vmul.f32 %v3094_v61, %v5692_v17  ;;  %v3578_v11 = vld [vmem:[%s5803_s2 + $0x188] ss:$0 sm:$0xff]  ;;  %s3650_s2 = smov [#allocation5]  }
 0xbe5   :  { %v3119_v6 = vmax.f32 %v3103_v35, 0.0  ;;  %v3120_v38 = vmax.f32 %v3104_v53, 0.0  ;;  %v3121_v46 = vmax.f32 %v3105_v7, 0.0  ;;  %v3122_v31 = vmax.f32 %v3106_v59, 0.0  ;;  %s3282_s27 = sshll.u32 %s3650_s2, 4  ;;  %s3283_s27 = int_to_ptr.vmem [resolvable:$true] %s3282_s27 }
 0xbe6   :  { %v3123_v16 = vmax.f32 %v3107_v63, 0.0  ;;  %v3124_v19 = vmax.f32 %v3108_v10, 0.0  ;;  %v3125_v42 = vmax.f32 %v3109_v22, 0.0  ;;  %v3126_v21 = vmax.f32 %v3110_v43, 0.0 }
 0xbe7   :  { %v3135_v24 = vmin.f32 %v3119_v6, 6.0  ;;  %v3136_v51 = vmin.f32 %v3120_v38, 6.0  ;;  %v3137_v62 = vmin.f32 %v3121_v46, 6.0  ;;  %v3138_v3 = vmin.f32 %v3122_v31, 6.0 }
 0xbe8   :  { %v3139_v9 = vmin.f32 %v3123_v16, 6.0  ;;  %v3140_v55 = vmin.f32 %v3124_v19, 6.0  ;;  %v3141_v39 = vmin.f32 %v3125_v42, 6.0  ;;  %v3142_v29 = vmin.f32 %v3126_v21, 6.0 }
 0xbeb   :  { %3523 = vmatmul.msk.f32.gmra.mxu3 %vm1182_vm2, %v3128_v13 }
 0xbf3   :  { %3524 = vmatmul.msk.f32.gmra.mxu3 %vm1182_vm2, %v3129_v20 }
 0xbfb   :  { %3525 = vmatmul.msk.f32.gmra.mxu3 %vm1182_vm2, %v3130_v48 }
 0xc03   :  { %3526 = vmatmul.msk.f32.gmra.mxu3 %vm1182_vm2, %v3131_v54 }
 0xc0b   :  { %3527 = vmatmul.msk.f32.gmra.mxu3 %vm1182_vm2, %v3132_v4 }
 0xc13   :  { %3528 = vmatmul.msk.f32.gmra.mxu3 %vm1182_vm2, %v3133_v41 }
 0xc1b   :  { %3529 = vmatmul.msk.f32.gmra.mxu3 %vm1182_vm2, %v3134_v5 }
 0xc23   :  { %3530 = vmatmul.msk.f32.gmra.mxu3 %vm1182_vm2, %v3135_v24 }
 0xc2b   :  { %3531 = vmatmul.msk.f32.gmra.mxu3 %vm1182_vm2, %v3136_v51 }
 0xc33   :  { %3532 = vmatmul.msk.f32.gmra.mxu3 %vm1182_vm2, %v3137_v62 }
 0xc3b   :  { %3533 = vmatmul.msk.f32.gmra.mxu3 %vm1182_vm2, %v3138_v3 }
 0xc43   :  { %3534 = vmatmul.msk.f32.gmra.mxu3 %vm1182_vm2, %v3139_v9 }
 0xc4b   :  { %3535 = vmatmul.msk.f32.gmra.mxu3 %vm1182_vm2, %v3140_v55 }
 0xc53   :  { %3536 = vmatmul.msk.f32.gmra.mxu3 %vm1182_vm2, %v3141_v39 }
 0xc5b   :  { %3537 = vmatmul.msk.f32.gmra.mxu3 %vm1182_vm2, %v3142_v29 }
 0xc66   :  { %v3214_v37 = vpop.f32.mrf.mxu3 }
 0xc67   :  { %v3215_v2 = vadd.f32 %v3578_v11, %v3214_v37 }
 0xc69   :  { %3262 = vst [vmem:[#allocation5] sm:$0xff] %v3215_v2 }
 0xc6e   :  { %v3217_v50 = vpop.f32.mrf.mxu3 }
 0xc6f   :  { %v3218_v15 = vadd.f32 %v3578_v11, %v3217_v50 }
 0xc71   :  { %3263 = vst [vmem:[#allocation5 + $0x8] sm:$0xff] %v3218_v15 }
 0xc76   :  { %v3220_v44 = vpop.f32.mrf.mxu3 }
 0xc77   :  { %v3221_v34 = vadd.f32 %v3578_v11, %v3220_v44 }
 0xc79   :  { %3264 = vst [vmem:[#allocation5 + $0x10] sm:$0xff] %v3221_v34 }
 0xc7e   :  { %v3223_v17 = vpop.f32.mrf.mxu3 }
 0xc7f   :  { %v3224_v58 = vadd.f32 %v3578_v11, %v3223_v17 }
 0xc81   :  { %3265 = vst [vmem:[#allocation5 + $0x18] sm:$0xff] %v3224_v58 }
 0xc86   :  { %v3226_v47 = vpop.f32.mrf.mxu3 }
 0xc87   :  { %v3227_v30 = vadd.f32 %v3578_v11, %v3226_v47 }
 0xc89   :  { %3266 = vst [vmem:[#allocation5 + $0x20] sm:$0xff] %v3227_v30 }
 0xc8e   :  { %v3229_v26 = vpop.f32.mrf.mxu3 }
 0xc8f   :  { %v3230_v23 = vadd.f32 %v3578_v11, %v3229_v26 }
 0xc91   :  { %3267 = vst [vmem:[#allocation5 + $0x28] sm:$0xff] %v3230_v23 }
 0xc96   :  { %v3232_v36 = vpop.f32.mrf.mxu3 }
 0xc97   :  { %v3233_v25 = vadd.f32 %v3578_v11, %v3232_v36 }
 0xc99   :  { %3268 = vst [vmem:[#allocation5 + $0x30] sm:$0xff] %v3233_v25 }
 0xc9e   :  { %v3235_v61 = vpop.f32.mrf.mxu3 }
 0xc9f   :  { %v3236_v0 = vadd.f32 %v3578_v11, %v3235_v61 }
 0xca1   :  { %3269 = vst [vmem:[#allocation5 + $0x38] sm:$0xff] %v3236_v0 }
 0xca6   :  { %v3238_v1 = vpop.f32.mrf.mxu3 }
 0xca7   :  { %v3239_v56 = vadd.f32 %v3578_v11, %v3238_v1 }
 0xca9   :  { %3270 = vst [vmem:[#allocation5 + $0x40] sm:$0xff] %v3239_v56 }
 0xcae   :  { %v3241_v40 = vpop.f32.mrf.mxu3 }
 0xcaf   :  { %v3242_v33 = vadd.f32 %v3578_v11, %v3241_v40 }
 0xcb1   :  { %3271 = vst [vmem:[#allocation5 + $0x48] sm:$0xff] %v3242_v33 }
 0xcb6   :  { %v3244_v13 = vpop.f32.mrf.mxu3 }
 0xcb7   :  { %v3245_v28 = vadd.f32 %v3578_v11, %v3244_v13 }
 0xcb9   :  { %3272 = vst [vmem:[#allocation5 + $0x50] sm:$0xff] %v3245_v28 }
 0xcbe   :  { %v3247_v52 = vpop.f32.mrf.mxu3 }
 0xcbf   :  { %v3248_v20 = vadd.f32 %v3578_v11, %v3247_v52 }
 0xcc1   :  { %3273 = vst [vmem:[#allocation5 + $0x58] sm:$0xff] %v3248_v20 }
 0xcc6   :  { %v3250_v45 = vpop.f32.mrf.mxu3 }
 0xcc7   :  { %v3251_v60 = vadd.f32 %v3578_v11, %v3250_v45 }
 0xcc9   :  { %3274 = vst [vmem:[#allocation5 + $0x60] sm:$0xff] %v3251_v60 }
 0xcce   :  { %v3253_v48 = vpop.f32.mrf.mxu3 }
 0xccf   :  { %v3254_v12 = vadd.f32 %v3578_v11, %v3253_v48 }
 0xcd1   :  { %3275 = vst [vmem:[#allocation5 + $0x68] sm:$0xff] %v3254_v12 }
 0xcd6   :  { %v3256_v18 = vpop.f32.mrf.mxu3 }
 0xcd7   :  { %v3257_v54 = vadd.f32 %v3578_v11, %v3256_v18 }
 0xcd9   :  { %3276 = vst [vmem:[#allocation5 + $0x70] sm:$0xff] %v3257_v54 }
 0xcde   :  { %v3259_v49 = vpop.f32.mrf.mxu3 }
 0xcdf   :  { %v3260_v14 = vadd.f32 %v3578_v11, %v3259_v49 }
 0xce1   :  { %3277 = vst [vmem:[#allocation5 + $0x78] sm:$0xff] %v3260_v14 }
 0xce2   :  { %3290 = dma.vmem_to_hbm [thread:$0]  %s3283_s27, 2048, %s3285_s30, [#allocation3], %s3651_s5, %s3651_s5, %s3652_s6  }
 0xce3   :  { %3647 = dma.done.wait [#allocation3], 2048  }
 0xce4   :  { %3648 = vsyncadd [#allocation3], 4294965248 }
 0xce5   :  { %3295 = vsyncpa [#allocation3], 1 }
 0xce6   :  { %3296 = vsyncpa [#allocation4], 1 }

</bundles_post_ra>
